<compile_context>
chip_gen: v7x
topology: tpu7x:2x2x1
jax: 0.10.0
libtpu: 0.0.40
codegen_flags: <defaults>
</compile_context>

<pallas_src>
import math
import functools

import jax
import jax.numpy as jnp
from jax.experimental import pallas as pl
from jax.experimental.pallas import tpu as pltpu

VMEM_LIMIT = 48 * 1024 * 1024      # leave headroom on v7x (64 MiB physical per TensorCore)
NEG_INF = -1e30


def _round_up(a, b):
    return ((a + b - 1) // b) * b


def _cparams(sems):
    return pltpu.CompilerParams(dimension_semantics=sems, vmem_limit_bytes=VMEM_LIMIT)


# ----------------------------------------------------------------------------
# Generic fused linear kernel: y = epilogue(x @ w + b)
#   grid = (row_tiles, out_tiles, k_tiles); f32 VMEM accumulator; bf16 MXU operands;
#   epilogue: activation / residual-add / (grouped) LayerNorm / log-softmax.
# ----------------------------------------------------------------------------
def _make_linear_kernel(activation, has_residual, has_ln, ln_groups, logsoftmax):
    def kernel(*refs):
        idx = 0
        x_ref = refs[idx]; idx += 1
        w_ref = refs[idx]; idx += 1
        b_ref = refs[idx]; idx += 1
        r_ref = g_ref = beta_ref = None
        if has_residual:
            r_ref = refs[idx]; idx += 1
        if has_ln:
            g_ref = refs[idx]; beta_ref = refs[idx + 1]; idx += 2
        o_ref = refs[idx]
        acc_ref = refs[idx + 1]

        k = pl.program_id(2)

        @pl.when(k == 0)
        def _():
            acc_ref[...] = jnp.zeros_like(acc_ref)

        acc_ref[...] += jnp.dot(x_ref[...].astype(jnp.bfloat16),
                                w_ref[...].astype(jnp.bfloat16),
                                preferred_element_type=jnp.float32)

        @pl.when(k == pl.num_programs(2) - 1)
        def _():
            y = acc_ref[...] + b_ref[...]
            if activation == 'gelu':
                # TODO(synk): tanh-approx GELU; the reference repo's `gelu` helper may use erf.
                y = 0.5 * y * (1.0 + jnp.tanh(0.7978845608028654 * (y + 0.044715 * y * y * y)))
            elif activation == 'relu':
                y = jnp.maximum(y, 0.0)
            if has_residual:
                y = y + r_ref[...].astype(jnp.float32)
            if has_ln:
                dseg = y.shape[-1] // ln_groups
                segs = []
                for gi in range(ln_groups):
                    seg = y[:, gi * dseg:(gi + 1) * dseg]
                    mean = jnp.mean(seg, axis=-1, keepdims=True)
                    var = jnp.mean((seg - mean) ** 2, axis=-1, keepdims=True)
                    segs.append((seg - mean) * jax.lax.rsqrt(var + 1e-5)
                                * g_ref[...] + beta_ref[...])
                y = segs[0] if ln_groups == 1 else jnp.concatenate(segs, axis=-1)
            if logsoftmax:
                m = jnp.max(y, axis=-1, keepdims=True)
                s = y - m
                y = s - jnp.log(jnp.sum(jnp.exp(s), axis=-1, keepdims=True))
            o_ref[...] = y.astype(o_ref.dtype)

    return kernel


def pallas_linear(x, w, b=None, *, residual=None, ln=None, ln_groups=1, activation=None,
                  logsoftmax=False, out_dtype=jnp.float32, tm=256, tn=512, tk=2048):
    """y = epilogue(x @ w + b).  x: (..., Din) (any dtype, bf16 preferred), w: (Din, Dout) bf16."""
    lead = x.shape[:-1]
    din = x.shape[-1]
    dout = w.shape[-1]
    x2 = x.reshape(-1, din)
    n = x2.shape[0]

    full_n = (ln is not None) or (residual is not None) or logsoftmax
    TM = min(tm, _round_up(n, 8))
    rows_p = _round_up(n, TM)
    TN = dout if (full_n or dout <= tn) else tn
    dout_p = _round_up(dout, TN)
    TK = din if din <= tk else tk
    din_p = _round_up(din, TK)

    if rows_p > n:
        x2 = jnp.pad(x2, ((0, rows_p - n), (0, 0)))
    if din_p > din:
        x2 = jnp.pad(x2, ((0, 0), (0, din_p - din)))
        w = jnp.pad(w, ((0, din_p - din), (0, 0)))
    if dout_p > dout:
        w = jnp.pad(w, ((0, 0), (0, dout_p - dout)))
    w_bf = w if w.dtype == jnp.bfloat16 else w.astype(jnp.bfloat16)

    if b is None:
        b2 = jnp.zeros((1, dout_p), jnp.float32)
    else:
        b2 = b.reshape(1, dout).astype(jnp.float32)
        if dout_p > dout:
            b2 = jnp.pad(b2, ((0, 0), (0, dout_p - dout)))

    in_specs = [pl.BlockSpec((TM, TK), lambda i, j, k: (i, k)),
                pl.BlockSpec((TK, TN), lambda i, j, k: (k, j)),
                pl.BlockSpec((1, TN), lambda i, j, k: (0, j))]
    args = [x2, w_bf, b2]

    if residual is not None:
        r2 = residual.reshape(-1, dout)
        if rows_p > n:
            r2 = jnp.pad(r2, ((0, rows_p - n), (0, 0)))
        in_specs.append(pl.BlockSpec((TM, TN), lambda i, j, k: (i, j)))
        args.append(r2)
    if ln is not None:
        g, beta = ln
        dseg = dout // ln_groups
        in_specs.append(pl.BlockSpec((1, dseg), lambda i, j, k: (0, 0)))
        in_specs.append(pl.BlockSpec((1, dseg), lambda i, j, k: (0, 0)))
        args.append(g.reshape(1, dseg).astype(jnp.float32))
        args.append(beta.reshape(1, dseg).astype(jnp.float32))

    kernel = _make_linear_kernel(activation, residual is not None, ln is not None,
                                 ln_groups, logsoftmax)
    out = pl.pallas_call(
        kernel,
        grid=(rows_p // TM, dout_p // TN, din_p // TK),
        in_specs=in_specs,
        out_specs=pl.BlockSpec((TM, TN), lambda i, j, k: (i, j)),
        out_shape=jax.ShapeDtypeStruct((rows_p, dout_p), out_dtype),
        scratch_shapes=[pltpu.VMEM((TM, TN), jnp.float32)],
        compiler_params=_cparams(("parallel", "parallel", "arbitrary")),
    )(*args)
    return out[:n, :dout].reshape(*lead, dout)


# ----------------------------------------------------------------------------
# Row-tiled (grouped) LayerNorm / log-softmax (standalone, where fusion is impossible)
# ----------------------------------------------------------------------------
def _make_ln_kernel(groups):
    def kernel(x_ref, g_ref, b_ref, o_ref):
        x = x_ref[...].astype(jnp.float32)
        dseg = x.shape[-1] // groups
        segs = []
        for gi in range(groups):
            seg = x[:, gi * dseg:(gi + 1) * dseg]
            mean = jnp.mean(seg, axis=-1, keepdims=True)
            var = jnp.mean((seg - mean) ** 2, axis=-1, keepdims=True)
            segs.append((seg - mean) * jax.lax.rsqrt(var + 1e-5) * g_ref[...] + b_ref[...])
        y = segs[0] if groups == 1 else jnp.concatenate(segs, axis=-1)
        o_ref[...] = y.astype(o_ref.dtype)
    return kernel


def pallas_layernorm(x, g, b, groups=1, out_dtype=jnp.float32, tm=256):
    lead = x.shape[:-1]
    d = x.shape[-1]
    dseg = d // groups
    x2 = x.reshape(-1, d)
    n = x2.shape[0]
    TM = min(tm, _round_up(n, 8))
    rows_p = _round_up(n, TM)
    if rows_p > n:
        x2 = jnp.pad(x2, ((0, rows_p - n), (0, 0)))
    out = pl.pallas_call(
        _make_ln_kernel(groups),
        grid=(rows_p // TM,),
        in_specs=[pl.BlockSpec((TM, d), lambda i: (i, 0)),
                  pl.BlockSpec((1, dseg), lambda i: (0, 0)),
                  pl.BlockSpec((1, dseg), lambda i: (0, 0))],
        out_specs=pl.BlockSpec((TM, d), lambda i: (i, 0)),
        out_shape=jax.ShapeDtypeStruct((rows_p, d), out_dtype),
        compiler_params=_cparams(("parallel",)),
    )(x2, g.reshape(1, dseg).astype(jnp.float32), b.reshape(1, dseg).astype(jnp.float32))
    return out[:n].reshape(*lead, d)


def _logsoftmax_kernel(x_ref, o_ref):
    x = x_ref[...].astype(jnp.float32)
    m = jnp.max(x, axis=-1, keepdims=True)
    s = x - m
    o_ref[...] = (s - jnp.log(jnp.sum(jnp.exp(s), axis=-1, keepdims=True))).astype(o_ref.dtype)


def pallas_log_softmax(x, tm=256):
    # TODO(synk): large-vocab fallback only; small-vocab path fuses log-softmax into the logits.
    lead = x.shape[:-1]
    d = x.shape[-1]
    x2 = x.reshape(-1, d)
    n = x2.shape[0]
    TM = min(tm, _round_up(n, 8))
    rows_p = _round_up(n, TM)
    if rows_p > n:
        x2 = jnp.pad(x2, ((0, rows_p - n), (0, 0)))
    out = pl.pallas_call(
        _logsoftmax_kernel,
        grid=(rows_p // TM,),
        in_specs=[pl.BlockSpec((TM, d), lambda i: (i, 0))],
        out_specs=pl.BlockSpec((TM, d), lambda i: (i, 0)),
        out_shape=jax.ShapeDtypeStruct((rows_p, d), jnp.float32),
        compiler_params=_cparams(("parallel",)),
    )(x2)
    return out[:n].reshape(*lead, d)


# ----------------------------------------------------------------------------
# Dynamic-projection chunk compression (softmax over chunk positions fused with the
# per-head weighted sum on the VPU; chunk-tiled grid; merged-head lane-packed output).
# ----------------------------------------------------------------------------
def _make_compress_kernel(n_heads, cr, dh, dx):
    def kernel(s_ref, x_ref, o_ref):
        s = s_ref[...].astype(jnp.float32)                  # (TC, cs, n_heads*cr)
        x = x_ref[...].astype(jnp.float32)                  # (TC, cs, dx)
        m = jnp.max(s, axis=1, keepdims=True)
        p = jnp.exp(s - m)
        p = p / jnp.sum(p, axis=1, keepdims=True)
        for h in range(n_heads):
            xh = x[:, :, h * dh:(h + 1) * dh]               # (TC, cs, dh)
            for r in range(cr):
                w = p[:, :, h * cr + r:h * cr + r + 1]      # (TC, cs, 1)
                o_ref[:, r * dx + h * dh:r * dx + (h + 1) * dh] = (
                    jnp.sum(w * xh, axis=1).astype(o_ref.dtype))
    return kernel


def pallas_compress(x, scores, n_heads, cs, cr, out_dtype=jnp.bfloat16):
    """x: (B, L, n_heads*dh), scores: (B, L, n_heads*cr) -> (B, (L//cs)*cr, n_heads*dh)."""
    B, L, dx = x.shape
    dh = dx // n_heads
    NC = L // cs
    x4 = x.reshape(B, NC, cs, dx)
    s4 = scores.reshape(B, NC, cs, n_heads * cr)
    TC = 8 if NC % 8 == 0 else NC
    out = pl.pallas_call(
        _make_compress_kernel(n_heads, cr, dh, dx),
        grid=(B, NC // TC),
        in_specs=[pl.BlockSpec((None, TC, cs, n_heads * cr), lambda b, c: (b, c, 0, 0)),
                  pl.BlockSpec((None, TC, cs, dx), lambda b, c: (b, c, 0, 0))],
        out_specs=pl.BlockSpec((None, TC, cr * dx), lambda b, c: (b, c, 0)),
        out_shape=jax.ShapeDtypeStruct((B, NC, cr * dx), out_dtype),
        compiler_params=_cparams(("parallel", "parallel")),
    )(s4, x4)
    return out.reshape(B, NC * cr, dx)


# ----------------------------------------------------------------------------
# Per-head chunk positional scores: pos[:, h] = (q_h + r_w_bias_h) @ pe_c_h  (all heads per step)
# ----------------------------------------------------------------------------
def _make_chunk_pos_kernel(nh, dh, ncv):
    def kernel(q_ref, pe_ref, bias_ref, o_ref):
        q = q_ref[...]                      # (tq, D) bf16
        pe = pe_ref[...]                    # (D, ncv) bf16, head-major rows
        bias = bias_ref[...]                # (1, D) f32 (pre-scaled)
        for h in range(nh):
            sl = slice(h * dh, (h + 1) * dh)
            qh = (q[:, sl].astype(jnp.float32) + bias[:, sl]).astype(jnp.bfloat16)
            pos = jnp.dot(qh, pe[sl, :], preferred_element_type=jnp.float32)
            o_ref[:, h * ncv:(h + 1) * ncv] = pos.astype(o_ref.dtype)
    return kernel


def pallas_chunk_pos(q, pe_c, rwb, nh, tq):
    B, Mp, D = q.shape
    dh = D // nh
    ncv = pe_c.shape[-1]
    return pl.pallas_call(
        _make_chunk_pos_kernel(nh, dh, ncv),
        grid=(B, Mp // tq),
        in_specs=[pl.BlockSpec((None, tq, D), lambda b, i: (b, i, 0)),
                  pl.BlockSpec((D, ncv), lambda b, i: (0, 0)),
                  pl.BlockSpec((1, D), lambda b, i: (0, 0))],
        out_specs=pl.BlockSpec((None, tq, nh * ncv), lambda b, i: (b, i, 0)),
        out_shape=jax.ShapeDtypeStruct((B, Mp, nh * ncv), jnp.bfloat16),
        compiler_params=_cparams(("parallel", "parallel")),
    )(q, pe_c, rwb)


# ----------------------------------------------------------------------------
# Fused banded long-short attention (all heads per (batch, query-tile) step):
#   per head: content scores against two tq-tall key slab halves + in-kernel window
#   relative-position band (pe matmul + skew + iota mask), compressed-chunk scores with the
#   precomputed (rel-shifted, causally masked) chunk bias, merged softmax, three PV matmuls.
# ----------------------------------------------------------------------------
def _make_ls_attn_kernel(nh, dh, tq, wlen, ncv):
    def kernel(q_ref, k0_ref, k1_ref, v0_ref, v1_ref, kc_ref, vc_ref, cb_ref,
               pe_ref, rrb_ref, o_ref):
        q = q_ref[...]                  # (tq, D) bf16
        k0 = k0_ref[...]
        k1 = k1_ref[...]
        v0 = v0_ref[...]
        v1 = v1_ref[...]
        kc = kc_ref[...]                # (ncv, D) bf16
        vc = vc_ref[...]
        cb = cb_ref[...]                # (tq, nh*ncv) bf16
        pe = pe_ref[...]                # (D, wlen) bf16, head-major rows
        rrb = rrb_ref[...]              # (1, D) f32 (pre-scaled)

        # Band validity for the 2*tq key slab: key slab column c is valid for query row r iff
        # 0 <= c - r - 1 < wlen  (causal window of length wlen including self).
        r_idx = jax.lax.broadcasted_iota(jnp.int32, (tq, 2 * tq), 0)
        c_idx = jax.lax.broadcasted_iota(jnp.int32, (tq, 2 * tq), 1)
        j_rel = c_idx - r_idx - 1
        band_ok = (j_rel >= 0) & (j_rel < wlen)
        diag_masks = [j_rel == j for j in range(wlen)] if wlen <= 32 else None

        dims_t = (((1,), (1,)), ((), ()))   # contract last dims (A @ B.T)

        for h in range(nh):
            sl = slice(h * dh, (h + 1) * dh)
            q_h = q[:, sl]

            # window relative-position term, skewed onto the slab (wraparound is masked)
            pos = jnp.dot((q_h.astype(jnp.float32) + rrb[:, sl]).astype(jnp.bfloat16),
                          pe[sl, :], preferred_element_type=jnp.float32)       # (tq, wlen)
            if diag_masks is not None:
                skew = jnp.zeros((tq, 2 * tq), jnp.float32)
                for j in range(wlen):
                    skew = skew + jnp.where(diag_masks[j], pos[:, j:j + 1], 0.0)
            else:
                pos_pad = jnp.concatenate(
                    [pos, jnp.zeros((tq, 2 * tq - wlen), jnp.float32)], axis=1)
                skew = pltpu.roll(pos_pad, shift=1, axis=1, stride=1, stride_axis=0)
            wbias = jnp.where(band_ok, skew, NEG_INF)

            s0 = jax.lax.dot_general(q_h, k0[:, sl], dims_t,
                                     preferred_element_type=jnp.float32) + wbias[:, :tq]
            s1 = jax.lax.dot_general(q_h, k1[:, sl], dims_t,
                                     preferred_element_type=jnp.float32) + wbias[:, tq:]
            sc = (jax.lax.dot_general(q_h, kc[:, sl], dims_t,
                                      preferred_element_type=jnp.float32)
                  + cb[:, h * ncv:(h + 1) * ncv].astype(jnp.float32))

            m = jnp.maximum(jnp.maximum(jnp.max(s0, axis=-1, keepdims=True),
                                        jnp.max(s1, axis=-1, keepdims=True)),
                            jnp.max(sc, axis=-1, keepdims=True))
            e0 = jnp.exp(s0 - m)
            e1 = jnp.exp(s1 - m)
            ec = jnp.exp(sc - m)
            denom = (jnp.sum(e0, axis=-1, keepdims=True)
                     + jnp.sum(e1, axis=-1, keepdims=True)
                     + jnp.sum(ec, axis=-1, keepdims=True))
            o_h = (jnp.dot(e0.astype(jnp.bfloat16), v0[:, sl], preferred_element_type=jnp.float32)
                   + jnp.dot(e1.astype(jnp.bfloat16), v1[:, sl], preferred_element_type=jnp.float32)
                   + jnp.dot(ec.astype(jnp.bfloat16), vc[:, sl], preferred_element_type=jnp.float32))
            o_h = o_h * pl.reciprocal(denom, approx=True)
            o_ref[:, sl] = o_h.astype(o_ref.dtype)
    return kernel


def pallas_ls_attention(q, k_win, v_win, k_comp, v_comp, cbias, pe_w, rrb, nh, wlen, tq):
    # TODO(synk): window K/V tiles are DMA'd twice (k0/k1 halves); overlapping blocks are not
    # expressible with plain BlockSpecs.
    B, Mp, D = q.shape
    dh = D // nh
    ncv = k_comp.shape[1]
    qmap = lambda b, i: (b, i, 0)
    k1map = lambda b, i: (b, i + 1, 0)
    cmap = lambda b, i: (b, 0, 0)
    return pl.pallas_call(
        _make_ls_attn_kernel(nh, dh, tq, wlen, ncv),
        grid=(B, Mp // tq),
        in_specs=[pl.BlockSpec((None, tq, D), qmap),
                  pl.BlockSpec((None, tq, D), qmap),
                  pl.BlockSpec((None, tq, D), k1map),
                  pl.BlockSpec((None, tq, D), qmap),
                  pl.BlockSpec((None, tq, D), k1map),
                  pl.BlockSpec((None, ncv, D), cmap),
                  pl.BlockSpec((None, ncv, D), cmap),
                  pl.BlockSpec((None, tq, nh * ncv), qmap),
                  pl.BlockSpec((D, wlen), lambda b, i: (0, 0)),
                  pl.BlockSpec((1, D), lambda b, i: (0, 0))],
        out_specs=pl.BlockSpec((None, tq, D), qmap),
        out_shape=jax.ShapeDtypeStruct((B, Mp, D), jnp.bfloat16),
        compiler_params=_cparams(("parallel", "parallel")),
    )(q, k_win, k_win, v_win, v_win, k_comp, v_comp, cbias, pe_w, rrb)


# ----------------------------------------------------------------------------
# Model pieces (glue in plain JAX, compute routed through the kernels above)
# ----------------------------------------------------------------------------
def positional_embedding(pos_seq, d_model):
    inv_freq = 1.0 / (10000.0 ** (jnp.arange(0, d_model, 2, dtype=jnp.float32) / d_model))
    sinusoid = jnp.outer(pos_seq, inv_freq)
    return jnp.concatenate([jnp.sin(sinusoid), jnp.cos(sinusoid)], axis=-1)[None]


def _select_tq(wlen, m):
    return _round_up(max(wlen, min(m, 256)), 8)


def build_chunk_bias(pos_c, cs, cr, m_real, n_mem_chunks):
    # TODO(synk): chunk-granular Transformer-XL relative shift (approximation of _rel_shift_chunked).
    B, Mp, nh, ncv = pos_c.shape
    n_q_chunks = max(m_real // cs, 1)
    t = jnp.arange(Mp)
    qi = jnp.minimum(t // cs, n_q_chunks - 1)
    shift = (n_q_chunks - 1 - qi) * cr
    src = jnp.arange(ncv)[None, :] + shift[:, None]
    valid = src < ncv
    src = jnp.minimum(src, ncv - 1)
    idx = jnp.broadcast_to(src[None, :, None, :], (B, Mp, nh, ncv))
    g = jnp.take_along_axis(pos_c, idx, axis=-1)
    g = jnp.where(valid[None, :, None, :], g, jnp.zeros((), pos_c.dtype))
    kcol = jnp.arange(ncv) // cr
    masked = kcol[None, :] >= (qi[:, None] + n_mem_chunks)
    return jnp.where(masked[None, :, None, :], jnp.asarray(NEG_INF, pos_c.dtype), g)


def attn_core(p, h, h_cache_l, key_pe, pos_emb_win, n_mem_chunks, cfg):
    """ChunkedLSAttention minus the output projection (fused upstream with residual + LN)."""
    B, M, D = h.shape
    nh, cs, cr, wlen = cfg['n_head'], cfg['chunk_size'], cfg['chunk_rank'], cfg['window_len']
    dh = D // nh
    bf16 = jnp.bfloat16

    # --- fused [q*scale | k | v | dconv1] projection over the block (single read of h) ---
    qkvs = pallas_linear(h, p['qkvs_w'], p['qkvs_b'], out_dtype=bf16)
    q = qkvs[..., :D]                                 # 1/sqrt(dh) folded into the weight
    kv_raw = qkvs[..., D:3 * D]                       # [key_bp | val_bp], bf16
    scores_blk = qkvs[..., 3 * D:]                    # (B, M, nh*cr)

    # --- window keys/values: one grouped-LN pass over [k|v]; fused K/V (+LN) on the cache window ---
    kv_blk_ln = pallas_layernorm(kv_raw, p['ln_win_g'], p['ln_win_b'], groups=2, out_dtype=bf16)
    hc_win = h_cache_l[:, -wlen:]
    kv_cwin = pallas_linear(hc_win, p['kv_w'], ln=(p['ln_win_g'], p['ln_win_b']),
                            ln_groups=2, out_dtype=bf16)
    k_win = jnp.concatenate([kv_cwin[..., :D], kv_blk_ln[..., :D]], axis=1)   # (B, wlen+M, D)
    v_win = jnp.concatenate([kv_cwin[..., D:], kv_blk_ln[..., D:]], axis=1)

    # --- compressed cache K/V: compress hidden -> fused K/V projection + grouped LN ---
    sc_cache = pallas_linear(h_cache_l, p['dconv1_w'], p['dconv1_b'], out_dtype=bf16)
    hc_merge = pallas_compress(h_cache_l, sc_cache, nh, cs, cr, out_dtype=bf16)
    kv_cache = pallas_linear(hc_merge, p['kv_w'], ln=(p['ln_dproj_g'], p['ln_dproj_b']),
                             ln_groups=2, out_dtype=bf16)

    # --- compressed block K/V: compress projected k and v together (duplicated scores) ---
    scores2 = jnp.concatenate([scores_blk, scores_blk], axis=-1)
    kv_blk_c = pallas_compress(kv_raw, scores2, 2 * nh, cs, cr, out_dtype=bf16)
    kv_blk_c = pallas_layernorm(kv_blk_c, p['ln_dproj_g'], p['ln_dproj_b'],
                                groups=2, out_dtype=bf16)

    k_comp = jnp.concatenate([kv_cache[..., :D], kv_blk_c[..., :D]], axis=1)  # (B, ncv, D)
    v_comp = jnp.concatenate([kv_cache[..., D:], kv_blk_c[..., D:]], axis=1)
    ncv = k_comp.shape[1]

    # --- per-head relative-position tables (small, head-shared, head-major rows) ---
    pe_w = pallas_linear(pos_emb_win[0], p['rnet_w'])
    pe_w = pe_w.reshape(wlen, nh, dh).transpose(1, 2, 0).reshape(D, wlen).astype(bf16)
    pe_c = pallas_linear(key_pe[0], p['rnetc_w'], p['rnetc_b'])
    pe_c = pe_c.reshape(ncv, nh, dh).transpose(1, 2, 0).reshape(D, ncv).astype(bf16)

    # --- query-tile padding so the banded kernel gets aligned blocks ---
    tq = _select_tq(wlen, M)
    Mp = _round_up(M, tq)
    if Mp > M:
        q = jnp.pad(q, ((0, 0), (0, Mp - M), (0, 0)))
    pad_k = (Mp + tq) - (wlen + M)
    if pad_k > 0:
        k_win = jnp.pad(k_win, ((0, 0), (0, pad_k), (0, 0)))
        v_win = jnp.pad(v_win, ((0, 0), (0, pad_k), (0, 0)))

    # --- chunk positional scores (+ JAX rel-shift & causal mask as a bf16 stream) ---
    pos_c = pallas_chunk_pos(q, pe_c, p['r_w_bias_scaled'], nh, tq)           # (B, Mp, nh*ncv)
    cbias = build_chunk_bias(pos_c.reshape(B, Mp, nh, ncv), cs, cr, M, n_mem_chunks)
    cbias = cbias.reshape(B, Mp, nh * ncv)

    # --- fused banded attention: window bias built in-kernel, merged softmax, PV fused ---
    attn = pallas_ls_attention(q, k_win, v_win, k_comp, v_comp, cbias, pe_w,
                               p['r_r_bias_scaled'], nh, wlen, tq)            # (B, Mp, D) bf16
    return attn[:, :M]


def layer_forward(p, h, h_cache_l, key_pe, pos_emb_win, n_mem_chunks, cfg):
    act = 'gelu' if cfg['use_gelu'] else 'relu'
    if cfg['pre_ln']:
        h_in = pallas_layernorm(h, p['norm1_g'], p['norm1_b'])
        hc_in = pallas_layernorm(h_cache_l, p['norm1_g'], p['norm1_b'])
        attn = attn_core(p, h_in, hc_in, key_pe, pos_emb_win, n_mem_chunks, cfg)
        h1 = pallas_linear(attn, p['o_w'], residual=h_in)
        h2 = pallas_layernorm(h1, p['norm2_g'], p['norm2_b'])
        ff1 = pallas_linear(h2, p['fc1_w'], p['fc1_b'], activation=act,
                            out_dtype=jnp.bfloat16, tm=512)
        out = pallas_linear(ff1, p['fc2_w'], p['fc2_b'], residual=h2, tm=512)
    else:
        attn = attn_core(p, h, h_cache_l, key_pe, pos_emb_win, n_mem_chunks, cfg)
        h1 = pallas_linear(attn, p['o_w'], residual=h, ln=(p['norm1_g'], p['norm1_b']))
        ff1 = pallas_linear(h1, p['fc1_w'], p['fc1_b'], activation=act,
                            out_dtype=jnp.bfloat16, tm=512)
        out = pallas_linear(ff1, p['fc2_w'], p['fc2_b'], residual=h1,
                            ln=(p['norm2_g'], p['norm2_b']), tm=512)
    return out


def model_forward(params, x, h_cache, cfg):
    cs, wlen, D = cfg['chunk_size'], cfg['window_len'], cfg['d_model']
    cr, mem_len = cfg['chunk_rank'], cfg['mem_len']
    B, T = x.shape
    padded = False
    orig_T = T
    if cs > 0 and T % cs:
        pad_multip = abs(cs * wlen) // math.gcd(cs, wlen)
        n_pad = pad_multip - T % pad_multip
        x = jnp.pad(x, ((0, 0), (0, n_pad)))
        padded = True
    block_size = x.shape[1]

    h = params['emb'][x] * (D ** 0.5)                                       # (B, T, D)
    mlen = h_cache[0].shape[1]
    klen = h.shape[1] + mlen

    pos_seq = jnp.arange(wlen - 1, -1, -1.0, dtype=jnp.float32)
    n_chunk_vecs = klen // cs * cr
    n_mem_chunks = mlen // cs

    pos_chunk_ids = jnp.arange(n_chunk_vecs - 1, -1, -1.0, dtype=jnp.float32)
    if cfg['cpos_clamp_len'] > 0:
        pos_chunk_ids = jnp.minimum(pos_chunk_ids, cfg['cpos_clamp_len'])
    pos_chunks = positional_embedding(pos_chunk_ids, D)                     # (1, ncv, D)
    if cfg['clamp_len'] > 0:
        pos_seq = jnp.minimum(pos_seq, cfg['clamp_len'])
    pos_emb = positional_embedding(pos_seq, D)                              # (1, wlen, D)

    h_cache_next = []
    for l in range(cfg['n_layer']):
        cache_size = mem_len
        if cache_size > block_size:
            h_cache_next_l = jnp.concatenate(
                [h_cache[l][:, -cache_size + block_size:, :], h], axis=1)
        else:
            h_cache_next_l = h[:, -cache_size:, :]
        h_cache_next.append(h_cache_next_l)
        h = layer_forward(params['layers'][l], h, h_cache[l], pos_chunks, pos_emb,
                          n_mem_chunks, cfg)

    # Tied output embedding (pre-transposed, bf16): logits + log-softmax fused for small vocab.
    V = cfg['vocab_size']
    if V <= 4096:
        out = pallas_linear(h, params['emb_T'], params['out_bias'], logsoftmax=True, tm=512)
    else:
        # TODO(synk): large-vocab path uses vocab-tiled logits + row-tiled log-softmax (two passes).
        logits = pallas_linear(h, params['emb_T'], params['out_bias'], tm=512)
        out = pallas_log_softmax(logits)
    if padded:
        out = out[:, :orig_T]
    return out, h_cache_next, None


# ----------------------------------------------------------------------------
# Deterministic synthetic init (mirrors _init_weights: normal(0, 0.02), LN weight ~ normal(1, 0.02),
# biases zero).  Matmul weights are pre-fused / pre-scaled / pre-cast to bf16 once (incl. tied emb.T).
# ----------------------------------------------------------------------------
def init_params(key, cfg):
    D, V = cfg['d_model'], cfg['vocab_size']
    nh, cr, Dn, L = cfg['n_head'], cfg['chunk_rank'], cfg['d_inner'], cfg['n_layer']
    dh = D // nh
    scale = 1.0 / math.sqrt(dh)
    std = 0.02
    bf16 = jnp.bfloat16
    keys = iter(jax.random.split(key, 64 * (L + 1)))

    def nrm(shape):
        return std * jax.random.normal(next(keys), shape, jnp.float32)

    emb = nrm((V, D))
    params = {'emb': emb,
              'emb_T': emb.T.astype(bf16),
              'out_bias': jnp.zeros((V,), jnp.float32),
              'layers': []}
    for _ in range(L):
        q_w, k_w, v_w = nrm((D, D)), nrm((D, D)), nrm((D, D))
        dconv1_w = nrm((D, nh * cr))
        dconv1_b = jnp.zeros((nh * cr,), jnp.float32)
        lp = {
            'qkvs_w': jnp.concatenate([q_w * scale, k_w, v_w, dconv1_w], axis=1).astype(bf16),
            'qkvs_b': jnp.concatenate([jnp.zeros((3 * D,), jnp.float32), dconv1_b]),
            'kv_w': jnp.concatenate([k_w, v_w], axis=1).astype(bf16),
            'dconv1_w': dconv1_w.astype(bf16), 'dconv1_b': dconv1_b,
            'rnet_w': nrm((D, D)).astype(bf16),
            'rnetc_w': nrm((D, D)).astype(bf16), 'rnetc_b': jnp.zeros((D,), jnp.float32),
            'r_r_bias_scaled': (nrm((nh, dh)) * scale).reshape(1, D),
            'r_w_bias_scaled': (nrm((nh, dh)) * scale).reshape(1, D),
            'o_w': nrm((D, D)).astype(bf16),
            'ln_dproj_g': 1.0 + nrm((D,)), 'ln_dproj_b': jnp.zeros((D,), jnp.float32),
            'ln_win_g': 1.0 + nrm((D,)), 'ln_win_b': jnp.zeros((D,), jnp.float32),
            'norm1_g': 1.0 + nrm((D,)), 'norm1_b': jnp.zeros((D,), jnp.float32),
            'norm2_g': 1.0 + nrm((D,)), 'norm2_b': jnp.zeros((D,), jnp.float32),
            'fc1_w': nrm((D, Dn)).astype(bf16), 'fc1_b': jnp.zeros((Dn,), jnp.float32),
            'fc2_w': nrm((Dn, D)).astype(bf16), 'fc2_b': jnp.zeros((D,), jnp.float32),
        }
        params['layers'].append(lp)
    return params


if __name__ == "__main__":
    cfg = dict(vocab_size=64, d_model=32, d_inner=64, n_head=2, n_layer=2,
               mem_len=8, chunk_rank=1, chunk_size=4, window_len=4,
               pre_ln=False, use_gelu=True, clamp_len=-1, cpos_clamp_len=-1)

    key = jax.random.PRNGKey(0)
    kp, kx, kc = jax.random.split(key, 3)
    params = init_params(kp, cfg)

    B, T = 2, 8
    x = jax.random.randint(kx, (B, T), 0, cfg['vocab_size'], dtype=jnp.int32)
    h_cache = [0.02 * jax.random.normal(jax.random.fold_in(kc, l),
                                        (B, cfg['mem_len'], cfg['d_model']), jnp.float32)
               for l in range(cfg['n_layer'])]

    fwd = jax.jit(functools.partial(model_forward, cfg=cfg))
    out, h_cache_next, _ = fwd(params, x, h_cache)
    out = jax.block_until_ready(out)
    jax.block_until_ready(h_cache_next)

    assert out.shape == (B, T, cfg['vocab_size'])
    assert all(c.shape == (B, cfg['mem_len'], cfg['d_model']) for c in h_cache_next)
    assert bool(jnp.all(jnp.isfinite(out)))
    # log-softmax rows should normalize to 1 in probability space
    assert bool(jnp.allclose(jnp.sum(jnp.exp(out), axis=-1), 1.0, atol=1e-3))
    print("KERNEL_OK")
</pallas_src>

<mosaic_0001>
module attributes {stable_mosaic.version = 11 : i64} {
  func.func @kernel(%arg0: i32, %arg1: i32, %arg2: i32, %arg3: memref<16x32xf32, #tpu.memory_space<vmem>>, %arg4: memref<32x98xbf16, #tpu.memory_space<vmem>>, %arg5: memref<1x98xf32, #tpu.memory_space<vmem>>, %arg6: memref<16x98xbf16, #tpu.memory_space<vmem>>, %arg7: memref<16x98xf32, #tpu.memory_space<vmem>>) attributes {dimension_semantics = [#tpu.dimension_semantics<parallel>, #tpu.dimension_semantics<parallel>, #tpu.dimension_semantics<arbitrary>], iteration_bounds = array<i64: 1, 1, 1>, scalar_prefetch = 0 : i64, scratch_operands = 1 : i64, tpu.core_type = #tpu.core_type<tc>, window_params = [{transform_indices = @transform_0, window_bounds = array<i64: 16, 32>}, {transform_indices = @transform_1, window_bounds = array<i64: 32, 98>}, {transform_indices = @transform_2, window_bounds = array<i64: 1, 98>}, {transform_indices = @transform_3, window_bounds = array<i64: 16, 98>}]} {
    %c0_i32 = arith.constant 0 : i32
    %0 = arith.cmpi eq, %arg2, %c0_i32 : i32
    %1 = arith.extui %0 : i1 to i32
    %c0_i32_0 = arith.constant 0 : i32
    %2 = arith.cmpi ne, %1, %c0_i32_0 : i32
    scf.if %2 {
      %cst_10 = arith.constant 0.000000e+00 : f32
      %13 = vector.broadcast %cst_10 : f32 to vector<16x98xf32>
      %c0_11 = arith.constant 0 : index
      %c0_12 = arith.constant 0 : index
      %14 = vector.load %arg7[%c0_11, %c0_12] : memref<16x98xf32, #tpu.memory_space<vmem>>, vector<16x98xf32>
      tpu.vector_store %arg7[%c0_11, %c0_12], %13 {strides = array<i32>} : memref<16x98xf32, #tpu.memory_space<vmem>>, vector<16x98xf32>,
    } else {
    }
    %c0 = arith.constant 0 : index
    %c0_1 = arith.constant 0 : index
    %3 = vector.load %arg7[%c0, %c0_1] : memref<16x98xf32, #tpu.memory_space<vmem>>, vector<16x98xf32>
    %c0_2 = arith.constant 0 : index
    %c0_3 = arith.constant 0 : index
    %4 = vector.load %arg3[%c0_2, %c0_3] : memref<16x32xf32, #tpu.memory_space<vmem>>, vector<16x32xf32>
    %5 = arith.truncf %4 : vector<16x32xf32> to vector<16x32xbf16>
    %c0_4 = arith.constant 0 : index
    %c0_5 = arith.constant 0 : index
    %6 = vector.load %arg4[%c0_4, %c0_5] : memref<32x98xbf16, #tpu.memory_space<vmem>>, vector<32x98xbf16>
    %cst = arith.constant dense<0.000000e+00> : vector<16x98xf32>
    %7 = tpu.matmul %5, %6, %cst {dimension_numbers = #tpu.dot_dimension_numbers<[1], [0], [0], [1], [0, 0, 1, 1], [], []>} : vector<16x32xbf16>, vector<32x98xbf16>, vector<16x98xf32> -> vector<16x98xf32>
    %8 = arith.addf %3, %7 : vector<16x98xf32>
    %c0_6 = arith.constant 0 : index
    %c0_7 = arith.constant 0 : index
    %9 = vector.load %arg7[%c0_6, %c0_7] : memref<16x98xf32, #tpu.memory_space<vmem>>, vector<16x98xf32>
    tpu.vector_store %arg7[%c0_6, %c0_7], %8 {strides = array<i32>} : memref<16x98xf32, #tpu.memory_space<vmem>>, vector<16x98xf32>,
    %c0_i32_8 = arith.constant 0 : i32
    %10 = arith.cmpi eq, %arg2, %c0_i32_8 : i32
    %11 = arith.extui %10 : i1 to i32
    %c0_i32_9 = arith.constant 0 : i32
    %12 = arith.cmpi ne, %11, %c0_i32_9 : i32
    scf.if %12 {
      %c0_10 = arith.constant 0 : index
      %c0_11 = arith.constant 0 : index
      %13 = vector.load %arg7[%c0_10, %c0_11] : memref<16x98xf32, #tpu.memory_space<vmem>>, vector<16x98xf32>
      %c0_12 = arith.constant 0 : index
      %c0_13 = arith.constant 0 : index
      %14 = vector.load %arg5[%c0_12, %c0_13] : memref<1x98xf32, #tpu.memory_space<vmem>>, vector<1x98xf32>
      %15 = vector.broadcast %14 : vector<1x98xf32> to vector<16x98xf32>
      %16 = arith.addf %13, %15 : vector<16x98xf32>
      %17 = arith.truncf %16 : vector<16x98xf32> to vector<16x98xbf16>
      %c0_14 = arith.constant 0 : index
      %c0_15 = arith.constant 0 : index
      %18 = vector.load %arg6[%c0_14, %c0_15] : memref<16x98xbf16, #tpu.memory_space<vmem>>, vector<16x98xbf16>
      tpu.vector_store %arg6[%c0_14, %c0_15], %17 {strides = array<i32>} : memref<16x98xbf16, #tpu.memory_space<vmem>>, vector<16x98xbf16>,
    } else {
    }
    return
  }
  func.func @transform_0(%arg0: i32, %arg1: i32, %arg2: i32) -> (i32, i32) {
    %c0_i32 = arith.constant 0 : i32
    return %arg0, %arg2 : i32, i32
  }
  func.func @transform_1(%arg0: i32, %arg1: i32, %arg2: i32) -> (i32, i32) {
    %c0_i32 = arith.constant 0 : i32
    return %arg2, %arg1 : i32, i32
  }
  func.func @transform_2(%arg0: i32, %arg1: i32, %arg2: i32) -> (i32, i32) {
    %c0_i32 = arith.constant 0 : i32
    %c0_i32_0 = arith.constant 0 : i32
    return %c0_i32, %arg1 : i32, i32
  }
  func.func @transform_3(%arg0: i32, %arg1: i32, %arg2: i32) -> (i32, i32) {
    %c0_i32 = arith.constant 0 : i32
    return %arg0, %arg1 : i32, i32
  }
}

module attributes {stable_mosaic.version = 11 : i64} {
  func.func @kernel(%arg0: i32, %arg1: i32, %arg2: i32, %arg3: memref<8x32xf32, #tpu.memory_space<vmem>>, %arg4: memref<32x32xbf16, #tpu.memory_space<vmem>>, %arg5: memref<1x32xf32, #tpu.memory_space<vmem>>, %arg6: memref<8x32xf32, #tpu.memory_space<vmem>>, %arg7: memref<8x32xf32, #tpu.memory_space<vmem>>) attributes {dimension_semantics = [#tpu.dimension_semantics<parallel>, #tpu.dimension_semantics<parallel>, #tpu.dimension_semantics<arbitrary>], iteration_bounds = array<i64: 1, 1, 1>, scalar_prefetch = 0 : i64, scratch_operands = 1 : i64, tpu.core_type = #tpu.core_type<tc>, window_params = [{transform_indices = @transform_0, window_bounds = array<i64: 8, 32>}, {transform_indices = @transform_1, window_bounds = array<i64: 32, 32>}, {transform_indices = @transform_2, window_bounds = array<i64: 1, 32>}, {transform_indices = @transform_3, window_bounds = array<i64: 8, 32>}]} {
    %c0_i32 = arith.constant 0 : i32
    %0 = arith.cmpi eq, %arg2, %c0_i32 : i32
    %1 = arith.extui %0 : i1 to i32
    %c0_i32_0 = arith.constant 0 : i32
    %2 = arith.cmpi ne, %1, %c0_i32_0 : i32
    scf.if %2 {
      %cst_10 = arith.constant 0.000000e+00 : f32
      %13 = vector.broadcast %cst_10 : f32 to vector<8x32xf32>
      %c0_11 = arith.constant 0 : index
      %c0_12 = arith.constant 0 : index
      %14 = vector.load %arg7[%c0_11, %c0_12] : memref<8x32xf32, #tpu.memory_space<vmem>>, vector<8x32xf32>
      tpu.vector_store %arg7[%c0_11, %c0_12], %13 {strides = array<i32>} : memref<8x32xf32, #tpu.memory_space<vmem>>, vector<8x32xf32>,
    } else {
    }
    %c0 = arith.constant 0 : index
    %c0_1 = arith.constant 0 : index
    %3 = vector.load %arg7[%c0, %c0_1] : memref<8x32xf32, #tpu.memory_space<vmem>>, vector<8x32xf32>
    %c0_2 = arith.constant 0 : index
    %c0_3 = arith.constant 0 : index
    %4 = vector.load %arg3[%c0_2, %c0_3] : memref<8x32xf32, #tpu.memory_space<vmem>>, vector<8x32xf32>
    %5 = arith.truncf %4 : vector<8x32xf32> to vector<8x32xbf16>
    %c0_4 = arith.constant 0 : index
    %c0_5 = arith.constant 0 : index
    %6 = vector.load %arg4[%c0_4, %c0_5] : memref<32x32xbf16, #tpu.memory_space<vmem>>, vector<32x32xbf16>
    %cst = arith.constant dense<0.000000e+00> : vector<8x32xf32>
    %7 = tpu.matmul %5, %6, %cst {dimension_numbers = #tpu.dot_dimension_numbers<[1], [0], [0], [1], [0, 0, 1, 1], [], []>} : vector<8x32xbf16>, vector<32x32xbf16>, vector<8x32xf32> -> vector<8x32xf32>
    %8 = arith.addf %3, %7 : vector<8x32xf32>
    %c0_6 = arith.constant 0 : index
    %c0_7 = arith.constant 0 : index
    %9 = vector.load %arg7[%c0_6, %c0_7] : memref<8x32xf32, #tpu.memory_space<vmem>>, vector<8x32xf32>
    tpu.vector_store %arg7[%c0_6, %c0_7], %8 {strides = array<i32>} : memref<8x32xf32, #tpu.memory_space<vmem>>, vector<8x32xf32>,
    %c0_i32_8 = arith.constant 0 : i32
    %10 = arith.cmpi eq, %arg2, %c0_i32_8 : i32
    %11 = arith.extui %10 : i1 to i32
    %c0_i32_9 = arith.constant 0 : i32
    %12 = arith.cmpi ne, %11, %c0_i32_9 : i32
    scf.if %12 {
      %c0_10 = arith.constant 0 : index
      %c0_11 = arith.constant 0 : index
      %13 = vector.load %arg7[%c0_10, %c0_11] : memref<8x32xf32, #tpu.memory_space<vmem>>, vector<8x32xf32>
      %c0_12 = arith.constant 0 : index
      %c0_13 = arith.constant 0 : index
      %14 = vector.load %arg5[%c0_12, %c0_13] : memref<1x32xf32, #tpu.memory_space<vmem>>, vector<1x32xf32>
      %15 = vector.broadcast %14 : vector<1x32xf32> to vector<8x32xf32>
      %16 = arith.addf %13, %15 : vector<8x32xf32>
      %c0_14 = arith.constant 0 : index
      %c0_15 = arith.constant 0 : index
      %17 = vector.load %arg6[%c0_14, %c0_15] : memref<8x32xf32, #tpu.memory_space<vmem>>, vector<8x32xf32>
      tpu.vector_store %arg6[%c0_14, %c0_15], %16 {strides = array<i32>} : memref<8x32xf32, #tpu.memory_space<vmem>>, vector<8x32xf32>,
    } else {
    }
    return
  }
  func.func @transform_0(%arg0: i32, %arg1: i32, %arg2: i32) -> (i32, i32) {
    %c0_i32 = arith.constant 0 : i32
    return %arg0, %arg2 : i32, i32
  }
  func.func @transform_1(%arg0: i32, %arg1: i32, %arg2: i32) -> (i32, i32) {
    %c0_i32 = arith.constant 0 : i32
    return %arg2, %arg1 : i32, i32
  }
  func.func @transform_2(%arg0: i32, %arg1: i32, %arg2: i32) -> (i32, i32) {
    %c0_i32 = arith.constant 0 : i32
    %c0_i32_0 = arith.constant 0 : i32
    return %c0_i32, %arg1 : i32, i32
  }
  func.func @transform_3(%arg0: i32, %arg1: i32, %arg2: i32) -> (i32, i32) {
    %c0_i32 = arith.constant 0 : i32
    return %arg0, %arg1 : i32, i32
  }
}

module attributes {stable_mosaic.version = 11 : i64} {
  func.func @kernel(%arg0: i32, %arg1: i32, %arg2: memref<1x8x32xbf16, #tpu.memory_space<vmem>>, %arg3: memref<32x4xbf16, #tpu.memory_space<vmem>>, %arg4: memref<1x32xf32, #tpu.memory_space<vmem>>, %arg5: memref<1x8x8xbf16, #tpu.memory_space<vmem>>) attributes {dimension_semantics = [#tpu.dimension_semantics<parallel>, #tpu.dimension_semantics<parallel>], iteration_bounds = array<i64: 2, 1>, scalar_prefetch = 0 : i64, scratch_operands = 0 : i64, tpu.core_type = #tpu.core_type<tc>, window_params = [{transform_indices = @transform_0, window_bounds = array<i64: 1, 8, 32>}, {pipeline_mode = #tpu.pipeline_mode<synchronous>, transform_indices = @transform_1, window_bounds = array<i64: 32, 4>}, {pipeline_mode = #tpu.pipeline_mode<synchronous>, transform_indices = @transform_2, window_bounds = array<i64: 1, 32>}, {transform_indices = @transform_3, window_bounds = array<i64: 1, 8, 8>}]} {
    %c0 = arith.constant 0 : index
    %c0_0 = arith.constant 0 : index
    %c0_1 = arith.constant 0 : index
    %0 = vector.load %arg2[%c0, %c0_0, %c0_1] : memref<1x8x32xbf16, #tpu.memory_space<vmem>>, vector<1x8x32xbf16>
    %1 = vector.shape_cast %0 : vector<1x8x32xbf16> to vector<8x32xbf16>
    %c0_2 = arith.constant 0 : index
    %c0_3 = arith.constant 0 : index
    %2 = vector.load %arg3[%c0_2, %c0_3] : memref<32x4xbf16, #tpu.memory_space<vmem>>, vector<32x4xbf16>
    %c0_4 = arith.constant 0 : index
    %c0_5 = arith.constant 0 : index
    %3 = vector.load %arg4[%c0_4, %c0_5] : memref<1x32xf32, #tpu.memory_space<vmem>>, vector<1x32xf32>
    %4 = vector.extract_strided_slice %1 {offsets = [0, 0], sizes = [8, 16], strides = [1, 1]} : vector<8x32xbf16> to vector<8x16xbf16>
    %5 = arith.extf %4 : vector<8x16xbf16> to vector<8x16xf32>
    %6 = vector.extract_strided_slice %3 {offsets = [0, 0], sizes = [1, 16], strides = [1, 1]} : vector<1x32xf32> to vector<1x16xf32>
    %7 = vector.broadcast %6 : vector<1x16xf32> to vector<8x16xf32>
    %8 = arith.addf %5, %7 : vector<8x16xf32>
    %9 = arith.truncf %8 : vector<8x16xf32> to vector<8x16xbf16>
    %10 = vector.extract_strided_slice %2 {offsets = [0, 0], sizes = [16, 4], strides = [1, 1]} : vector<32x4xbf16> to vector<16x4xbf16>
    %cst = arith.constant dense<0.000000e+00> : vector<8x4xf32>
    %11 = tpu.matmul %9, %10, %cst {dimension_numbers = #tpu.dot_dimension_numbers<[1], [0], [0], [1], [0, 0, 1, 1], [], []>} : vector<8x16xbf16>, vector<16x4xbf16>, vector<8x4xf32> -> vector<8x4xf32>
    %12 = arith.truncf %11 : vector<8x4xf32> to vector<8x4xbf16>
    %c0_6 = arith.constant 0 : index
    %c0_7 = arith.constant 0 : index
    %c0_8 = arith.constant 0 : index
    %13 = vector.load %arg5[%c0_6, %c0_7, %c0_8] : memref<1x8x8xbf16, #tpu.memory_space<vmem>>, vector<1x8x4xbf16>
    %14 = vector.shape_cast %13 : vector<1x8x4xbf16> to vector<8x4xbf16>
    %15 = vector.shape_cast %12 : vector<8x4xbf16> to vector<1x8x4xbf16>
    tpu.vector_store %arg5[%c0_6, %c0_7, %c0_8], %15 {strides = array<i32>} : memref<1x8x8xbf16, #tpu.memory_space<vmem>>, vector<1x8x4xbf16>,
    %16 = vector.extract_strided_slice %1 {offsets = [0, 16], sizes = [8, 16], strides = [1, 1]} : vector<8x32xbf16> to vector<8x16xbf16>
    %17 = arith.extf %16 : vector<8x16xbf16> to vector<8x16xf32>
    %18 = vector.extract_strided_slice %3 {offsets = [0, 16], sizes = [1, 16], strides = [1, 1]} : vector<1x32xf32> to vector<1x16xf32>
    %19 = vector.broadcast %18 : vector<1x16xf32> to vector<8x16xf32>
    %20 = arith.addf %17, %19 : vector<8x16xf32>
    %21 = arith.truncf %20 : vector<8x16xf32> to vector<8x16xbf16>
    %22 = vector.extract_strided_slice %2 {offsets = [16, 0], sizes = [16, 4], strides = [1, 1]} : vector<32x4xbf16> to vector<16x4xbf16>
    %cst_9 = arith.constant dense<0.000000e+00> : vector<8x4xf32>
    %23 = tpu.matmul %21, %22, %cst_9 {dimension_numbers = #tpu.dot_dimension_numbers<[1], [0], [0], [1], [0, 0, 1, 1], [], []>} : vector<8x16xbf16>, vector<16x4xbf16>, vector<8x4xf32> -> vector<8x4xf32>
    %24 = arith.truncf %23 : vector<8x4xf32> to vector<8x4xbf16>
    %c0_10 = arith.constant 0 : index
    %c0_11 = arith.constant 0 : index
    %c4 = arith.constant 4 : index
    %25 = vector.load %arg5[%c0_10, %c0_11, %c4] : memref<1x8x8xbf16, #tpu.memory_space<vmem>>, vector<1x8x4xbf16>
    %26 = vector.shape_cast %25 : vector<1x8x4xbf16> to vector<8x4xbf16>
    %27 = vector.shape_cast %24 : vector<8x4xbf16> to vector<1x8x4xbf16>
    tpu.vector_store %arg5[%c0_10, %c0_11, %c4], %27 {strides = array<i32>} : memref<1x8x8xbf16, #tpu.memory_space<vmem>>, vector<1x8x4xbf16>,
    return
  }
  func.func @transform_0(%arg0: i32, %arg1: i32) -> (i32, i32, i32) {
    %c0_i32 = arith.constant 0 : i32
    %c0_i32_0 = arith.constant 0 : i32
    return %arg0, %arg1, %c0_i32 : i32, i32, i32
  }
  func.func @transform_1(%arg0: i32, %arg1: i32) -> (i32, i32) {
    %c0_i32 = arith.constant 0 : i32
    %c0_i32_0 = arith.constant 0 : i32
    %c0_i32_1 = arith.constant 0 : i32
    return %c0_i32, %c0_i32_0 : i32, i32
  }
  func.func @transform_2(%arg0: i32, %arg1: i32) -> (i32, i32) {
    %c0_i32 = arith.constant 0 : i32
    %c0_i32_0 = arith.constant 0 : i32
    %c0_i32_1 = arith.constant 0 : i32
    return %c0_i32, %c0_i32_0 : i32, i32
  }
  func.func @transform_3(%arg0: i32, %arg1: i32) -> (i32, i32, i32) {
    %c0_i32 = arith.constant 0 : i32
    %c0_i32_0 = arith.constant 0 : i32
    return %arg0, %arg1, %c0_i32 : i32, i32, i32
  }
}

module attributes {stable_mosaic.version = 11 : i64} {
  func.func @kernel(%arg0: i32, %arg1: i32, %arg2: memref<1x2x4x4xbf16, #tpu.memory_space<vmem>>, %arg3: memref<1x2x4x64xbf16, #tpu.memory_space<vmem>>, %arg4: memref<1x2x64xbf16, #tpu.memory_space<vmem>>) attributes {dimension_semantics = [#tpu.dimension_semantics<parallel>, #tpu.dimension_semantics<parallel>], iteration_bounds = array<i64: 2, 1>, scalar_prefetch = 0 : i64, scratch_operands = 0 : i64, tpu.core_type = #tpu.core_type<tc>, window_params = [{transform_indices = @transform_0, window_bounds = array<i64: 1, 2, 4, 4>}, {transform_indices = @transform_1, window_bounds = array<i64: 1, 2, 4, 64>}, {transform_indices = @transform_2, window_bounds = array<i64: 1, 2, 64>}]} {
    %c0 = arith.constant 0 : index
    %c0_0 = arith.constant 0 : index
    %c0_1 = arith.constant 0 : index
    %c0_2 = arith.constant 0 : index
    %0 = vector.load %arg2[%c0, %c0_0, %c0_1, %c0_2] : memref<1x2x4x4xbf16, #tpu.memory_space<vmem>>, vector<1x2x4x4xbf16>
    %1 = vector.shape_cast %0 : vector<1x2x4x4xbf16> to vector<2x4x4xbf16>
    %2 = arith.extf %1 : vector<2x4x4xbf16> to vector<2x4x4xf32>
    %c0_3 = arith.constant 0 : index
    %c0_4 = arith.constant 0 : index
    %c0_5 = arith.constant 0 : index
    %c0_6 = arith.constant 0 : index
    %3 = vector.load %arg3[%c0_3, %c0_4, %c0_5, %c0_6] : memref<1x2x4x64xbf16, #tpu.memory_space<vmem>>, vector<1x2x4x64xbf16>
    %4 = vector.shape_cast %3 : vector<1x2x4x64xbf16> to vector<2x4x64xbf16>
    %5 = arith.extf %4 : vector<2x4x64xbf16> to vector<2x4x64xf32>
    %cst = arith.constant dense<0xFF800000> : vector<2x4xf32>
    %6 = vector.multi_reduction <maximumf>, %2, %cst [1] : vector<2x4x4xf32> to vector<2x4xf32>
    %7 = vector.shape_cast %6 : vector<2x4xf32> to vector<2x1x4xf32>
    %8 = vector.broadcast %7 : vector<2x1x4xf32> to vector<2x4x4xf32>
    %9 = arith.subf %2, %8 : vector<2x4x4xf32>
    %10 = math.exp %9 : vector<2x4x4xf32>
    %cst_7 = arith.constant dense<0.000000e+00> : vector<2x4xf32>
    %11 = vector.multi_reduction <add>, %10, %cst_7 [1] : vector<2x4x4xf32> to vector<2x4xf32>
    %12 = vector.shape_cast %11 : vector<2x4xf32> to vector<2x1x4xf32>
    %13 = vector.broadcast %12 : vector<2x1x4xf32> to vector<2x4x4xf32>
    %14 = arith.divf %10, %13 : vector<2x4x4xf32>
    %15 = vector.extract_strided_slice %5 {offsets = [0, 0, 0], sizes = [2, 4, 16], strides = [1, 1, 1]} : vector<2x4x64xf32> to vector<2x4x16xf32>
    %16 = vector.extract_strided_slice %14 {offsets = [0, 0, 0], sizes = [2, 4, 1], strides = [1, 1, 1]} : vector<2x4x4xf32> to vector<2x4x1xf32>
    %17 = vector.broadcast %16 : vector<2x4x1xf32> to vector<2x4x16xf32>
    %18 = arith.mulf %17, %15 : vector<2x4x16xf32>
    %cst_8 = arith.constant dense<0.000000e+00> : vector<2x16xf32>
    %19 = vector.multi_reduction <add>, %18, %cst_8 [1] : vector<2x4x16xf32> to vector<2x16xf32>
    %20 = arith.truncf %19 : vector<2x16xf32> to vector<2x16xbf16>
    %c0_9 = arith.constant 0 : index
    %c0_10 = arith.constant 0 : index
    %c0_11 = arith.constant 0 : index
    %21 = vector.load %arg4[%c0_9, %c0_10, %c0_11] : memref<1x2x64xbf16, #tpu.memory_space<vmem>>, vector<1x2x16xbf16>
    %22 = vector.shape_cast %21 : vector<1x2x16xbf16> to vector<2x16xbf16>
    %23 = vector.shape_cast %20 : vector<2x16xbf16> to vector<1x2x16xbf16>
    tpu.vector_store %arg4[%c0_9, %c0_10, %c0_11], %23 {strides = array<i32>} : memref<1x2x64xbf16, #tpu.memory_space<vmem>>, vector<1x2x16xbf16>,
    %24 = vector.extract_strided_slice %5 {offsets = [0, 0, 16], sizes = [2, 4, 16], strides = [1, 1, 1]} : vector<2x4x64xf32> to vector<2x4x16xf32>
    %25 = vector.extract_strided_slice %14 {offsets = [0, 0, 1], sizes = [2, 4, 1], strides = [1, 1, 1]} : vector<2x4x4xf32> to vector<2x4x1xf32>
    %26 = vector.broadcast %25 : vector<2x4x1xf32> to vector<2x4x16xf32>
    %27 = arith.mulf %26, %24 : vector<2x4x16xf32>
    %cst_12 = arith.constant dense<0.000000e+00> : vector<2x16xf32>
    %28 = vector.multi_reduction <add>, %27, %cst_12 [1] : vector<2x4x16xf32> to vector<2x16xf32>
    %29 = arith.truncf %28 : vector<2x16xf32> to vector<2x16xbf16>
    %c0_13 = arith.constant 0 : index
    %c0_14 = arith.constant 0 : index
    %c16 = arith.constant 16 : index
    %30 = vector.load %arg4[%c0_13, %c0_14, %c16] : memref<1x2x64xbf16, #tpu.memory_space<vmem>>, vector<1x2x16xbf16>
    %31 = vector.shape_cast %30 : vector<1x2x16xbf16> to vector<2x16xbf16>
    %32 = vector.shape_cast %29 : vector<2x16xbf16> to vector<1x2x16xbf16>
    tpu.vector_store %arg4[%c0_13, %c0_14, %c16], %32 {strides = array<i32>} : memref<1x2x64xbf16, #tpu.memory_space<vmem>>, vector<1x2x16xbf16>,
    %33 = vector.extract_strided_slice %5 {offsets = [0, 0, 32], sizes = [2, 4, 16], strides = [1, 1, 1]} : vector<2x4x64xf32> to vector<2x4x16xf32>
    %34 = vector.extract_strided_slice %14 {offsets = [0, 0, 2], sizes = [2, 4, 1], strides = [1, 1, 1]} : vector<2x4x4xf32> to vector<2x4x1xf32>
    %35 = vector.broadcast %34 : vector<2x4x1xf32> to vector<2x4x16xf32>
    %36 = arith.mulf %35, %33 : vector<2x4x16xf32>
    %cst_15 = arith.constant dense<0.000000e+00> : vector<2x16xf32>
    %37 = vector.multi_reduction <add>, %36, %cst_15 [1] : vector<2x4x16xf32> to vector<2x16xf32>
    %38 = arith.truncf %37 : vector<2x16xf32> to vector<2x16xbf16>
    %c0_16 = arith.constant 0 : index
    %c0_17 = arith.constant 0 : index
    %c32 = arith.constant 32 : index
    %39 = vector.load %arg4[%c0_16, %c0_17, %c32] : memref<1x2x64xbf16, #tpu.memory_space<vmem>>, vector<1x2x16xbf16>
    %40 = vector.shape_cast %39 : vector<1x2x16xbf16> to vector<2x16xbf16>
    %41 = vector.shape_cast %38 : vector<2x16xbf16> to vector<1x2x16xbf16>
    tpu.vector_store %arg4[%c0_16, %c0_17, %c32], %41 {strides = array<i32>} : memref<1x2x64xbf16, #tpu.memory_space<vmem>>, vector<1x2x16xbf16>,
    %42 = vector.extract_strided_slice %5 {offsets = [0, 0, 48], sizes = [2, 4, 16], strides = [1, 1, 1]} : vector<2x4x64xf32> to vector<2x4x16xf32>
    %43 = vector.extract_strided_slice %14 {offsets = [0, 0, 3], sizes = [2, 4, 1], strides = [1, 1, 1]} : vector<2x4x4xf32> to vector<2x4x1xf32>
    %44 = vector.broadcast %43 : vector<2x4x1xf32> to vector<2x4x16xf32>
    %45 = arith.mulf %44, %42 : vector<2x4x16xf32>
    %cst_18 = arith.constant dense<0.000000e+00> : vector<2x16xf32>
    %46 = vector.multi_reduction <add>, %45, %cst_18 [1] : vector<2x4x16xf32> to vector<2x16xf32>
    %47 = arith.truncf %46 : vector<2x16xf32> to vector<2x16xbf16>
    %c0_19 = arith.constant 0 : index
    %c0_20 = arith.constant 0 : index
    %c48 = arith.constant 48 : index
    %48 = vector.load %arg4[%c0_19, %c0_20, %c48] : memref<1x2x64xbf16, #tpu.memory_space<vmem>>, vector<1x2x16xbf16>
    %49 = vector.shape_cast %48 : vector<1x2x16xbf16> to vector<2x16xbf16>
    %50 = vector.shape_cast %47 : vector<2x16xbf16> to vector<1x2x16xbf16>
    tpu.vector_store %arg4[%c0_19, %c0_20, %c48], %50 {strides = array<i32>} : memref<1x2x64xbf16, #tpu.memory_space<vmem>>, vector<1x2x16xbf16>,
    return
  }
  func.func @transform_0(%arg0: i32, %arg1: i32) -> (i32, i32, i32, i32) {
    %c0_i32 = arith.constant 0 : i32
    %c0_i32_0 = arith.constant 0 : i32
    %c0_i32_1 = arith.constant 0 : i32
    return %arg0, %arg1, %c0_i32, %c0_i32_0 : i32, i32, i32, i32
  }
  func.func @transform_1(%arg0: i32, %arg1: i32) -> (i32, i32, i32, i32) {
    %c0_i32 = arith.constant 0 : i32
    %c0_i32_0 = arith.constant 0 : i32
    %c0_i32_1 = arith.constant 0 : i32
    return %arg0, %arg1, %c0_i32, %c0_i32_0 : i32, i32, i32, i32
  }
  func.func @transform_2(%arg0: i32, %arg1: i32) -> (i32, i32, i32) {
    %c0_i32 = arith.constant 0 : i32
    %c0_i32_0 = arith.constant 0 : i32
    return %arg0, %arg1, %c0_i32 : i32, i32, i32
  }
}

module attributes {stable_mosaic.version = 11 : i64} {
  func.func @kernel(%arg0: i32, %arg1: memref<8x64xbf16, #tpu.memory_space<vmem>>, %arg2: memref<1x32xf32, #tpu.memory_space<vmem>>, %arg3: memref<1x32xf32, #tpu.memory_space<vmem>>, %arg4: memref<8x64xbf16, #tpu.memory_space<vmem>>) attributes {dimension_semantics = [#tpu.dimension_semantics<parallel>], iteration_bounds = array<i64: 1>, scalar_prefetch = 0 : i64, scratch_operands = 0 : i64, tpu.core_type = #tpu.core_type<tc>, window_params = [{transform_indices = @transform_0, window_bounds = array<i64: 8, 64>}, {pipeline_mode = #tpu.pipeline_mode<synchronous>, transform_indices = @transform_1, window_bounds = array<i64: 1, 32>}, {pipeline_mode = #tpu.pipeline_mode<synchronous>, transform_indices = @transform_2, window_bounds = array<i64: 1, 32>}, {transform_indices = @transform_3, window_bounds = array<i64: 8, 64>}]} {
    %c0 = arith.constant 0 : index
    %c0_0 = arith.constant 0 : index
    %0 = vector.load %arg1[%c0, %c0_0] : memref<8x64xbf16, #tpu.memory_space<vmem>>, vector<8x64xbf16>
    %1 = arith.extf %0 : vector<8x64xbf16> to vector<8x64xf32>
    %2 = vector.extract_strided_slice %1 {offsets = [0, 0], sizes = [8, 32], strides = [1, 1]} : vector<8x64xf32> to vector<8x32xf32>
    %cst = arith.constant dense<0.000000e+00> : vector<8xf32>
    %3 = vector.multi_reduction <add>, %2, %cst [1] : vector<8x32xf32> to vector<8xf32>
    %4 = vector.shape_cast %3 : vector<8xf32> to vector<8x1xf32>
    %cst_1 = arith.constant 3.200000e+01 : f32
    %5 = vector.broadcast %cst_1 : f32 to vector<8x1xf32>
    %6 = arith.divf %4, %5 : vector<8x1xf32>
    %7 = vector.broadcast %6 : vector<8x1xf32> to vector<8x32xf32>
    %8 = arith.subf %2, %7 : vector<8x32xf32>
    %9 = arith.mulf %8, %8 : vector<8x32xf32>
    %cst_2 = arith.constant dense<0.000000e+00> : vector<8xf32>
    %10 = vector.multi_reduction <add>, %9, %cst_2 [1] : vector<8x32xf32> to vector<8xf32>
    %11 = vector.shape_cast %10 : vector<8xf32> to vector<8x1xf32>
    %cst_3 = arith.constant 3.200000e+01 : f32
    %12 = vector.broadcast %cst_3 : f32 to vector<8x1xf32>
    %13 = arith.divf %11, %12 : vector<8x1xf32>
    %14 = vector.broadcast %6 : vector<8x1xf32> to vector<8x32xf32>
    %15 = arith.subf %2, %14 : vector<8x32xf32>
    %cst_4 = arith.constant 9.99999974E-6 : f32
    %16 = vector.broadcast %cst_4 : f32 to vector<8x1xf32>
    %17 = arith.addf %13, %16 : vector<8x1xf32>
    %18 = math.rsqrt %17 : vector<8x1xf32>
    %19 = vector.broadcast %18 : vector<8x1xf32> to vector<8x32xf32>
    %20 = arith.mulf %15, %19 : vector<8x32xf32>
    %c0_5 = arith.constant 0 : index
    %c0_6 = arith.constant 0 : index
    %21 = vector.load %arg2[%c0_5, %c0_6] : memref<1x32xf32, #tpu.memory_space<vmem>>, vector<1x32xf32>
    %22 = vector.broadcast %21 : vector<1x32xf32> to vector<8x32xf32>
    %23 = arith.mulf %20, %22 : vector<8x32xf32>
    %c0_7 = arith.constant 0 : index
    %c0_8 = arith.constant 0 : index
    %24 = vector.load %arg3[%c0_7, %c0_8] : memref<1x32xf32, #tpu.memory_space<vmem>>, vector<1x32xf32>
    %25 = vector.broadcast %24 : vector<1x32xf32> to vector<8x32xf32>
    %26 = arith.addf %23, %25 : vector<8x32xf32>
    %27 = vector.extract_strided_slice %1 {offsets = [0, 32], sizes = [8, 32], strides = [1, 1]} : vector<8x64xf32> to vector<8x32xf32>
    %cst_9 = arith.constant dense<0.000000e+00> : vector<8xf32>
    %28 = vector.multi_reduction <add>, %27, %cst_9 [1] : vector<8x32xf32> to vector<8xf32>
    %29 = vector.shape_cast %28 : vector<8xf32> to vector<8x1xf32>
    %cst_10 = arith.constant 3.200000e+01 : f32
    %30 = vector.broadcast %cst_10 : f32 to vector<8x1xf32>
    %31 = arith.divf %29, %30 : vector<8x1xf32>
    %32 = vector.broadcast %31 : vector<8x1xf32> to vector<8x32xf32>
    %33 = arith.subf %27, %32 : vector<8x32xf32>
    %34 = arith.mulf %33, %33 : vector<8x32xf32>
    %cst_11 = arith.constant dense<0.000000e+00> : vector<8xf32>
    %35 = vector.multi_reduction <add>, %34, %cst_11 [1] : vector<8x32xf32> to vector<8xf32>
    %36 = vector.shape_cast %35 : vector<8xf32> to vector<8x1xf32>
    %cst_12 = arith.constant 3.200000e+01 : f32
    %37 = vector.broadcast %cst_12 : f32 to vector<8x1xf32>
    %38 = arith.divf %36, %37 : vector<8x1xf32>
    %39 = vector.broadcast %31 : vector<8x1xf32> to vector<8x32xf32>
    %40 = arith.subf %27, %39 : vector<8x32xf32>
    %cst_13 = arith.constant 9.99999974E-6 : f32
    %41 = vector.broadcast %cst_13 : f32 to vector<8x1xf32>
    %42 = arith.addf %38, %41 : vector<8x1xf32>
    %43 = math.rsqrt %42 : vector<8x1xf32>
    %44 = vector.broadcast %43 : vector<8x1xf32> to vector<8x32xf32>
    %45 = arith.mulf %40, %44 : vector<8x32xf32>
    %c0_14 = arith.constant 0 : index
    %c0_15 = arith.constant 0 : index
    %46 = vector.load %arg2[%c0_14, %c0_15] : memref<1x32xf32, #tpu.memory_space<vmem>>, vector<1x32xf32>
    %47 = vector.broadcast %46 : vector<1x32xf32> to vector<8x32xf32>
    %48 = arith.mulf %45, %47 : vector<8x32xf32>
    %c0_16 = arith.constant 0 : index
    %c0_17 = arith.constant 0 : index
    %49 = vector.load %arg3[%c0_16, %c0_17] : memref<1x32xf32, #tpu.memory_space<vmem>>, vector<1x32xf32>
    %50 = vector.broadcast %49 : vector<1x32xf32> to vector<8x32xf32>
    %51 = arith.addf %48, %50 : vector<8x32xf32>
    %52 = tpu.concatenate %26, %51 in 1 : vector<8x32xf32>, vector<8x32xf32> -> vector<8x64xf32>
    %53 = arith.truncf %52 : vector<8x64xf32> to vector<8x64xbf16>
    %c0_18 = arith.constant 0 : index
    %c0_19 = arith.constant 0 : index
    %54 = vector.load %arg4[%c0_18, %c0_19] : memref<8x64xbf16, #tpu.memory_space<vmem>>, vector<8x64xbf16>
    tpu.vector_store %arg4[%c0_18, %c0_19], %53 {strides = array<i32>} : memref<8x64xbf16, #tpu.memory_space<vmem>>, vector<8x64xbf16>,
    return
  }
  func.func @transform_0(%arg0: i32) -> (i32, i32) {
    %c0_i32 = arith.constant 0 : i32
    %c0_i32_0 = arith.constant 0 : i32
    return %arg0, %c0_i32 : i32, i32
  }
  func.func @transform_1(%arg0: i32) -> (i32, i32) {
    %c0_i32 = arith.constant 0 : i32
    %c0_i32_0 = arith.constant 0 : i32
    %c0_i32_1 = arith.constant 0 : i32
    return %c0_i32, %c0_i32_0 : i32, i32
  }
  func.func @transform_2(%arg0: i32) -> (i32, i32) {
    %c0_i32 = arith.constant 0 : i32
    %c0_i32_0 = arith.constant 0 : i32
    %c0_i32_1 = arith.constant 0 : i32
    return %c0_i32, %c0_i32_0 : i32, i32
  }
  func.func @transform_3(%arg0: i32) -> (i32, i32) {
    %c0_i32 = arith.constant 0 : i32
    %c0_i32_0 = arith.constant 0 : i32
    return %arg0, %c0_i32 : i32, i32
  }
}

module attributes {stable_mosaic.version = 11 : i64} {
  func.func @kernel(%arg0: i32, %arg1: i32, %arg2: i32, %arg3: memref<16x32xf32, #tpu.memory_space<vmem>>, %arg4: memref<32x2xbf16, #tpu.memory_space<vmem>>, %arg5: memref<1x2xf32, #tpu.memory_space<vmem>>, %arg6: memref<16x2xbf16, #tpu.memory_space<vmem>>, %arg7: memref<16x2xf32, #tpu.memory_space<vmem>>) attributes {dimension_semantics = [#tpu.dimension_semantics<parallel>, #tpu.dimension_semantics<parallel>, #tpu.dimension_semantics<arbitrary>], iteration_bounds = array<i64: 1, 1, 1>, scalar_prefetch = 0 : i64, scratch_operands = 1 : i64, tpu.core_type = #tpu.core_type<tc>, window_params = [{transform_indices = @transform_0, window_bounds = array<i64: 16, 32>}, {transform_indices = @transform_1, window_bounds = array<i64: 32, 2>}, {transform_indices = @transform_2, window_bounds = array<i64: 1, 2>}, {transform_indices = @transform_3, window_bounds = array<i64: 16, 2>}]} {
    %c0_i32 = arith.constant 0 : i32
    %0 = arith.cmpi eq, %arg2, %c0_i32 : i32
    %1 = arith.extui %0 : i1 to i32
    %c0_i32_0 = arith.constant 0 : i32
    %2 = arith.cmpi ne, %1, %c0_i32_0 : i32
    scf.if %2 {
      %cst_10 = arith.constant 0.000000e+00 : f32
      %13 = vector.broadcast %cst_10 : f32 to vector<16x2xf32>
      %c0_11 = arith.constant 0 : index
      %c0_12 = arith.constant 0 : index
      %14 = vector.load %arg7[%c0_11, %c0_12] : memref<16x2xf32, #tpu.memory_space<vmem>>, vector<16x2xf32>
      tpu.vector_store %arg7[%c0_11, %c0_12], %13 {strides = array<i32>} : memref<16x2xf32, #tpu.memory_space<vmem>>, vector<16x2xf32>,
    } else {
    }
    %c0 = arith.constant 0 : index
    %c0_1 = arith.constant 0 : index
    %3 = vector.load %arg7[%c0, %c0_1] : memref<16x2xf32, #tpu.memory_space<vmem>>, vector<16x2xf32>
    %c0_2 = arith.constant 0 : index
    %c0_3 = arith.constant 0 : index
    %4 = vector.load %arg3[%c0_2, %c0_3] : memref<16x32xf32, #tpu.memory_space<vmem>>, vector<16x32xf32>
    %5 = arith.truncf %4 : vector<16x32xf32> to vector<16x32xbf16>
    %c0_4 = arith.constant 0 : index
    %c0_5 = arith.constant 0 : index
    %6 = vector.load %arg4[%c0_4, %c0_5] : memref<32x2xbf16, #tpu.memory_space<vmem>>, vector<32x2xbf16>
    %cst = arith.constant dense<0.000000e+00> : vector<16x2xf32>
    %7 = tpu.matmul %5, %6, %cst {dimension_numbers = #tpu.dot_dimension_numbers<[1], [0], [0], [1], [0, 0, 1, 1], [], []>} : vector<16x32xbf16>, vector<32x2xbf16>, vector<16x2xf32> -> vector<16x2xf32>
    %8 = arith.addf %3, %7 : vector<16x2xf32>
    %c0_6 = arith.constant 0 : index
    %c0_7 = arith.constant 0 : index
    %9 = vector.load %arg7[%c0_6, %c0_7] : memref<16x2xf32, #tpu.memory_space<vmem>>, vector<16x2xf32>
    tpu.vector_store %arg7[%c0_6, %c0_7], %8 {strides = array<i32>} : memref<16x2xf32, #tpu.memory_space<vmem>>, vector<16x2xf32>,
    %c0_i32_8 = arith.constant 0 : i32
    %10 = arith.cmpi eq, %arg2, %c0_i32_8 : i32
    %11 = arith.extui %10 : i1 to i32
    %c0_i32_9 = arith.constant 0 : i32
    %12 = arith.cmpi ne, %11, %c0_i32_9 : i32
    scf.if %12 {
      %c0_10 = arith.constant 0 : index
      %c0_11 = arith.constant 0 : index
      %13 = vector.load %arg7[%c0_10, %c0_11] : memref<16x2xf32, #tpu.memory_space<vmem>>, vector<16x2xf32>
      %c0_12 = arith.constant 0 : index
      %c0_13 = arith.constant 0 : index
      %14 = vector.load %arg5[%c0_12, %c0_13] : memref<1x2xf32, #tpu.memory_space<vmem>>, vector<1x2xf32>
      %15 = vector.broadcast %14 : vector<1x2xf32> to vector<16x2xf32>
      %16 = arith.addf %13, %15 : vector<16x2xf32>
      %17 = arith.truncf %16 : vector<16x2xf32> to vector<16x2xbf16>
      %c0_14 = arith.constant 0 : index
      %c0_15 = arith.constant 0 : index
      %18 = vector.load %arg6[%c0_14, %c0_15] : memref<16x2xbf16, #tpu.memory_space<vmem>>, vector<16x2xbf16>
      tpu.vector_store %arg6[%c0_14, %c0_15], %17 {strides = array<i32>} : memref<16x2xbf16, #tpu.memory_space<vmem>>, vector<16x2xbf16>,
    } else {
    }
    return
  }
  func.func @transform_0(%arg0: i32, %arg1: i32, %arg2: i32) -> (i32, i32) {
    %c0_i32 = arith.constant 0 : i32
    return %arg0, %arg2 : i32, i32
  }
  func.func @transform_1(%arg0: i32, %arg1: i32, %arg2: i32) -> (i32, i32) {
    %c0_i32 = arith.constant 0 : i32
    return %arg2, %arg1 : i32, i32
  }
  func.func @transform_2(%arg0: i32, %arg1: i32, %arg2: i32) -> (i32, i32) {
    %c0_i32 = arith.constant 0 : i32
    %c0_i32_0 = arith.constant 0 : i32
    return %c0_i32, %arg1 : i32, i32
  }
  func.func @transform_3(%arg0: i32, %arg1: i32, %arg2: i32) -> (i32, i32) {
    %c0_i32 = arith.constant 0 : i32
    return %arg0, %arg1 : i32, i32
  }
}

module attributes {stable_mosaic.version = 11 : i64} {
  func.func @kernel(%arg0: i32, %arg1: i32, %arg2: memref<1x2x4x2xbf16, #tpu.memory_space<vmem>>, %arg3: memref<1x2x4x32xf32, #tpu.memory_space<vmem>>, %arg4: memref<1x2x32xbf16, #tpu.memory_space<vmem>>) attributes {dimension_semantics = [#tpu.dimension_semantics<parallel>, #tpu.dimension_semantics<parallel>], iteration_bounds = array<i64: 2, 1>, scalar_prefetch = 0 : i64, scratch_operands = 0 : i64, tpu.core_type = #tpu.core_type<tc>, window_params = [{transform_indices = @transform_0, window_bounds = array<i64: 1, 2, 4, 2>}, {transform_indices = @transform_1, window_bounds = array<i64: 1, 2, 4, 32>}, {transform_indices = @transform_2, window_bounds = array<i64: 1, 2, 32>}]} {
    %c0 = arith.constant 0 : index
    %c0_0 = arith.constant 0 : index
    %c0_1 = arith.constant 0 : index
    %c0_2 = arith.constant 0 : index
    %0 = vector.load %arg2[%c0, %c0_0, %c0_1, %c0_2] : memref<1x2x4x2xbf16, #tpu.memory_space<vmem>>, vector<1x2x4x2xbf16>
    %1 = vector.shape_cast %0 : vector<1x2x4x2xbf16> to vector<2x4x2xbf16>
    %2 = arith.extf %1 : vector<2x4x2xbf16> to vector<2x4x2xf32>
    %c0_3 = arith.constant 0 : index
    %c0_4 = arith.constant 0 : index
    %c0_5 = arith.constant 0 : index
    %c0_6 = arith.constant 0 : index
    %3 = vector.load %arg3[%c0_3, %c0_4, %c0_5, %c0_6] : memref<1x2x4x32xf32, #tpu.memory_space<vmem>>, vector<1x2x4x32xf32>
    %4 = vector.shape_cast %3 : vector<1x2x4x32xf32> to vector<2x4x32xf32>
    %cst = arith.constant dense<0xFF800000> : vector<2x2xf32>
    %5 = vector.multi_reduction <maximumf>, %2, %cst [1] : vector<2x4x2xf32> to vector<2x2xf32>
    %6 = vector.shape_cast %5 : vector<2x2xf32> to vector<2x1x2xf32>
    %7 = vector.broadcast %6 : vector<2x1x2xf32> to vector<2x4x2xf32>
    %8 = arith.subf %2, %7 : vector<2x4x2xf32>
    %9 = math.exp %8 : vector<2x4x2xf32>
    %cst_7 = arith.constant dense<0.000000e+00> : vector<2x2xf32>
    %10 = vector.multi_reduction <add>, %9, %cst_7 [1] : vector<2x4x2xf32> to vector<2x2xf32>
    %11 = vector.shape_cast %10 : vector<2x2xf32> to vector<2x1x2xf32>
    %12 = vector.broadcast %11 : vector<2x1x2xf32> to vector<2x4x2xf32>
    %13 = arith.divf %9, %12 : vector<2x4x2xf32>
    %14 = vector.extract_strided_slice %4 {offsets = [0, 0, 0], sizes = [2, 4, 16], strides = [1, 1, 1]} : vector<2x4x32xf32> to vector<2x4x16xf32>
    %15 = vector.extract_strided_slice %13 {offsets = [0, 0, 0], sizes = [2, 4, 1], strides = [1, 1, 1]} : vector<2x4x2xf32> to vector<2x4x1xf32>
    %16 = vector.broadcast %15 : vector<2x4x1xf32> to vector<2x4x16xf32>
    %17 = arith.mulf %16, %14 : vector<2x4x16xf32>
    %cst_8 = arith.constant dense<0.000000e+00> : vector<2x16xf32>
    %18 = vector.multi_reduction <add>, %17, %cst_8 [1] : vector<2x4x16xf32> to vector<2x16xf32>
    %19 = arith.truncf %18 : vector<2x16xf32> to vector<2x16xbf16>
    %c0_9 = arith.constant 0 : index
    %c0_10 = arith.constant 0 : index
    %c0_11 = arith.constant 0 : index
    %20 = vector.load %arg4[%c0_9, %c0_10, %c0_11] : memref<1x2x32xbf16, #tpu.memory_space<vmem>>, vector<1x2x16xbf16>
    %21 = vector.shape_cast %20 : vector<1x2x16xbf16> to vector<2x16xbf16>
    %22 = vector.shape_cast %19 : vector<2x16xbf16> to vector<1x2x16xbf16>
    tpu.vector_store %arg4[%c0_9, %c0_10, %c0_11], %22 {strides = array<i32>} : memref<1x2x32xbf16, #tpu.memory_space<vmem>>, vector<1x2x16xbf16>,
    %23 = vector.extract_strided_slice %4 {offsets = [0, 0, 16], sizes = [2, 4, 16], strides = [1, 1, 1]} : vector<2x4x32xf32> to vector<2x4x16xf32>
    %24 = vector.extract_strided_slice %13 {offsets = [0, 0, 1], sizes = [2, 4, 1], strides = [1, 1, 1]} : vector<2x4x2xf32> to vector<2x4x1xf32>
    %25 = vector.broadcast %24 : vector<2x4x1xf32> to vector<2x4x16xf32>
    %26 = arith.mulf %25, %23 : vector<2x4x16xf32>
    %cst_12 = arith.constant dense<0.000000e+00> : vector<2x16xf32>
    %27 = vector.multi_reduction <add>, %26, %cst_12 [1] : vector<2x4x16xf32> to vector<2x16xf32>
    %28 = arith.truncf %27 : vector<2x16xf32> to vector<2x16xbf16>
    %c0_13 = arith.constant 0 : index
    %c0_14 = arith.constant 0 : index
    %c16 = arith.constant 16 : index
    %29 = vector.load %arg4[%c0_13, %c0_14, %c16] : memref<1x2x32xbf16, #tpu.memory_space<vmem>>, vector<1x2x16xbf16>
    %30 = vector.shape_cast %29 : vector<1x2x16xbf16> to vector<2x16xbf16>
    %31 = vector.shape_cast %28 : vector<2x16xbf16> to vector<1x2x16xbf16>
    tpu.vector_store %arg4[%c0_13, %c0_14, %c16], %31 {strides = array<i32>} : memref<1x2x32xbf16, #tpu.memory_space<vmem>>, vector<1x2x16xbf16>,
    return
  }
  func.func @transform_0(%arg0: i32, %arg1: i32) -> (i32, i32, i32, i32) {
    %c0_i32 = arith.constant 0 : i32
    %c0_i32_0 = arith.constant 0 : i32
    %c0_i32_1 = arith.constant 0 : i32
    return %arg0, %arg1, %c0_i32, %c0_i32_0 : i32, i32, i32, i32
  }
  func.func @transform_1(%arg0: i32, %arg1: i32) -> (i32, i32, i32, i32) {
    %c0_i32 = arith.constant 0 : i32
    %c0_i32_0 = arith.constant 0 : i32
    %c0_i32_1 = arith.constant 0 : i32
    return %arg0, %arg1, %c0_i32, %c0_i32_0 : i32, i32, i32, i32
  }
  func.func @transform_2(%arg0: i32, %arg1: i32) -> (i32, i32, i32) {
    %c0_i32 = arith.constant 0 : i32
    %c0_i32_0 = arith.constant 0 : i32
    return %arg0, %arg1, %c0_i32 : i32, i32, i32
  }
}

module attributes {stable_mosaic.version = 11 : i64} {
  func.func @kernel(%arg0: i32, %arg1: i32, %arg2: i32, %arg3: memref<8x32xbf16, #tpu.memory_space<vmem>>, %arg4: memref<32x64xbf16, #tpu.memory_space<vmem>>, %arg5: memref<1x64xf32, #tpu.memory_space<vmem>>, %arg6: memref<1x32xf32, #tpu.memory_space<vmem>>, %arg7: memref<1x32xf32, #tpu.memory_space<vmem>>, %arg8: memref<8x64xbf16, #tpu.memory_space<vmem>>, %arg9: memref<8x64xf32, #tpu.memory_space<vmem>>) attributes {dimension_semantics = [#tpu.dimension_semantics<parallel>, #tpu.dimension_semantics<parallel>, #tpu.dimension_semantics<arbitrary>], iteration_bounds = array<i64: 1, 1, 1>, scalar_prefetch = 0 : i64, scratch_operands = 1 : i64, tpu.core_type = #tpu.core_type<tc>, window_params = [{transform_indices = @transform_0, window_bounds = array<i64: 8, 32>}, {transform_indices = @transform_1, window_bounds = array<i64: 32, 64>}, {transform_indices = @transform_2, window_bounds = array<i64: 1, 64>}, {pipeline_mode = #tpu.pipeline_mode<synchronous>, transform_indices = @transform_3, window_bounds = array<i64: 1, 32>}, {pipeline_mode = #tpu.pipeline_mode<synchronous>, transform_indices = @transform_4, window_bounds = array<i64: 1, 32>}, {transform_indices = @transform_5, window_bounds = array<i64: 8, 64>}]} {
    %c0_i32 = arith.constant 0 : i32
    %0 = arith.cmpi eq, %arg2, %c0_i32 : i32
    %1 = arith.extui %0 : i1 to i32
    %c0_i32_0 = arith.constant 0 : i32
    %2 = arith.cmpi ne, %1, %c0_i32_0 : i32
    scf.if %2 {
      %cst_10 = arith.constant 0.000000e+00 : f32
      %12 = vector.broadcast %cst_10 : f32 to vector<8x64xf32>
      %c0_11 = arith.constant 0 : index
      %c0_12 = arith.constant 0 : index
      %13 = vector.load %arg9[%c0_11, %c0_12] : memref<8x64xf32, #tpu.memory_space<vmem>>, vector<8x64xf32>
      tpu.vector_store %arg9[%c0_11, %c0_12], %12 {strides = array<i32>} : memref<8x64xf32, #tpu.memory_space<vmem>>, vector<8x64xf32>,
    } else {
    }
    %c0 = arith.constant 0 : index
    %c0_1 = arith.constant 0 : index
    %3 = vector.load %arg9[%c0, %c0_1] : memref<8x64xf32, #tpu.memory_space<vmem>>, vector<8x64xf32>
    %c0_2 = arith.constant 0 : index
    %c0_3 = arith.constant 0 : index
    %4 = vector.load %arg3[%c0_2, %c0_3] : memref<8x32xbf16, #tpu.memory_space<vmem>>, vector<8x32xbf16>
    %c0_4 = arith.constant 0 : index
    %c0_5 = arith.constant 0 : index
    %5 = vector.load %arg4[%c0_4, %c0_5] : memref<32x64xbf16, #tpu.memory_space<vmem>>, vector<32x64xbf16>
    %cst = arith.constant dense<0.000000e+00> : vector<8x64xf32>
    %6 = tpu.matmul %4, %5, %cst {dimension_numbers = #tpu.dot_dimension_numbers<[1], [0], [0], [1], [0, 0, 1, 1], [], []>} : vector<8x32xbf16>, vector<32x64xbf16>, vector<8x64xf32> -> vector<8x64xf32>
    %7 = arith.addf %3, %6 : vector<8x64xf32>
    %c0_6 = arith.constant 0 : index
    %c0_7 = arith.constant 0 : index
    %8 = vector.load %arg9[%c0_6, %c0_7] : memref<8x64xf32, #tpu.memory_space<vmem>>, vector<8x64xf32>
    tpu.vector_store %arg9[%c0_6, %c0_7], %7 {strides = array<i32>} : memref<8x64xf32, #tpu.memory_space<vmem>>, vector<8x64xf32>,
    %c0_i32_8 = arith.constant 0 : i32
    %9 = arith.cmpi eq, %arg2, %c0_i32_8 : i32
    %10 = arith.extui %9 : i1 to i32
    %c0_i32_9 = arith.constant 0 : i32
    %11 = arith.cmpi ne, %10, %c0_i32_9 : i32
    scf.if %11 {
      %c0_10 = arith.constant 0 : index
      %c0_11 = arith.constant 0 : index
      %12 = vector.load %arg9[%c0_10, %c0_11] : memref<8x64xf32, #tpu.memory_space<vmem>>, vector<8x64xf32>
      %c0_12 = arith.constant 0 : index
      %c0_13 = arith.constant 0 : index
      %13 = vector.load %arg5[%c0_12, %c0_13] : memref<1x64xf32, #tpu.memory_space<vmem>>, vector<1x64xf32>
      %14 = vector.broadcast %13 : vector<1x64xf32> to vector<8x64xf32>
      %15 = arith.addf %12, %14 : vector<8x64xf32>
      %16 = vector.extract_strided_slice %15 {offsets = [0, 0], sizes = [8, 32], strides = [1, 1]} : vector<8x64xf32> to vector<8x32xf32>
      %cst_14 = arith.constant dense<0.000000e+00> : vector<8xf32>
      %17 = vector.multi_reduction <add>, %16, %cst_14 [1] : vector<8x32xf32> to vector<8xf32>
      %18 = vector.shape_cast %17 : vector<8xf32> to vector<8x1xf32>
      %cst_15 = arith.constant 3.200000e+01 : f32
      %19 = vector.broadcast %cst_15 : f32 to vector<8x1xf32>
      %20 = arith.divf %18, %19 : vector<8x1xf32>
      %21 = vector.broadcast %20 : vector<8x1xf32> to vector<8x32xf32>
      %22 = arith.subf %16, %21 : vector<8x32xf32>
      %23 = arith.mulf %22, %22 : vector<8x32xf32>
      %cst_16 = arith.constant dense<0.000000e+00> : vector<8xf32>
      %24 = vector.multi_reduction <add>, %23, %cst_16 [1] : vector<8x32xf32> to vector<8xf32>
      %25 = vector.shape_cast %24 : vector<8xf32> to vector<8x1xf32>
      %cst_17 = arith.constant 3.200000e+01 : f32
      %26 = vector.broadcast %cst_17 : f32 to vector<8x1xf32>
      %27 = arith.divf %25, %26 : vector<8x1xf32>
      %28 = vector.broadcast %20 : vector<8x1xf32> to vector<8x32xf32>
      %29 = arith.subf %16, %28 : vector<8x32xf32>
      %cst_18 = arith.constant 9.99999974E-6 : f32
      %30 = vector.broadcast %cst_18 : f32 to vector<8x1xf32>
      %31 = arith.addf %27, %30 : vector<8x1xf32>
      %32 = math.rsqrt %31 : vector<8x1xf32>
      %33 = vector.broadcast %32 : vector<8x1xf32> to vector<8x32xf32>
      %34 = arith.mulf %29, %33 : vector<8x32xf32>
      %c0_19 = arith.constant 0 : index
      %c0_20 = arith.constant 0 : index
      %35 = vector.load %arg6[%c0_19, %c0_20] : memref<1x32xf32, #tpu.memory_space<vmem>>, vector<1x32xf32>
      %36 = vector.broadcast %35 : vector<1x32xf32> to vector<8x32xf32>
      %37 = arith.mulf %34, %36 : vector<8x32xf32>
      %c0_21 = arith.constant 0 : index
      %c0_22 = arith.constant 0 : index
      %38 = vector.load %arg7[%c0_21, %c0_22] : memref<1x32xf32, #tpu.memory_space<vmem>>, vector<1x32xf32>
      %39 = vector.broadcast %38 : vector<1x32xf32> to vector<8x32xf32>
      %40 = arith.addf %37, %39 : vector<8x32xf32>
      %41 = vector.extract_strided_slice %15 {offsets = [0, 32], sizes = [8, 32], strides = [1, 1]} : vector<8x64xf32> to vector<8x32xf32>
      %cst_23 = arith.constant dense<0.000000e+00> : vector<8xf32>
      %42 = vector.multi_reduction <add>, %41, %cst_23 [1] : vector<8x32xf32> to vector<8xf32>
      %43 = vector.shape_cast %42 : vector<8xf32> to vector<8x1xf32>
      %cst_24 = arith.constant 3.200000e+01 : f32
      %44 = vector.broadcast %cst_24 : f32 to vector<8x1xf32>
      %45 = arith.divf %43, %44 : vector<8x1xf32>
      %46 = vector.broadcast %45 : vector<8x1xf32> to vector<8x32xf32>
      %47 = arith.subf %41, %46 : vector<8x32xf32>
      %48 = arith.mulf %47, %47 : vector<8x32xf32>
      %cst_25 = arith.constant dense<0.000000e+00> : vector<8xf32>
      %49 = vector.multi_reduction <add>, %48, %cst_25 [1] : vector<8x32xf32> to vector<8xf32>
      %50 = vector.shape_cast %49 : vector<8xf32> to vector<8x1xf32>
      %cst_26 = arith.constant 3.200000e+01 : f32
      %51 = vector.broadcast %cst_26 : f32 to vector<8x1xf32>
      %52 = arith.divf %50, %51 : vector<8x1xf32>
      %53 = vector.broadcast %45 : vector<8x1xf32> to vector<8x32xf32>
      %54 = arith.subf %41, %53 : vector<8x32xf32>
      %cst_27 = arith.constant 9.99999974E-6 : f32
      %55 = vector.broadcast %cst_27 : f32 to vector<8x1xf32>
      %56 = arith.addf %52, %55 : vector<8x1xf32>
      %57 = math.rsqrt %56 : vector<8x1xf32>
      %58 = vector.broadcast %57 : vector<8x1xf32> to vector<8x32xf32>
      %59 = arith.mulf %54, %58 : vector<8x32xf32>
      %c0_28 = arith.constant 0 : index
      %c0_29 = arith.constant 0 : index
      %60 = vector.load %arg6[%c0_28, %c0_29] : memref<1x32xf32, #tpu.memory_space<vmem>>, vector<1x32xf32>
      %61 = vector.broadcast %60 : vector<1x32xf32> to vector<8x32xf32>
      %62 = arith.mulf %59, %61 : vector<8x32xf32>
      %c0_30 = arith.constant 0 : index
      %c0_31 = arith.constant 0 : index
      %63 = vector.load %arg7[%c0_30, %c0_31] : memref<1x32xf32, #tpu.memory_space<vmem>>, vector<1x32xf32>
      %64 = vector.broadcast %63 : vector<1x32xf32> to vector<8x32xf32>
      %65 = arith.addf %62, %64 : vector<8x32xf32>
      %66 = tpu.concatenate %40, %65 in 1 : vector<8x32xf32>, vector<8x32xf32> -> vector<8x64xf32>
      %67 = arith.truncf %66 : vector<8x64xf32> to vector<8x64xbf16>
      %c0_32 = arith.constant 0 : index
      %c0_33 = arith.constant 0 : index
      %68 = vector.load %arg8[%c0_32, %c0_33] : memref<8x64xbf16, #tpu.memory_space<vmem>>, vector<8x64xbf16>
      tpu.vector_store %arg8[%c0_32, %c0_33], %67 {strides = array<i32>} : memref<8x64xbf16, #tpu.memory_space<vmem>>, vector<8x64xbf16>,
    } else {
    }
    return
  }
  func.func @transform_0(%arg0: i32, %arg1: i32, %arg2: i32) -> (i32, i32) {
    %c0_i32 = arith.constant 0 : i32
    return %arg0, %arg2 : i32, i32
  }
  func.func @transform_1(%arg0: i32, %arg1: i32, %arg2: i32) -> (i32, i32) {
    %c0_i32 = arith.constant 0 : i32
    return %arg2, %arg1 : i32, i32
  }
  func.func @transform_2(%arg0: i32, %arg1: i32, %arg2: i32) -> (i32, i32) {
    %c0_i32 = arith.constant 0 : i32
    %c0_i32_0 = arith.constant 0 : i32
    return %c0_i32, %arg1 : i32, i32
  }
  func.func @transform_3(%arg0: i32, %arg1: i32, %arg2: i32) -> (i32, i32) {
    %c0_i32 = arith.constant 0 : i32
    %c0_i32_0 = arith.constant 0 : i32
    %c0_i32_1 = arith.constant 0 : i32
    return %c0_i32, %c0_i32_0 : i32, i32
  }
  func.func @transform_4(%arg0: i32, %arg1: i32, %arg2: i32) -> (i32, i32) {
    %c0_i32 = arith.constant 0 : i32
    %c0_i32_0 = arith.constant 0 : i32
    %c0_i32_1 = arith.constant 0 : i32
    return %c0_i32, %c0_i32_0 : i32, i32
  }
  func.func @transform_5(%arg0: i32, %arg1: i32, %arg2: i32) -> (i32, i32) {
    %c0_i32 = arith.constant 0 : i32
    return %arg0, %arg1 : i32, i32
  }
}

module attributes {stable_mosaic.version = 11 : i64} {
  func.func @kernel(%arg0: i32, %arg1: memref<16x64xbf16, #tpu.memory_space<vmem>>, %arg2: memref<1x32xf32, #tpu.memory_space<vmem>>, %arg3: memref<1x32xf32, #tpu.memory_space<vmem>>, %arg4: memref<16x64xbf16, #tpu.memory_space<vmem>>) attributes {dimension_semantics = [#tpu.dimension_semantics<parallel>], iteration_bounds = array<i64: 1>, scalar_prefetch = 0 : i64, scratch_operands = 0 : i64, tpu.core_type = #tpu.core_type<tc>, window_params = [{transform_indices = @transform_0, window_bounds = array<i64: 16, 64>}, {pipeline_mode = #tpu.pipeline_mode<synchronous>, transform_indices = @transform_1, window_bounds = array<i64: 1, 32>}, {pipeline_mode = #tpu.pipeline_mode<synchronous>, transform_indices = @transform_2, window_bounds = array<i64: 1, 32>}, {transform_indices = @transform_3, window_bounds = array<i64: 16, 64>}]} {
    %c0 = arith.constant 0 : index
    %c0_0 = arith.constant 0 : index
    %0 = vector.load %arg1[%c0, %c0_0] : memref<16x64xbf16, #tpu.memory_space<vmem>>, vector<16x64xbf16>
    %1 = arith.extf %0 : vector<16x64xbf16> to vector<16x64xf32>
    %2 = vector.extract_strided_slice %1 {offsets = [0, 0], sizes = [16, 32], strides = [1, 1]} : vector<16x64xf32> to vector<16x32xf32>
    %cst = arith.constant dense<0.000000e+00> : vector<16xf32>
    %3 = vector.multi_reduction <add>, %2, %cst [1] : vector<16x32xf32> to vector<16xf32>
    %4 = vector.shape_cast %3 : vector<16xf32> to vector<16x1xf32>
    %cst_1 = arith.constant 3.200000e+01 : f32
    %5 = vector.broadcast %cst_1 : f32 to vector<16x1xf32>
    %6 = arith.divf %4, %5 : vector<16x1xf32>
    %7 = vector.broadcast %6 : vector<16x1xf32> to vector<16x32xf32>
    %8 = arith.subf %2, %7 : vector<16x32xf32>
    %9 = arith.mulf %8, %8 : vector<16x32xf32>
    %cst_2 = arith.constant dense<0.000000e+00> : vector<16xf32>
    %10 = vector.multi_reduction <add>, %9, %cst_2 [1] : vector<16x32xf32> to vector<16xf32>
    %11 = vector.shape_cast %10 : vector<16xf32> to vector<16x1xf32>
    %cst_3 = arith.constant 3.200000e+01 : f32
    %12 = vector.broadcast %cst_3 : f32 to vector<16x1xf32>
    %13 = arith.divf %11, %12 : vector<16x1xf32>
    %14 = vector.broadcast %6 : vector<16x1xf32> to vector<16x32xf32>
    %15 = arith.subf %2, %14 : vector<16x32xf32>
    %cst_4 = arith.constant 9.99999974E-6 : f32
    %16 = vector.broadcast %cst_4 : f32 to vector<16x1xf32>
    %17 = arith.addf %13, %16 : vector<16x1xf32>
    %18 = math.rsqrt %17 : vector<16x1xf32>
    %19 = vector.broadcast %18 : vector<16x1xf32> to vector<16x32xf32>
    %20 = arith.mulf %15, %19 : vector<16x32xf32>
    %c0_5 = arith.constant 0 : index
    %c0_6 = arith.constant 0 : index
    %21 = vector.load %arg2[%c0_5, %c0_6] : memref<1x32xf32, #tpu.memory_space<vmem>>, vector<1x32xf32>
    %22 = vector.broadcast %21 : vector<1x32xf32> to vector<16x32xf32>
    %23 = arith.mulf %20, %22 : vector<16x32xf32>
    %c0_7 = arith.constant 0 : index
    %c0_8 = arith.constant 0 : index
    %24 = vector.load %arg3[%c0_7, %c0_8] : memref<1x32xf32, #tpu.memory_space<vmem>>, vector<1x32xf32>
    %25 = vector.broadcast %24 : vector<1x32xf32> to vector<16x32xf32>
    %26 = arith.addf %23, %25 : vector<16x32xf32>
    %27 = vector.extract_strided_slice %1 {offsets = [0, 32], sizes = [16, 32], strides = [1, 1]} : vector<16x64xf32> to vector<16x32xf32>
    %cst_9 = arith.constant dense<0.000000e+00> : vector<16xf32>
    %28 = vector.multi_reduction <add>, %27, %cst_9 [1] : vector<16x32xf32> to vector<16xf32>
    %29 = vector.shape_cast %28 : vector<16xf32> to vector<16x1xf32>
    %cst_10 = arith.constant 3.200000e+01 : f32
    %30 = vector.broadcast %cst_10 : f32 to vector<16x1xf32>
    %31 = arith.divf %29, %30 : vector<16x1xf32>
    %32 = vector.broadcast %31 : vector<16x1xf32> to vector<16x32xf32>
    %33 = arith.subf %27, %32 : vector<16x32xf32>
    %34 = arith.mulf %33, %33 : vector<16x32xf32>
    %cst_11 = arith.constant dense<0.000000e+00> : vector<16xf32>
    %35 = vector.multi_reduction <add>, %34, %cst_11 [1] : vector<16x32xf32> to vector<16xf32>
    %36 = vector.shape_cast %35 : vector<16xf32> to vector<16x1xf32>
    %cst_12 = arith.constant 3.200000e+01 : f32
    %37 = vector.broadcast %cst_12 : f32 to vector<16x1xf32>
    %38 = arith.divf %36, %37 : vector<16x1xf32>
    %39 = vector.broadcast %31 : vector<16x1xf32> to vector<16x32xf32>
    %40 = arith.subf %27, %39 : vector<16x32xf32>
    %cst_13 = arith.constant 9.99999974E-6 : f32
    %41 = vector.broadcast %cst_13 : f32 to vector<16x1xf32>
    %42 = arith.addf %38, %41 : vector<16x1xf32>
    %43 = math.rsqrt %42 : vector<16x1xf32>
    %44 = vector.broadcast %43 : vector<16x1xf32> to vector<16x32xf32>
    %45 = arith.mulf %40, %44 : vector<16x32xf32>
    %c0_14 = arith.constant 0 : index
    %c0_15 = arith.constant 0 : index
    %46 = vector.load %arg2[%c0_14, %c0_15] : memref<1x32xf32, #tpu.memory_space<vmem>>, vector<1x32xf32>
    %47 = vector.broadcast %46 : vector<1x32xf32> to vector<16x32xf32>
    %48 = arith.mulf %45, %47 : vector<16x32xf32>
    %c0_16 = arith.constant 0 : index
    %c0_17 = arith.constant 0 : index
    %49 = vector.load %arg3[%c0_16, %c0_17] : memref<1x32xf32, #tpu.memory_space<vmem>>, vector<1x32xf32>
    %50 = vector.broadcast %49 : vector<1x32xf32> to vector<16x32xf32>
    %51 = arith.addf %48, %50 : vector<16x32xf32>
    %52 = tpu.concatenate %26, %51 in 1 : vector<16x32xf32>, vector<16x32xf32> -> vector<16x64xf32>
    %53 = arith.truncf %52 : vector<16x64xf32> to vector<16x64xbf16>
    %c0_18 = arith.constant 0 : index
    %c0_19 = arith.constant 0 : index
    %54 = vector.load %arg4[%c0_18, %c0_19] : memref<16x64xbf16, #tpu.memory_space<vmem>>, vector<16x64xbf16>
    tpu.vector_store %arg4[%c0_18, %c0_19], %53 {strides = array<i32>} : memref<16x64xbf16, #tpu.memory_space<vmem>>, vector<16x64xbf16>,
    return
  }
  func.func @transform_0(%arg0: i32) -> (i32, i32) {
    %c0_i32 = arith.constant 0 : i32
    %c0_i32_0 = arith.constant 0 : i32
    return %arg0, %c0_i32 : i32, i32
  }
  func.func @transform_1(%arg0: i32) -> (i32, i32) {
    %c0_i32 = arith.constant 0 : i32
    %c0_i32_0 = arith.constant 0 : i32
    %c0_i32_1 = arith.constant 0 : i32
    return %c0_i32, %c0_i32_0 : i32, i32
  }
  func.func @transform_2(%arg0: i32) -> (i32, i32) {
    %c0_i32 = arith.constant 0 : i32
    %c0_i32_0 = arith.constant 0 : i32
    %c0_i32_1 = arith.constant 0 : i32
    return %c0_i32, %c0_i32_0 : i32, i32
  }
  func.func @transform_3(%arg0: i32) -> (i32, i32) {
    %c0_i32 = arith.constant 0 : i32
    %c0_i32_0 = arith.constant 0 : i32
    return %arg0, %c0_i32 : i32, i32
  }
}

module attributes {stable_mosaic.version = 11 : i64} {
  func.func @kernel(%arg0: i32, %arg1: i32, %arg2: i32, %arg3: memref<8x32xf32, #tpu.memory_space<vmem>>, %arg4: memref<32x64xbf16, #tpu.memory_space<vmem>>, %arg5: memref<1x64xf32, #tpu.memory_space<vmem>>, %arg6: memref<1x32xf32, #tpu.memory_space<vmem>>, %arg7: memref<1x32xf32, #tpu.memory_space<vmem>>, %arg8: memref<8x64xbf16, #tpu.memory_space<vmem>>, %arg9: memref<8x64xf32, #tpu.memory_space<vmem>>) attributes {dimension_semantics = [#tpu.dimension_semantics<parallel>, #tpu.dimension_semantics<parallel>, #tpu.dimension_semantics<arbitrary>], iteration_bounds = array<i64: 1, 1, 1>, scalar_prefetch = 0 : i64, scratch_operands = 1 : i64, tpu.core_type = #tpu.core_type<tc>, window_params = [{transform_indices = @transform_0, window_bounds = array<i64: 8, 32>}, {transform_indices = @transform_1, window_bounds = array<i64: 32, 64>}, {transform_indices = @transform_2, window_bounds = array<i64: 1, 64>}, {pipeline_mode = #tpu.pipeline_mode<synchronous>, transform_indices = @transform_3, window_bounds = array<i64: 1, 32>}, {pipeline_mode = #tpu.pipeline_mode<synchronous>, transform_indices = @transform_4, window_bounds = array<i64: 1, 32>}, {transform_indices = @transform_5, window_bounds = array<i64: 8, 64>}]} {
    %c0_i32 = arith.constant 0 : i32
    %0 = arith.cmpi eq, %arg2, %c0_i32 : i32
    %1 = arith.extui %0 : i1 to i32
    %c0_i32_0 = arith.constant 0 : i32
    %2 = arith.cmpi ne, %1, %c0_i32_0 : i32
    scf.if %2 {
      %cst_10 = arith.constant 0.000000e+00 : f32
      %13 = vector.broadcast %cst_10 : f32 to vector<8x64xf32>
      %c0_11 = arith.constant 0 : index
      %c0_12 = arith.constant 0 : index
      %14 = vector.load %arg9[%c0_11, %c0_12] : memref<8x64xf32, #tpu.memory_space<vmem>>, vector<8x64xf32>
      tpu.vector_store %arg9[%c0_11, %c0_12], %13 {strides = array<i32>} : memref<8x64xf32, #tpu.memory_space<vmem>>, vector<8x64xf32>,
    } else {
    }
    %c0 = arith.constant 0 : index
    %c0_1 = arith.constant 0 : index
    %3 = vector.load %arg9[%c0, %c0_1] : memref<8x64xf32, #tpu.memory_space<vmem>>, vector<8x64xf32>
    %c0_2 = arith.constant 0 : index
    %c0_3 = arith.constant 0 : index
    %4 = vector.load %arg3[%c0_2, %c0_3] : memref<8x32xf32, #tpu.memory_space<vmem>>, vector<8x32xf32>
    %5 = arith.truncf %4 : vector<8x32xf32> to vector<8x32xbf16>
    %c0_4 = arith.constant 0 : index
    %c0_5 = arith.constant 0 : index
    %6 = vector.load %arg4[%c0_4, %c0_5] : memref<32x64xbf16, #tpu.memory_space<vmem>>, vector<32x64xbf16>
    %cst = arith.constant dense<0.000000e+00> : vector<8x64xf32>
    %7 = tpu.matmul %5, %6, %cst {dimension_numbers = #tpu.dot_dimension_numbers<[1], [0], [0], [1], [0, 0, 1, 1], [], []>} : vector<8x32xbf16>, vector<32x64xbf16>, vector<8x64xf32> -> vector<8x64xf32>
    %8 = arith.addf %3, %7 : vector<8x64xf32>
    %c0_6 = arith.constant 0 : index
    %c0_7 = arith.constant 0 : index
    %9 = vector.load %arg9[%c0_6, %c0_7] : memref<8x64xf32, #tpu.memory_space<vmem>>, vector<8x64xf32>
    tpu.vector_store %arg9[%c0_6, %c0_7], %8 {strides = array<i32>} : memref<8x64xf32, #tpu.memory_space<vmem>>, vector<8x64xf32>,
    %c0_i32_8 = arith.constant 0 : i32
    %10 = arith.cmpi eq, %arg2, %c0_i32_8 : i32
    %11 = arith.extui %10 : i1 to i32
    %c0_i32_9 = arith.constant 0 : i32
    %12 = arith.cmpi ne, %11, %c0_i32_9 : i32
    scf.if %12 {
      %c0_10 = arith.constant 0 : index
      %c0_11 = arith.constant 0 : index
      %13 = vector.load %arg9[%c0_10, %c0_11] : memref<8x64xf32, #tpu.memory_space<vmem>>, vector<8x64xf32>
      %c0_12 = arith.constant 0 : index
      %c0_13 = arith.constant 0 : index
      %14 = vector.load %arg5[%c0_12, %c0_13] : memref<1x64xf32, #tpu.memory_space<vmem>>, vector<1x64xf32>
      %15 = vector.broadcast %14 : vector<1x64xf32> to vector<8x64xf32>
      %16 = arith.addf %13, %15 : vector<8x64xf32>
      %17 = vector.extract_strided_slice %16 {offsets = [0, 0], sizes = [8, 32], strides = [1, 1]} : vector<8x64xf32> to vector<8x32xf32>
      %cst_14 = arith.constant dense<0.000000e+00> : vector<8xf32>
      %18 = vector.multi_reduction <add>, %17, %cst_14 [1] : vector<8x32xf32> to vector<8xf32>
      %19 = vector.shape_cast %18 : vector<8xf32> to vector<8x1xf32>
      %cst_15 = arith.constant 3.200000e+01 : f32
      %20 = vector.broadcast %cst_15 : f32 to vector<8x1xf32>
      %21 = arith.divf %19, %20 : vector<8x1xf32>
      %22 = vector.broadcast %21 : vector<8x1xf32> to vector<8x32xf32>
      %23 = arith.subf %17, %22 : vector<8x32xf32>
      %24 = arith.mulf %23, %23 : vector<8x32xf32>
      %cst_16 = arith.constant dense<0.000000e+00> : vector<8xf32>
      %25 = vector.multi_reduction <add>, %24, %cst_16 [1] : vector<8x32xf32> to vector<8xf32>
      %26 = vector.shape_cast %25 : vector<8xf32> to vector<8x1xf32>
      %cst_17 = arith.constant 3.200000e+01 : f32
      %27 = vector.broadcast %cst_17 : f32 to vector<8x1xf32>
      %28 = arith.divf %26, %27 : vector<8x1xf32>
      %29 = vector.broadcast %21 : vector<8x1xf32> to vector<8x32xf32>
      %30 = arith.subf %17, %29 : vector<8x32xf32>
      %cst_18 = arith.constant 9.99999974E-6 : f32
      %31 = vector.broadcast %cst_18 : f32 to vector<8x1xf32>
      %32 = arith.addf %28, %31 : vector<8x1xf32>
      %33 = math.rsqrt %32 : vector<8x1xf32>
      %34 = vector.broadcast %33 : vector<8x1xf32> to vector<8x32xf32>
      %35 = arith.mulf %30, %34 : vector<8x32xf32>
      %c0_19 = arith.constant 0 : index
      %c0_20 = arith.constant 0 : index
      %36 = vector.load %arg6[%c0_19, %c0_20] : memref<1x32xf32, #tpu.memory_space<vmem>>, vector<1x32xf32>
      %37 = vector.broadcast %36 : vector<1x32xf32> to vector<8x32xf32>
      %38 = arith.mulf %35, %37 : vector<8x32xf32>
      %c0_21 = arith.constant 0 : index
      %c0_22 = arith.constant 0 : index
      %39 = vector.load %arg7[%c0_21, %c0_22] : memref<1x32xf32, #tpu.memory_space<vmem>>, vector<1x32xf32>
      %40 = vector.broadcast %39 : vector<1x32xf32> to vector<8x32xf32>
      %41 = arith.addf %38, %40 : vector<8x32xf32>
      %42 = vector.extract_strided_slice %16 {offsets = [0, 32], sizes = [8, 32], strides = [1, 1]} : vector<8x64xf32> to vector<8x32xf32>
      %cst_23 = arith.constant dense<0.000000e+00> : vector<8xf32>
      %43 = vector.multi_reduction <add>, %42, %cst_23 [1] : vector<8x32xf32> to vector<8xf32>
      %44 = vector.shape_cast %43 : vector<8xf32> to vector<8x1xf32>
      %cst_24 = arith.constant 3.200000e+01 : f32
      %45 = vector.broadcast %cst_24 : f32 to vector<8x1xf32>
      %46 = arith.divf %44, %45 : vector<8x1xf32>
      %47 = vector.broadcast %46 : vector<8x1xf32> to vector<8x32xf32>
      %48 = arith.subf %42, %47 : vector<8x32xf32>
      %49 = arith.mulf %48, %48 : vector<8x32xf32>
      %cst_25 = arith.constant dense<0.000000e+00> : vector<8xf32>
      %50 = vector.multi_reduction <add>, %49, %cst_25 [1] : vector<8x32xf32> to vector<8xf32>
      %51 = vector.shape_cast %50 : vector<8xf32> to vector<8x1xf32>
      %cst_26 = arith.constant 3.200000e+01 : f32
      %52 = vector.broadcast %cst_26 : f32 to vector<8x1xf32>
      %53 = arith.divf %51, %52 : vector<8x1xf32>
      %54 = vector.broadcast %46 : vector<8x1xf32> to vector<8x32xf32>
      %55 = arith.subf %42, %54 : vector<8x32xf32>
      %cst_27 = arith.constant 9.99999974E-6 : f32
      %56 = vector.broadcast %cst_27 : f32 to vector<8x1xf32>
      %57 = arith.addf %53, %56 : vector<8x1xf32>
      %58 = math.rsqrt %57 : vector<8x1xf32>
      %59 = vector.broadcast %58 : vector<8x1xf32> to vector<8x32xf32>
      %60 = arith.mulf %55, %59 : vector<8x32xf32>
      %c0_28 = arith.constant 0 : index
      %c0_29 = arith.constant 0 : index
      %61 = vector.load %arg6[%c0_28, %c0_29] : memref<1x32xf32, #tpu.memory_space<vmem>>, vector<1x32xf32>
      %62 = vector.broadcast %61 : vector<1x32xf32> to vector<8x32xf32>
      %63 = arith.mulf %60, %62 : vector<8x32xf32>
      %c0_30 = arith.constant 0 : index
      %c0_31 = arith.constant 0 : index
      %64 = vector.load %arg7[%c0_30, %c0_31] : memref<1x32xf32, #tpu.memory_space<vmem>>, vector<1x32xf32>
      %65 = vector.broadcast %64 : vector<1x32xf32> to vector<8x32xf32>
      %66 = arith.addf %63, %65 : vector<8x32xf32>
      %67 = tpu.concatenate %41, %66 in 1 : vector<8x32xf32>, vector<8x32xf32> -> vector<8x64xf32>
      %68 = arith.truncf %67 : vector<8x64xf32> to vector<8x64xbf16>
      %c0_32 = arith.constant 0 : index
      %c0_33 = arith.constant 0 : index
      %69 = vector.load %arg8[%c0_32, %c0_33] : memref<8x64xbf16, #tpu.memory_space<vmem>>, vector<8x64xbf16>
      tpu.vector_store %arg8[%c0_32, %c0_33], %68 {strides = array<i32>} : memref<8x64xbf16, #tpu.memory_space<vmem>>, vector<8x64xbf16>,
    } else {
    }
    return
  }
  func.func @transform_0(%arg0: i32, %arg1: i32, %arg2: i32) -> (i32, i32) {
    %c0_i32 = arith.constant 0 : i32
    return %arg0, %arg2 : i32, i32
  }
  func.func @transform_1(%arg0: i32, %arg1: i32, %arg2: i32) -> (i32, i32) {
    %c0_i32 = arith.constant 0 : i32
    return %arg2, %arg1 : i32, i32
  }
  func.func @transform_2(%arg0: i32, %arg1: i32, %arg2: i32) -> (i32, i32) {
    %c0_i32 = arith.constant 0 : i32
    %c0_i32_0 = arith.constant 0 : i32
    return %c0_i32, %arg1 : i32, i32
  }
  func.func @transform_3(%arg0: i32, %arg1: i32, %arg2: i32) -> (i32, i32) {
    %c0_i32 = arith.constant 0 : i32
    %c0_i32_0 = arith.constant 0 : i32
    %c0_i32_1 = arith.constant 0 : i32
    return %c0_i32, %c0_i32_0 : i32, i32
  }
  func.func @transform_4(%arg0: i32, %arg1: i32, %arg2: i32) -> (i32, i32) {
    %c0_i32 = arith.constant 0 : i32
    %c0_i32_0 = arith.constant 0 : i32
    %c0_i32_1 = arith.constant 0 : i32
    return %c0_i32, %c0_i32_0 : i32, i32
  }
  func.func @transform_5(%arg0: i32, %arg1: i32, %arg2: i32) -> (i32, i32) {
    %c0_i32 = arith.constant 0 : i32
    return %arg0, %arg1 : i32, i32
  }
}

module attributes {stable_mosaic.version = 11 : i64} {
  func.func @kernel(%arg0: i32, %arg1: i32, %arg2: i32, %arg3: memref<16x32xbf16, #tpu.memory_space<vmem>>, %arg4: memref<32x32xbf16, #tpu.memory_space<vmem>>, %arg5: memref<1x32xf32, #tpu.memory_space<vmem>>, %arg6: memref<16x32xf32, #tpu.memory_space<vmem>>, %arg7: memref<1x32xf32, #tpu.memory_space<vmem>>, %arg8: memref<1x32xf32, #tpu.memory_space<vmem>>, %arg9: memref<16x32xf32, #tpu.memory_space<vmem>>, %arg10: memref<16x32xf32, #tpu.memory_space<vmem>>) attributes {dimension_semantics = [#tpu.dimension_semantics<parallel>, #tpu.dimension_semantics<parallel>, #tpu.dimension_semantics<arbitrary>], iteration_bounds = array<i64: 1, 1, 1>, scalar_prefetch = 0 : i64, scratch_operands = 1 : i64, tpu.core_type = #tpu.core_type<tc>, window_params = [{transform_indices = @transform_0, window_bounds = array<i64: 16, 32>}, {transform_indices = @transform_1, window_bounds = array<i64: 32, 32>}, {transform_indices = @transform_2, window_bounds = array<i64: 1, 32>}, {transform_indices = @transform_3, window_bounds = array<i64: 16, 32>}, {pipeline_mode = #tpu.pipeline_mode<synchronous>, transform_indices = @transform_4, window_bounds = array<i64: 1, 32>}, {pipeline_mode = #tpu.pipeline_mode<synchronous>, transform_indices = @transform_5, window_bounds = array<i64: 1, 32>}, {transform_indices = @transform_6, window_bounds = array<i64: 16, 32>}]} {
    %c0_i32 = arith.constant 0 : i32
    %0 = arith.cmpi eq, %arg2, %c0_i32 : i32
    %1 = arith.extui %0 : i1 to i32
    %c0_i32_0 = arith.constant 0 : i32
    %2 = arith.cmpi ne, %1, %c0_i32_0 : i32
    scf.if %2 {
      %cst_10 = arith.constant 0.000000e+00 : f32
      %12 = vector.broadcast %cst_10 : f32 to vector<16x32xf32>
      %c0_11 = arith.constant 0 : index
      %c0_12 = arith.constant 0 : index
      %13 = vector.load %arg10[%c0_11, %c0_12] : memref<16x32xf32, #tpu.memory_space<vmem>>, vector<16x32xf32>
      tpu.vector_store %arg10[%c0_11, %c0_12], %12 {strides = array<i32>} : memref<16x32xf32, #tpu.memory_space<vmem>>, vector<16x32xf32>,
    } else {
    }
    %c0 = arith.constant 0 : index
    %c0_1 = arith.constant 0 : index
    %3 = vector.load %arg10[%c0, %c0_1] : memref<16x32xf32, #tpu.memory_space<vmem>>, vector<16x32xf32>
    %c0_2 = arith.constant 0 : index
    %c0_3 = arith.constant 0 : index
    %4 = vector.load %arg3[%c0_2, %c0_3] : memref<16x32xbf16, #tpu.memory_space<vmem>>, vector<16x32xbf16>
    %c0_4 = arith.constant 0 : index
    %c0_5 = arith.constant 0 : index
    %5 = vector.load %arg4[%c0_4, %c0_5] : memref<32x32xbf16, #tpu.memory_space<vmem>>, vector<32x32xbf16>
    %cst = arith.constant dense<0.000000e+00> : vector<16x32xf32>
    %6 = tpu.matmul %4, %5, %cst {dimension_numbers = #tpu.dot_dimension_numbers<[1], [0], [0], [1], [0, 0, 1, 1], [], []>} : vector<16x32xbf16>, vector<32x32xbf16>, vector<16x32xf32> -> vector<16x32xf32>
    %7 = arith.addf %3, %6 : vector<16x32xf32>
    %c0_6 = arith.constant 0 : index
    %c0_7 = arith.constant 0 : index
    %8 = vector.load %arg10[%c0_6, %c0_7] : memref<16x32xf32, #tpu.memory_space<vmem>>, vector<16x32xf32>
    tpu.vector_store %arg10[%c0_6, %c0_7], %7 {strides = array<i32>} : memref<16x32xf32, #tpu.memory_space<vmem>>, vector<16x32xf32>,
    %c0_i32_8 = arith.constant 0 : i32
    %9 = arith.cmpi eq, %arg2, %c0_i32_8 : i32
    %10 = arith.extui %9 : i1 to i32
    %c0_i32_9 = arith.constant 0 : i32
    %11 = arith.cmpi ne, %10, %c0_i32_9 : i32
    scf.if %11 {
      %c0_10 = arith.constant 0 : index
      %c0_11 = arith.constant 0 : index
      %12 = vector.load %arg10[%c0_10, %c0_11] : memref<16x32xf32, #tpu.memory_space<vmem>>, vector<16x32xf32>
      %c0_12 = arith.constant 0 : index
      %c0_13 = arith.constant 0 : index
      %13 = vector.load %arg5[%c0_12, %c0_13] : memref<1x32xf32, #tpu.memory_space<vmem>>, vector<1x32xf32>
      %14 = vector.broadcast %13 : vector<1x32xf32> to vector<16x32xf32>
      %15 = arith.addf %12, %14 : vector<16x32xf32>
      %c0_14 = arith.constant 0 : index
      %c0_15 = arith.constant 0 : index
      %16 = vector.load %arg6[%c0_14, %c0_15] : memref<16x32xf32, #tpu.memory_space<vmem>>, vector<16x32xf32>
      %17 = arith.addf %15, %16 : vector<16x32xf32>
      %cst_16 = arith.constant dense<0.000000e+00> : vector<16xf32>
      %18 = vector.multi_reduction <add>, %17, %cst_16 [1] : vector<16x32xf32> to vector<16xf32>
      %19 = vector.shape_cast %18 : vector<16xf32> to vector<16x1xf32>
      %cst_17 = arith.constant 3.200000e+01 : f32
      %20 = vector.broadcast %cst_17 : f32 to vector<16x1xf32>
      %21 = arith.divf %19, %20 : vector<16x1xf32>
      %22 = vector.broadcast %21 : vector<16x1xf32> to vector<16x32xf32>
      %23 = arith.subf %17, %22 : vector<16x32xf32>
      %24 = arith.mulf %23, %23 : vector<16x32xf32>
      %cst_18 = arith.constant dense<0.000000e+00> : vector<16xf32>
      %25 = vector.multi_reduction <add>, %24, %cst_18 [1] : vector<16x32xf32> to vector<16xf32>
      %26 = vector.shape_cast %25 : vector<16xf32> to vector<16x1xf32>
      %cst_19 = arith.constant 3.200000e+01 : f32
      %27 = vector.broadcast %cst_19 : f32 to vector<16x1xf32>
      %28 = arith.divf %26, %27 : vector<16x1xf32>
      %29 = vector.broadcast %21 : vector<16x1xf32> to vector<16x32xf32>
      %30 = arith.subf %17, %29 : vector<16x32xf32>
      %cst_20 = arith.constant 9.99999974E-6 : f32
      %31 = vector.broadcast %cst_20 : f32 to vector<16x1xf32>
      %32 = arith.addf %28, %31 : vector<16x1xf32>
      %33 = math.rsqrt %32 : vector<16x1xf32>
      %34 = vector.broadcast %33 : vector<16x1xf32> to vector<16x32xf32>
      %35 = arith.mulf %30, %34 : vector<16x32xf32>
      %c0_21 = arith.constant 0 : index
      %c0_22 = arith.constant 0 : index
      %36 = vector.load %arg7[%c0_21, %c0_22] : memref<1x32xf32, #tpu.memory_space<vmem>>, vector<1x32xf32>
      %37 = vector.broadcast %36 : vector<1x32xf32> to vector<16x32xf32>
      %38 = arith.mulf %35, %37 : vector<16x32xf32>
      %c0_23 = arith.constant 0 : index
      %c0_24 = arith.constant 0 : index
      %39 = vector.load %arg8[%c0_23, %c0_24] : memref<1x32xf32, #tpu.memory_space<vmem>>, vector<1x32xf32>
      %40 = vector.broadcast %39 : vector<1x32xf32> to vector<16x32xf32>
      %41 = arith.addf %38, %40 : vector<16x32xf32>
      %c0_25 = arith.constant 0 : index
      %c0_26 = arith.constant 0 : index
      %42 = vector.load %arg9[%c0_25, %c0_26] : memref<16x32xf32, #tpu.memory_space<vmem>>, vector<16x32xf32>
      tpu.vector_store %arg9[%c0_25, %c0_26], %41 {strides = array<i32>} : memref<16x32xf32, #tpu.memory_space<vmem>>, vector<16x32xf32>,
    } else {
    }
    return
  }
  func.func @transform_0(%arg0: i32, %arg1: i32, %arg2: i32) -> (i32, i32) {
    %c0_i32 = arith.constant 0 : i32
    return %arg0, %arg2 : i32, i32
  }
  func.func @transform_1(%arg0: i32, %arg1: i32, %arg2: i32) -> (i32, i32) {
    %c0_i32 = arith.constant 0 : i32
    return %arg2, %arg1 : i32, i32
  }
  func.func @transform_2(%arg0: i32, %arg1: i32, %arg2: i32) -> (i32, i32) {
    %c0_i32 = arith.constant 0 : i32
    %c0_i32_0 = arith.constant 0 : i32
    return %c0_i32, %arg1 : i32, i32
  }
  func.func @transform_3(%arg0: i32, %arg1: i32, %arg2: i32) -> (i32, i32) {
    %c0_i32 = arith.constant 0 : i32
    return %arg0, %arg1 : i32, i32
  }
  func.func @transform_4(%arg0: i32, %arg1: i32, %arg2: i32) -> (i32, i32) {
    %c0_i32 = arith.constant 0 : i32
    %c0_i32_0 = arith.constant 0 : i32
    %c0_i32_1 = arith.constant 0 : i32
    return %c0_i32, %c0_i32_0 : i32, i32
  }
  func.func @transform_5(%arg0: i32, %arg1: i32, %arg2: i32) -> (i32, i32) {
    %c0_i32 = arith.constant 0 : i32
    %c0_i32_0 = arith.constant 0 : i32
    %c0_i32_1 = arith.constant 0 : i32
    return %c0_i32, %c0_i32_0 : i32, i32
  }
  func.func @transform_6(%arg0: i32, %arg1: i32, %arg2: i32) -> (i32, i32) {
    %c0_i32 = arith.constant 0 : i32
    return %arg0, %arg1 : i32, i32
  }
}

module attributes {stable_mosaic.version = 11 : i64} {
  func.func @kernel(%arg0: i32, %arg1: i32, %arg2: memref<1x8x32xbf16, #tpu.memory_space<vmem>>, %arg3: memref<1x8x32xbf16, #tpu.memory_space<vmem>>, %arg4: memref<1x8x32xbf16, #tpu.memory_space<vmem>>, %arg5: memref<1x8x32xbf16, #tpu.memory_space<vmem>>, %arg6: memref<1x8x32xbf16, #tpu.memory_space<vmem>>, %arg7: memref<1x4x32xbf16, #tpu.memory_space<vmem>>, %arg8: memref<1x4x32xbf16, #tpu.memory_space<vmem>>, %arg9: memref<1x8x8xbf16, #tpu.memory_space<vmem>>, %arg10: memref<32x4xbf16, #tpu.memory_space<vmem>>, %arg11: memref<1x32xf32, #tpu.memory_space<vmem>>, %arg12: memref<1x8x32xbf16, #tpu.memory_space<vmem>>) attributes {dimension_semantics = [#tpu.dimension_semantics<parallel>, #tpu.dimension_semantics<parallel>], iteration_bounds = array<i64: 2, 1>, scalar_prefetch = 0 : i64, scratch_operands = 0 : i64, tpu.core_type = #tpu.core_type<tc>, window_params = [{transform_indices = @transform_0, window_bounds = array<i64: 1, 8, 32>}, {transform_indices = @transform_1, window_bounds = array<i64: 1, 8, 32>}, {transform_indices = @transform_2, window_bounds = array<i64: 1, 8, 32>}, {transform_indices = @transform_3, window_bounds = array<i64: 1, 8, 32>}, {transform_indices = @transform_4, window_bounds = array<i64: 1, 8, 32>}, {transform_indices = @transform_5, window_bounds = array<i64: 1, 4, 32>}, {transform_indices = @transform_6, window_bounds = array<i64: 1, 4, 32>}, {transform_indices = @transform_7, window_bounds = array<i64: 1, 8, 8>}, {pipeline_mode = #tpu.pipeline_mode<synchronous>, transform_indices = @transform_8, window_bounds = array<i64: 32, 4>}, {pipeline_mode = #tpu.pipeline_mode<synchronous>, transform_indices = @transform_9, window_bounds = array<i64: 1, 32>}, {transform_indices = @transform_10, window_bounds = array<i64: 1, 8, 32>}]} {
    %c0 = arith.constant 0 : index
    %c0_0 = arith.constant 0 : index
    %c0_1 = arith.constant 0 : index
    %0 = vector.load %arg2[%c0, %c0_0, %c0_1] : memref<1x8x32xbf16, #tpu.memory_space<vmem>>, vector<1x8x32xbf16>
    %1 = vector.shape_cast %0 : vector<1x8x32xbf16> to vector<8x32xbf16>
    %c0_2 = arith.constant 0 : index
    %c0_3 = arith.constant 0 : index
    %c0_4 = arith.constant 0 : index
    %2 = vector.load %arg3[%c0_2, %c0_3, %c0_4] : memref<1x8x32xbf16, #tpu.memory_space<vmem>>, vector<1x8x32xbf16>
    %3 = vector.shape_cast %2 : vector<1x8x32xbf16> to vector<8x32xbf16>
    %c0_5 = arith.constant 0 : index
    %c0_6 = arith.constant 0 : index
    %c0_7 = arith.constant 0 : index
    %4 = vector.load %arg4[%c0_5, %c0_6, %c0_7] : memref<1x8x32xbf16, #tpu.memory_space<vmem>>, vector<1x8x32xbf16>
    %5 = vector.shape_cast %4 : vector<1x8x32xbf16> to vector<8x32xbf16>
    %c0_8 = arith.constant 0 : index
    %c0_9 = arith.constant 0 : index
    %c0_10 = arith.constant 0 : index
    %6 = vector.load %arg5[%c0_8, %c0_9, %c0_10] : memref<1x8x32xbf16, #tpu.memory_space<vmem>>, vector<1x8x32xbf16>
    %7 = vector.shape_cast %6 : vector<1x8x32xbf16> to vector<8x32xbf16>
    %c0_11 = arith.constant 0 : index
    %c0_12 = arith.constant 0 : index
    %c0_13 = arith.constant 0 : index
    %8 = vector.load %arg6[%c0_11, %c0_12, %c0_13] : memref<1x8x32xbf16, #tpu.memory_space<vmem>>, vector<1x8x32xbf16>
    %9 = vector.shape_cast %8 : vector<1x8x32xbf16> to vector<8x32xbf16>
    %c0_14 = arith.constant 0 : index
    %c0_15 = arith.constant 0 : index
    %c0_16 = arith.constant 0 : index
    %10 = vector.load %arg7[%c0_14, %c0_15, %c0_16] : memref<1x4x32xbf16, #tpu.memory_space<vmem>>, vector<1x4x32xbf16>
    %11 = vector.shape_cast %10 : vector<1x4x32xbf16> to vector<4x32xbf16>
    %c0_17 = arith.constant 0 : index
    %c0_18 = arith.constant 0 : index
    %c0_19 = arith.constant 0 : index
    %12 = vector.load %arg8[%c0_17, %c0_18, %c0_19] : memref<1x4x32xbf16, #tpu.memory_space<vmem>>, vector<1x4x32xbf16>
    %13 = vector.shape_cast %12 : vector<1x4x32xbf16> to vector<4x32xbf16>
    %c0_20 = arith.constant 0 : index
    %c0_21 = arith.constant 0 : index
    %c0_22 = arith.constant 0 : index
    %14 = vector.load %arg9[%c0_20, %c0_21, %c0_22] : memref<1x8x8xbf16, #tpu.memory_space<vmem>>, vector<1x8x8xbf16>
    %15 = vector.shape_cast %14 : vector<1x8x8xbf16> to vector<8x8xbf16>
    %c0_23 = arith.constant 0 : index
    %c0_24 = arith.constant 0 : index
    %16 = vector.load %arg10[%c0_23, %c0_24] : memref<32x4xbf16, #tpu.memory_space<vmem>>, vector<32x4xbf16>
    %c0_25 = arith.constant 0 : index
    %c0_26 = arith.constant 0 : index
    %17 = vector.load %arg11[%c0_25, %c0_26] : memref<1x32xf32, #tpu.memory_space<vmem>>, vector<1x32xf32>
    %18 = tpu.iota {dimensions = array<i32: 0>} : vector<8x16xi32>
    %19 = tpu.iota {dimensions = array<i32: 1>} : vector<8x16xi32>
    %20 = arith.subi %19, %18 : vector<8x16xi32>
    %c1_i32 = arith.constant 1 : i32
    %21 = vector.broadcast %c1_i32 : i32 to vector<8x16xi32>
    %22 = arith.subi %20, %21 : vector<8x16xi32>
    %c0_i32 = arith.constant 0 : i32
    %23 = vector.broadcast %c0_i32 : i32 to vector<8x16xi32>
    %24 = arith.cmpi sge, %22, %23 : vector<8x16xi32>
    %c4_i32 = arith.constant 4 : i32
    %25 = vector.broadcast %c4_i32 : i32 to vector<8x16xi32>
    %26 = arith.cmpi slt, %22, %25 : vector<8x16xi32>
    %27 = arith.andi %24, %26 : vector<8x16xi1>
    %c0_i32_27 = arith.constant 0 : i32
    %28 = vector.broadcast %c0_i32_27 : i32 to vector<8x16xi32>
    %29 = arith.cmpi eq, %22, %28 : vector<8x16xi32>
    %c1_i32_28 = arith.constant 1 : i32
    %30 = vector.broadcast %c1_i32_28 : i32 to vector<8x16xi32>
    %31 = arith.cmpi eq, %22, %30 : vector<8x16xi32>
    %c2_i32 = arith.constant 2 : i32
    %32 = vector.broadcast %c2_i32 : i32 to vector<8x16xi32>
    %33 = arith.cmpi eq, %22, %32 : vector<8x16xi32>
    %c3_i32 = arith.constant 3 : i32
    %34 = vector.broadcast %c3_i32 : i32 to vector<8x16xi32>
    %35 = arith.cmpi eq, %22, %34 : vector<8x16xi32>
    %36 = vector.extract_strided_slice %1 {offsets = [0, 0], sizes = [8, 16], strides = [1, 1]} : vector<8x32xbf16> to vector<8x16xbf16>
    %37 = arith.extf %36 : vector<8x16xbf16> to vector<8x16xf32>
    %38 = vector.extract_strided_slice %17 {offsets = [0, 0], sizes = [1, 16], strides = [1, 1]} : vector<1x32xf32> to vector<1x16xf32>
    %39 = vector.broadcast %38 : vector<1x16xf32> to vector<8x16xf32>
    %40 = arith.addf %37, %39 : vector<8x16xf32>
    %41 = arith.truncf %40 : vector<8x16xf32> to vector<8x16xbf16>
    %42 = vector.extract_strided_slice %16 {offsets = [0, 0], sizes = [16, 4], strides = [1, 1]} : vector<32x4xbf16> to vector<16x4xbf16>
    %cst = arith.constant dense<0.000000e+00> : vector<8x4xf32>
    %43 = tpu.matmul %41, %42, %cst {dimension_numbers = #tpu.dot_dimension_numbers<[1], [0], [0], [1], [0, 0, 1, 1], [], []>} : vector<8x16xbf16>, vector<16x4xbf16>, vector<8x4xf32> -> vector<8x4xf32>
    %cst_29 = arith.constant 0.000000e+00 : f32
    %44 = vector.broadcast %cst_29 : f32 to vector<8x16xf32>
    %45 = vector.extract_strided_slice %43 {offsets = [0, 0], sizes = [8, 1], strides = [1, 1]} : vector<8x4xf32> to vector<8x1xf32>
    %cst_30 = arith.constant 0.000000e+00 : f32
    %46 = vector.shape_cast %45 : vector<8x1xf32> to vector<8x1xf32>
    %47 = vector.broadcast %46 : vector<8x1xf32> to vector<8x16xf32>
    %48 = vector.broadcast %cst_30 : f32 to vector<8x16xf32>
    %49 = arith.select %29, %47, %48 : vector<8x16xi1>, vector<8x16xf32>
    %50 = arith.addf %44, %49 : vector<8x16xf32>
    %51 = vector.extract_strided_slice %43 {offsets = [0, 1], sizes = [8, 1], strides = [1, 1]} : vector<8x4xf32> to vector<8x1xf32>
    %cst_31 = arith.constant 0.000000e+00 : f32
    %52 = vector.shape_cast %51 : vector<8x1xf32> to vector<8x1xf32>
    %53 = vector.broadcast %52 : vector<8x1xf32> to vector<8x16xf32>
    %54 = vector.broadcast %cst_31 : f32 to vector<8x16xf32>
    %55 = arith.select %31, %53, %54 : vector<8x16xi1>, vector<8x16xf32>
    %56 = arith.addf %50, %55 : vector<8x16xf32>
    %57 = vector.extract_strided_slice %43 {offsets = [0, 2], sizes = [8, 1], strides = [1, 1]} : vector<8x4xf32> to vector<8x1xf32>
    %cst_32 = arith.constant 0.000000e+00 : f32
    %58 = vector.shape_cast %57 : vector<8x1xf32> to vector<8x1xf32>
    %59 = vector.broadcast %58 : vector<8x1xf32> to vector<8x16xf32>
    %60 = vector.broadcast %cst_32 : f32 to vector<8x16xf32>
    %61 = arith.select %33, %59, %60 : vector<8x16xi1>, vector<8x16xf32>
    %62 = arith.addf %56, %61 : vector<8x16xf32>
    %63 = vector.extract_strided_slice %43 {offsets = [0, 3], sizes = [8, 1], strides = [1, 1]} : vector<8x4xf32> to vector<8x1xf32>
    %cst_33 = arith.constant 0.000000e+00 : f32
    %64 = vector.shape_cast %63 : vector<8x1xf32> to vector<8x1xf32>
    %65 = vector.broadcast %64 : vector<8x1xf32> to vector<8x16xf32>
    %66 = vector.broadcast %cst_33 : f32 to vector<8x16xf32>
    %67 = arith.select %35, %65, %66 : vector<8x16xi1>, vector<8x16xf32>
    %68 = arith.addf %62, %67 : vector<8x16xf32>
    %cst_34 = arith.constant -1.000000e+30 : f32
    %69 = vector.broadcast %cst_34 : f32 to vector<8x16xf32>
    %70 = arith.select %27, %68, %69 : vector<8x16xi1>, vector<8x16xf32>
    %71 = vector.extract_strided_slice %3 {offsets = [0, 0], sizes = [8, 16], strides = [1, 1]} : vector<8x32xbf16> to vector<8x16xbf16>
    %cst_35 = arith.constant dense<0.000000e+00> : vector<8x8xf32>
    %72 = tpu.matmul %36, %71, %cst_35 {dimension_numbers = #tpu.dot_dimension_numbers<[1], [1], [0], [0], [0, 0, 1, 0], [], []>} : vector<8x16xbf16>, vector<8x16xbf16>, vector<8x8xf32> -> vector<8x8xf32>
    %73 = vector.extract_strided_slice %70 {offsets = [0, 0], sizes = [8, 8], strides = [1, 1]} : vector<8x16xf32> to vector<8x8xf32>
    %74 = arith.addf %72, %73 : vector<8x8xf32>
    %75 = vector.extract_strided_slice %5 {offsets = [0, 0], sizes = [8, 16], strides = [1, 1]} : vector<8x32xbf16> to vector<8x16xbf16>
    %cst_36 = arith.constant dense<0.000000e+00> : vector<8x8xf32>
    %76 = tpu.matmul %36, %75, %cst_36 {dimension_numbers = #tpu.dot_dimension_numbers<[1], [1], [0], [0], [0, 0, 1, 0], [], []>} : vector<8x16xbf16>, vector<8x16xbf16>, vector<8x8xf32> -> vector<8x8xf32>
    %77 = vector.extract_strided_slice %70 {offsets = [0, 8], sizes = [8, 8], strides = [1, 1]} : vector<8x16xf32> to vector<8x8xf32>
    %78 = arith.addf %76, %77 : vector<8x8xf32>
    %79 = vector.extract_strided_slice %11 {offsets = [0, 0], sizes = [4, 16], strides = [1, 1]} : vector<4x32xbf16> to vector<4x16xbf16>
    %cst_37 = arith.constant dense<0.000000e+00> : vector<8x4xf32>
    %80 = tpu.matmul %36, %79, %cst_37 {dimension_numbers = #tpu.dot_dimension_numbers<[1], [1], [0], [0], [0, 0, 1, 0], [], []>} : vector<8x16xbf16>, vector<4x16xbf16>, vector<8x4xf32> -> vector<8x4xf32>
    %81 = vector.extract_strided_slice %15 {offsets = [0, 0], sizes = [8, 4], strides = [1, 1]} : vector<8x8xbf16> to vector<8x4xbf16>
    %82 = arith.extf %81 : vector<8x4xbf16> to vector<8x4xf32>
    %83 = arith.addf %80, %82 : vector<8x4xf32>
    %cst_38 = arith.constant dense<0xFF800000> : vector<8xf32>
    %84 = vector.multi_reduction <maximumf>, %74, %cst_38 [1] : vector<8x8xf32> to vector<8xf32>
    %85 = vector.shape_cast %84 : vector<8xf32> to vector<8x1xf32>
    %cst_39 = arith.constant dense<0xFF800000> : vector<8xf32>
    %86 = vector.multi_reduction <maximumf>, %78, %cst_39 [1] : vector<8x8xf32> to vector<8xf32>
    %87 = vector.shape_cast %86 : vector<8xf32> to vector<8x1xf32>
    %88 = arith.maximumf %85, %87 : vector<8x1xf32>
    %cst_40 = arith.constant dense<0xFF800000> : vector<8xf32>
    %89 = vector.multi_reduction <maximumf>, %83, %cst_40 [1] : vector<8x4xf32> to vector<8xf32>
    %90 = vector.shape_cast %89 : vector<8xf32> to vector<8x1xf32>
    %91 = arith.maximumf %88, %90 : vector<8x1xf32>
    %92 = vector.broadcast %91 : vector<8x1xf32> to vector<8x8xf32>
    %93 = arith.subf %74, %92 : vector<8x8xf32>
    %94 = math.exp %93 : vector<8x8xf32>
    %95 = vector.broadcast %91 : vector<8x1xf32> to vector<8x8xf32>
    %96 = arith.subf %78, %95 : vector<8x8xf32>
    %97 = math.exp %96 : vector<8x8xf32>
    %98 = vector.broadcast %91 : vector<8x1xf32> to vector<8x4xf32>
    %99 = arith.subf %83, %98 : vector<8x4xf32>
    %100 = math.exp %99 : vector<8x4xf32>
    %cst_41 = arith.constant dense<0.000000e+00> : vector<8xf32>
    %101 = vector.multi_reduction <add>, %94, %cst_41 [1] : vector<8x8xf32> to vector<8xf32>
    %102 = vector.shape_cast %101 : vector<8xf32> to vector<8x1xf32>
    %cst_42 = arith.constant dense<0.000000e+00> : vector<8xf32>
    %103 = vector.multi_reduction <add>, %97, %cst_42 [1] : vector<8x8xf32> to vector<8xf32>
    %104 = vector.shape_cast %103 : vector<8xf32> to vector<8x1xf32>
    %105 = arith.addf %102, %104 : vector<8x1xf32>
    %cst_43 = arith.constant dense<0.000000e+00> : vector<8xf32>
    %106 = vector.multi_reduction <add>, %100, %cst_43 [1] : vector<8x4xf32> to vector<8xf32>
    %107 = vector.shape_cast %106 : vector<8xf32> to vector<8x1xf32>
    %108 = arith.addf %105, %107 : vector<8x1xf32>
    %109 = arith.truncf %94 : vector<8x8xf32> to vector<8x8xbf16>
    %110 = vector.extract_strided_slice %7 {offsets = [0, 0], sizes = [8, 16], strides = [1, 1]} : vector<8x32xbf16> to vector<8x16xbf16>
    %cst_44 = arith.constant dense<0.000000e+00> : vector<8x16xf32>
    %111 = tpu.matmul %109, %110, %cst_44 {dimension_numbers = #tpu.dot_dimension_numbers<[1], [0], [0], [1], [0, 0, 1, 1], [], []>} : vector<8x8xbf16>, vector<8x16xbf16>, vector<8x16xf32> -> vector<8x16xf32>
    %112 = arith.truncf %97 : vector<8x8xf32> to vector<8x8xbf16>
    %113 = vector.extract_strided_slice %9 {offsets = [0, 0], sizes = [8, 16], strides = [1, 1]} : vector<8x32xbf16> to vector<8x16xbf16>
    %cst_45 = arith.constant dense<0.000000e+00> : vector<8x16xf32>
    %114 = tpu.matmul %112, %113, %cst_45 {dimension_numbers = #tpu.dot_dimension_numbers<[1], [0], [0], [1], [0, 0, 1, 1], [], []>} : vector<8x8xbf16>, vector<8x16xbf16>, vector<8x16xf32> -> vector<8x16xf32>
    %115 = arith.addf %111, %114 : vector<8x16xf32>
    %116 = arith.truncf %100 : vector<8x4xf32> to vector<8x4xbf16>
    %117 = vector.extract_strided_slice %13 {offsets = [0, 0], sizes = [4, 16], strides = [1, 1]} : vector<4x32xbf16> to vector<4x16xbf16>
    %cst_46 = arith.constant dense<0.000000e+00> : vector<8x16xf32>
    %118 = tpu.matmul %116, %117, %cst_46 {dimension_numbers = #tpu.dot_dimension_numbers<[1], [0], [0], [1], [0, 0, 1, 1], [], []>} : vector<8x4xbf16>, vector<4x16xbf16>, vector<8x16xf32> -> vector<8x16xf32>
    %119 = arith.addf %115, %118 : vector<8x16xf32>
    %120 = tpu.reciprocal %108 {approx = true} : vector<8x1xf32> -> vector<8x1xf32>
    %121 = vector.broadcast %120 : vector<8x1xf32> to vector<8x16xf32>
    %122 = arith.mulf %119, %121 : vector<8x16xf32>
    %123 = arith.truncf %122 : vector<8x16xf32> to vector<8x16xbf16>
    %c0_47 = arith.constant 0 : index
    %c0_48 = arith.constant 0 : index
    %c0_49 = arith.constant 0 : index
    %124 = vector.load %arg12[%c0_47, %c0_48, %c0_49] : memref<1x8x32xbf16, #tpu.memory_space<vmem>>, vector<1x8x16xbf16>
    %125 = vector.shape_cast %124 : vector<1x8x16xbf16> to vector<8x16xbf16>
    %126 = vector.shape_cast %123 : vector<8x16xbf16> to vector<1x8x16xbf16>
    tpu.vector_store %arg12[%c0_47, %c0_48, %c0_49], %126 {strides = array<i32>} : memref<1x8x32xbf16, #tpu.memory_space<vmem>>, vector<1x8x16xbf16>,
    %127 = vector.extract_strided_slice %1 {offsets = [0, 16], sizes = [8, 16], strides = [1, 1]} : vector<8x32xbf16> to vector<8x16xbf16>
    %128 = arith.extf %127 : vector<8x16xbf16> to vector<8x16xf32>
    %129 = vector.extract_strided_slice %17 {offsets = [0, 16], sizes = [1, 16], strides = [1, 1]} : vector<1x32xf32> to vector<1x16xf32>
    %130 = vector.broadcast %129 : vector<1x16xf32> to vector<8x16xf32>
    %131 = arith.addf %128, %130 : vector<8x16xf32>
    %132 = arith.truncf %131 : vector<8x16xf32> to vector<8x16xbf16>
    %133 = vector.extract_strided_slice %16 {offsets = [16, 0], sizes = [16, 4], strides = [1, 1]} : vector<32x4xbf16> to vector<16x4xbf16>
    %cst_50 = arith.constant dense<0.000000e+00> : vector<8x4xf32>
    %134 = tpu.matmul %132, %133, %cst_50 {dimension_numbers = #tpu.dot_dimension_numbers<[1], [0], [0], [1], [0, 0, 1, 1], [], []>} : vector<8x16xbf16>, vector<16x4xbf16>, vector<8x4xf32> -> vector<8x4xf32>
    %cst_51 = arith.constant 0.000000e+00 : f32
    %135 = vector.broadcast %cst_51 : f32 to vector<8x16xf32>
    %136 = vector.extract_strided_slice %134 {offsets = [0, 0], sizes = [8, 1], strides = [1, 1]} : vector<8x4xf32> to vector<8x1xf32>
    %cst_52 = arith.constant 0.000000e+00 : f32
    %137 = vector.shape_cast %136 : vector<8x1xf32> to vector<8x1xf32>
    %138 = vector.broadcast %137 : vector<8x1xf32> to vector<8x16xf32>
    %139 = vector.broadcast %cst_52 : f32 to vector<8x16xf32>
    %140 = arith.select %29, %138, %139 : vector<8x16xi1>, vector<8x16xf32>
    %141 = arith.addf %135, %140 : vector<8x16xf32>
    %142 = vector.extract_strided_slice %134 {offsets = [0, 1], sizes = [8, 1], strides = [1, 1]} : vector<8x4xf32> to vector<8x1xf32>
    %cst_53 = arith.constant 0.000000e+00 : f32
    %143 = vector.shape_cast %142 : vector<8x1xf32> to vector<8x1xf32>
    %144 = vector.broadcast %143 : vector<8x1xf32> to vector<8x16xf32>
    %145 = vector.broadcast %cst_53 : f32 to vector<8x16xf32>
    %146 = arith.select %31, %144, %145 : vector<8x16xi1>, vector<8x16xf32>
    %147 = arith.addf %141, %146 : vector<8x16xf32>
    %148 = vector.extract_strided_slice %134 {offsets = [0, 2], sizes = [8, 1], strides = [1, 1]} : vector<8x4xf32> to vector<8x1xf32>
    %cst_54 = arith.constant 0.000000e+00 : f32
    %149 = vector.shape_cast %148 : vector<8x1xf32> to vector<8x1xf32>
    %150 = vector.broadcast %149 : vector<8x1xf32> to vector<8x16xf32>
    %151 = vector.broadcast %cst_54 : f32 to vector<8x16xf32>
    %152 = arith.select %33, %150, %151 : vector<8x16xi1>, vector<8x16xf32>
    %153 = arith.addf %147, %152 : vector<8x16xf32>
    %154 = vector.extract_strided_slice %134 {offsets = [0, 3], sizes = [8, 1], strides = [1, 1]} : vector<8x4xf32> to vector<8x1xf32>
    %cst_55 = arith.constant 0.000000e+00 : f32
    %155 = vector.shape_cast %154 : vector<8x1xf32> to vector<8x1xf32>
    %156 = vector.broadcast %155 : vector<8x1xf32> to vector<8x16xf32>
    %157 = vector.broadcast %cst_55 : f32 to vector<8x16xf32>
    %158 = arith.select %35, %156, %157 : vector<8x16xi1>, vector<8x16xf32>
    %159 = arith.addf %153, %158 : vector<8x16xf32>
    %cst_56 = arith.constant -1.000000e+30 : f32
    %160 = vector.broadcast %cst_56 : f32 to vector<8x16xf32>
    %161 = arith.select %27, %159, %160 : vector<8x16xi1>, vector<8x16xf32>
    %162 = vector.extract_strided_slice %3 {offsets = [0, 16], sizes = [8, 16], strides = [1, 1]} : vector<8x32xbf16> to vector<8x16xbf16>
    %cst_57 = arith.constant dense<0.000000e+00> : vector<8x8xf32>
    %163 = tpu.matmul %127, %162, %cst_57 {dimension_numbers = #tpu.dot_dimension_numbers<[1], [1], [0], [0], [0, 0, 1, 0], [], []>} : vector<8x16xbf16>, vector<8x16xbf16>, vector<8x8xf32> -> vector<8x8xf32>
    %164 = vector.extract_strided_slice %161 {offsets = [0, 0], sizes = [8, 8], strides = [1, 1]} : vector<8x16xf32> to vector<8x8xf32>
    %165 = arith.addf %163, %164 : vector<8x8xf32>
    %166 = vector.extract_strided_slice %5 {offsets = [0, 16], sizes = [8, 16], strides = [1, 1]} : vector<8x32xbf16> to vector<8x16xbf16>
    %cst_58 = arith.constant dense<0.000000e+00> : vector<8x8xf32>
    %167 = tpu.matmul %127, %166, %cst_58 {dimension_numbers = #tpu.dot_dimension_numbers<[1], [1], [0], [0], [0, 0, 1, 0], [], []>} : vector<8x16xbf16>, vector<8x16xbf16>, vector<8x8xf32> -> vector<8x8xf32>
    %168 = vector.extract_strided_slice %161 {offsets = [0, 8], sizes = [8, 8], strides = [1, 1]} : vector<8x16xf32> to vector<8x8xf32>
    %169 = arith.addf %167, %168 : vector<8x8xf32>
    %170 = vector.extract_strided_slice %11 {offsets = [0, 16], sizes = [4, 16], strides = [1, 1]} : vector<4x32xbf16> to vector<4x16xbf16>
    %cst_59 = arith.constant dense<0.000000e+00> : vector<8x4xf32>
    %171 = tpu.matmul %127, %170, %cst_59 {dimension_numbers = #tpu.dot_dimension_numbers<[1], [1], [0], [0], [0, 0, 1, 0], [], []>} : vector<8x16xbf16>, vector<4x16xbf16>, vector<8x4xf32> -> vector<8x4xf32>
    %172 = vector.extract_strided_slice %15 {offsets = [0, 4], sizes = [8, 4], strides = [1, 1]} : vector<8x8xbf16> to vector<8x4xbf16>
    %173 = arith.extf %172 : vector<8x4xbf16> to vector<8x4xf32>
    %174 = arith.addf %171, %173 : vector<8x4xf32>
    %cst_60 = arith.constant dense<0xFF800000> : vector<8xf32>
    %175 = vector.multi_reduction <maximumf>, %165, %cst_60 [1] : vector<8x8xf32> to vector<8xf32>
    %176 = vector.shape_cast %175 : vector<8xf32> to vector<8x1xf32>
    %cst_61 = arith.constant dense<0xFF800000> : vector<8xf32>
    %177 = vector.multi_reduction <maximumf>, %169, %cst_61 [1] : vector<8x8xf32> to vector<8xf32>
    %178 = vector.shape_cast %177 : vector<8xf32> to vector<8x1xf32>
    %179 = arith.maximumf %176, %178 : vector<8x1xf32>
    %cst_62 = arith.constant dense<0xFF800000> : vector<8xf32>
    %180 = vector.multi_reduction <maximumf>, %174, %cst_62 [1] : vector<8x4xf32> to vector<8xf32>
    %181 = vector.shape_cast %180 : vector<8xf32> to vector<8x1xf32>
    %182 = arith.maximumf %179, %181 : vector<8x1xf32>
    %183 = vector.broadcast %182 : vector<8x1xf32> to vector<8x8xf32>
    %184 = arith.subf %165, %183 : vector<8x8xf32>
    %185 = math.exp %184 : vector<8x8xf32>
    %186 = vector.broadcast %182 : vector<8x1xf32> to vector<8x8xf32>
    %187 = arith.subf %169, %186 : vector<8x8xf32>
    %188 = math.exp %187 : vector<8x8xf32>
    %189 = vector.broadcast %182 : vector<8x1xf32> to vector<8x4xf32>
    %190 = arith.subf %174, %189 : vector<8x4xf32>
    %191 = math.exp %190 : vector<8x4xf32>
    %cst_63 = arith.constant dense<0.000000e+00> : vector<8xf32>
    %192 = vector.multi_reduction <add>, %185, %cst_63 [1] : vector<8x8xf32> to vector<8xf32>
    %193 = vector.shape_cast %192 : vector<8xf32> to vector<8x1xf32>
    %cst_64 = arith.constant dense<0.000000e+00> : vector<8xf32>
    %194 = vector.multi_reduction <add>, %188, %cst_64 [1] : vector<8x8xf32> to vector<8xf32>
    %195 = vector.shape_cast %194 : vector<8xf32> to vector<8x1xf32>
    %196 = arith.addf %193, %195 : vector<8x1xf32>
    %cst_65 = arith.constant dense<0.000000e+00> : vector<8xf32>
    %197 = vector.multi_reduction <add>, %191, %cst_65 [1] : vector<8x4xf32> to vector<8xf32>
    %198 = vector.shape_cast %197 : vector<8xf32> to vector<8x1xf32>
    %199 = arith.addf %196, %198 : vector<8x1xf32>
    %200 = arith.truncf %185 : vector<8x8xf32> to vector<8x8xbf16>
    %201 = vector.extract_strided_slice %7 {offsets = [0, 16], sizes = [8, 16], strides = [1, 1]} : vector<8x32xbf16> to vector<8x16xbf16>
    %cst_66 = arith.constant dense<0.000000e+00> : vector<8x16xf32>
    %202 = tpu.matmul %200, %201, %cst_66 {dimension_numbers = #tpu.dot_dimension_numbers<[1], [0], [0], [1], [0, 0, 1, 1], [], []>} : vector<8x8xbf16>, vector<8x16xbf16>, vector<8x16xf32> -> vector<8x16xf32>
    %203 = arith.truncf %188 : vector<8x8xf32> to vector<8x8xbf16>
    %204 = vector.extract_strided_slice %9 {offsets = [0, 16], sizes = [8, 16], strides = [1, 1]} : vector<8x32xbf16> to vector<8x16xbf16>
    %cst_67 = arith.constant dense<0.000000e+00> : vector<8x16xf32>
    %205 = tpu.matmul %203, %204, %cst_67 {dimension_numbers = #tpu.dot_dimension_numbers<[1], [0], [0], [1], [0, 0, 1, 1], [], []>} : vector<8x8xbf16>, vector<8x16xbf16>, vector<8x16xf32> -> vector<8x16xf32>
    %206 = arith.addf %202, %205 : vector<8x16xf32>
    %207 = arith.truncf %191 : vector<8x4xf32> to vector<8x4xbf16>
    %208 = vector.extract_strided_slice %13 {offsets = [0, 16], sizes = [4, 16], strides = [1, 1]} : vector<4x32xbf16> to vector<4x16xbf16>
    %cst_68 = arith.constant dense<0.000000e+00> : vector<8x16xf32>
    %209 = tpu.matmul %207, %208, %cst_68 {dimension_numbers = #tpu.dot_dimension_numbers<[1], [0], [0], [1], [0, 0, 1, 1], [], []>} : vector<8x4xbf16>, vector<4x16xbf16>, vector<8x16xf32> -> vector<8x16xf32>
    %210 = arith.addf %206, %209 : vector<8x16xf32>
    %211 = tpu.reciprocal %199 {approx = true} : vector<8x1xf32> -> vector<8x1xf32>
    %212 = vector.broadcast %211 : vector<8x1xf32> to vector<8x16xf32>
    %213 = arith.mulf %210, %212 : vector<8x16xf32>
    %214 = arith.truncf %213 : vector<8x16xf32> to vector<8x16xbf16>
    %c0_69 = arith.constant 0 : index
    %c0_70 = arith.constant 0 : index
    %c16 = arith.constant 16 : index
    %215 = vector.load %arg12[%c0_69, %c0_70, %c16] : memref<1x8x32xbf16, #tpu.memory_space<vmem>>, vector<1x8x16xbf16>
    %216 = vector.shape_cast %215 : vector<1x8x16xbf16> to vector<8x16xbf16>
    %217 = vector.shape_cast %214 : vector<8x16xbf16> to vector<1x8x16xbf16>
    tpu.vector_store %arg12[%c0_69, %c0_70, %c16], %217 {strides = array<i32>} : memref<1x8x32xbf16, #tpu.memory_space<vmem>>, vector<1x8x16xbf16>,
    return
  }
  func.func @transform_0(%arg0: i32, %arg1: i32) -> (i32, i32, i32) {
    %c0_i32 = arith.constant 0 : i32
    %c0_i32_0 = arith.constant 0 : i32
    return %arg0, %arg1, %c0_i32 : i32, i32, i32
  }
  func.func @transform_1(%arg0: i32, %arg1: i32) -> (i32, i32, i32) {
    %c0_i32 = arith.constant 0 : i32
    %c0_i32_0 = arith.constant 0 : i32
    return %arg0, %arg1, %c0_i32 : i32, i32, i32
  }
  func.func @transform_2(%arg0: i32, %arg1: i32) -> (i32, i32, i32) {
    %c1_i32 = arith.constant 1 : i32
    %0 = arith.addi %arg1, %c1_i32 : i32
    %c0_i32 = arith.constant 0 : i32
    %c0_i32_0 = arith.constant 0 : i32
    return %arg0, %0, %c0_i32 : i32, i32, i32
  }
  func.func @transform_3(%arg0: i32, %arg1: i32) -> (i32, i32, i32) {
    %c0_i32 = arith.constant 0 : i32
    %c0_i32_0 = arith.constant 0 : i32
    return %arg0, %arg1, %c0_i32 : i32, i32, i32
  }
  func.func @transform_4(%arg0: i32, %arg1: i32) -> (i32, i32, i32) {
    %c1_i32 = arith.constant 1 : i32
    %0 = arith.addi %arg1, %c1_i32 : i32
    %c0_i32 = arith.constant 0 : i32
    %c0_i32_0 = arith.constant 0 : i32
    return %arg0, %0, %c0_i32 : i32, i32, i32
  }
  func.func @transform_5(%arg0: i32, %arg1: i32) -> (i32, i32, i32) {
    %c0_i32 = arith.constant 0 : i32
    %c0_i32_0 = arith.constant 0 : i32
    %c0_i32_1 = arith.constant 0 : i32
    return %arg0, %c0_i32, %c0_i32_0 : i32, i32, i32
  }
  func.func @transform_6(%arg0: i32, %arg1: i32) -> (i32, i32, i32) {
    %c0_i32 = arith.constant 0 : i32
    %c0_i32_0 = arith.constant 0 : i32
    %c0_i32_1 = arith.constant 0 : i32
    return %arg0, %c0_i32, %c0_i32_0 : i32, i32, i32
  }
  func.func @transform_7(%arg0: i32, %arg1: i32) -> (i32, i32, i32) {
    %c0_i32 = arith.constant 0 : i32
    %c0_i32_0 = arith.constant 0 : i32
    return %arg0, %arg1, %c0_i32 : i32, i32, i32
  }
  func.func @transform_8(%arg0: i32, %arg1: i32) -> (i32, i32) {
    %c0_i32 = arith.constant 0 : i32
    %c0_i32_0 = arith.constant 0 : i32
    %c0_i32_1 = arith.constant 0 : i32
    return %c0_i32, %c0_i32_0 : i32, i32
  }
  func.func @transform_9(%arg0: i32, %arg1: i32) -> (i32, i32) {
    %c0_i32 = arith.constant 0 : i32
    %c0_i32_0 = arith.constant 0 : i32
    %c0_i32_1 = arith.constant 0 : i32
    return %c0_i32, %c0_i32_0 : i32, i32
  }
  func.func @transform_10(%arg0: i32, %arg1: i32) -> (i32, i32, i32) {
    %c0_i32 = arith.constant 0 : i32
    %c0_i32_0 = arith.constant 0 : i32
    return %arg0, %arg1, %c0_i32 : i32, i32, i32
  }
}

module attributes {stable_mosaic.version = 11 : i64} {
  func.func @kernel(%arg0: i32, %arg1: i32, %arg2: i32, %arg3: memref<16x32xf32, #tpu.memory_space<vmem>>, %arg4: memref<32x64xbf16, #tpu.memory_space<vmem>>, %arg5: memref<1x64xf32, #tpu.memory_space<vmem>>, %arg6: memref<16x64xbf16, #tpu.memory_space<vmem>>, %arg7: memref<16x64xf32, #tpu.memory_space<vmem>>) attributes {dimension_semantics = [#tpu.dimension_semantics<parallel>, #tpu.dimension_semantics<parallel>, #tpu.dimension_semantics<arbitrary>], iteration_bounds = array<i64: 1, 1, 1>, scalar_prefetch = 0 : i64, scratch_operands = 1 : i64, tpu.core_type = #tpu.core_type<tc>, window_params = [{transform_indices = @transform_0, window_bounds = array<i64: 16, 32>}, {transform_indices = @transform_1, window_bounds = array<i64: 32, 64>}, {transform_indices = @transform_2, window_bounds = array<i64: 1, 64>}, {transform_indices = @transform_3, window_bounds = array<i64: 16, 64>}]} {
    %c0_i32 = arith.constant 0 : i32
    %0 = arith.cmpi eq, %arg2, %c0_i32 : i32
    %1 = arith.extui %0 : i1 to i32
    %c0_i32_0 = arith.constant 0 : i32
    %2 = arith.cmpi ne, %1, %c0_i32_0 : i32
    scf.if %2 {
      %cst_10 = arith.constant 0.000000e+00 : f32
      %13 = vector.broadcast %cst_10 : f32 to vector<16x64xf32>
      %c0_11 = arith.constant 0 : index
      %c0_12 = arith.constant 0 : index
      %14 = vector.load %arg7[%c0_11, %c0_12] : memref<16x64xf32, #tpu.memory_space<vmem>>, vector<16x64xf32>
      tpu.vector_store %arg7[%c0_11, %c0_12], %13 {strides = array<i32>} : memref<16x64xf32, #tpu.memory_space<vmem>>, vector<16x64xf32>,
    } else {
    }
    %c0 = arith.constant 0 : index
    %c0_1 = arith.constant 0 : index
    %3 = vector.load %arg7[%c0, %c0_1] : memref<16x64xf32, #tpu.memory_space<vmem>>, vector<16x64xf32>
    %c0_2 = arith.constant 0 : index
    %c0_3 = arith.constant 0 : index
    %4 = vector.load %arg3[%c0_2, %c0_3] : memref<16x32xf32, #tpu.memory_space<vmem>>, vector<16x32xf32>
    %5 = arith.truncf %4 : vector<16x32xf32> to vector<16x32xbf16>
    %c0_4 = arith.constant 0 : index
    %c0_5 = arith.constant 0 : index
    %6 = vector.load %arg4[%c0_4, %c0_5] : memref<32x64xbf16, #tpu.memory_space<vmem>>, vector<32x64xbf16>
    %cst = arith.constant dense<0.000000e+00> : vector<16x64xf32>
    %7 = tpu.matmul %5, %6, %cst {dimension_numbers = #tpu.dot_dimension_numbers<[1], [0], [0], [1], [0, 0, 1, 1], [], []>} : vector<16x32xbf16>, vector<32x64xbf16>, vector<16x64xf32> -> vector<16x64xf32>
    %8 = arith.addf %3, %7 : vector<16x64xf32>
    %c0_6 = arith.constant 0 : index
    %c0_7 = arith.constant 0 : index
    %9 = vector.load %arg7[%c0_6, %c0_7] : memref<16x64xf32, #tpu.memory_space<vmem>>, vector<16x64xf32>
    tpu.vector_store %arg7[%c0_6, %c0_7], %8 {strides = array<i32>} : memref<16x64xf32, #tpu.memory_space<vmem>>, vector<16x64xf32>,
    %c0_i32_8 = arith.constant 0 : i32
    %10 = arith.cmpi eq, %arg2, %c0_i32_8 : i32
    %11 = arith.extui %10 : i1 to i32
    %c0_i32_9 = arith.constant 0 : i32
    %12 = arith.cmpi ne, %11, %c0_i32_9 : i32
    scf.if %12 {
      %c0_10 = arith.constant 0 : index
      %c0_11 = arith.constant 0 : index
      %13 = vector.load %arg7[%c0_10, %c0_11] : memref<16x64xf32, #tpu.memory_space<vmem>>, vector<16x64xf32>
      %c0_12 = arith.constant 0 : index
      %c0_13 = arith.constant 0 : index
      %14 = vector.load %arg5[%c0_12, %c0_13] : memref<1x64xf32, #tpu.memory_space<vmem>>, vector<1x64xf32>
      %15 = vector.broadcast %14 : vector<1x64xf32> to vector<16x64xf32>
      %16 = arith.addf %13, %15 : vector<16x64xf32>
      %cst_14 = arith.constant 5.000000e-01 : f32
      %17 = vector.broadcast %cst_14 : f32 to vector<16x64xf32>
      %18 = arith.mulf %17, %16 : vector<16x64xf32>
      %cst_15 = arith.constant 4.471500e-02 : f32
      %19 = vector.broadcast %cst_15 : f32 to vector<16x64xf32>
      %20 = arith.mulf %19, %16 : vector<16x64xf32>
      %21 = arith.mulf %20, %16 : vector<16x64xf32>
      %22 = arith.mulf %21, %16 : vector<16x64xf32>
      %23 = arith.addf %16, %22 : vector<16x64xf32>
      %cst_16 = arith.constant 0.797884583 : f32
      %24 = vector.broadcast %cst_16 : f32 to vector<16x64xf32>
      %25 = arith.mulf %24, %23 : vector<16x64xf32>
      %26 = math.tanh %25 : vector<16x64xf32>
      %cst_17 = arith.constant 1.000000e+00 : f32
      %27 = vector.broadcast %cst_17 : f32 to vector<16x64xf32>
      %28 = arith.addf %27, %26 : vector<16x64xf32>
      %29 = arith.mulf %18, %28 : vector<16x64xf32>
      %30 = arith.truncf %29 : vector<16x64xf32> to vector<16x64xbf16>
      %c0_18 = arith.constant 0 : index
      %c0_19 = arith.constant 0 : index
      %31 = vector.load %arg6[%c0_18, %c0_19] : memref<16x64xbf16, #tpu.memory_space<vmem>>, vector<16x64xbf16>
      tpu.vector_store %arg6[%c0_18, %c0_19], %30 {strides = array<i32>} : memref<16x64xbf16, #tpu.memory_space<vmem>>, vector<16x64xbf16>,
    } else {
    }
    return
  }
  func.func @transform_0(%arg0: i32, %arg1: i32, %arg2: i32) -> (i32, i32) {
    %c0_i32 = arith.constant 0 : i32
    return %arg0, %arg2 : i32, i32
  }
  func.func @transform_1(%arg0: i32, %arg1: i32, %arg2: i32) -> (i32, i32) {
    %c0_i32 = arith.constant 0 : i32
    return %arg2, %arg1 : i32, i32
  }
  func.func @transform_2(%arg0: i32, %arg1: i32, %arg2: i32) -> (i32, i32) {
    %c0_i32 = arith.constant 0 : i32
    %c0_i32_0 = arith.constant 0 : i32
    return %c0_i32, %arg1 : i32, i32
  }
  func.func @transform_3(%arg0: i32, %arg1: i32, %arg2: i32) -> (i32, i32) {
    %c0_i32 = arith.constant 0 : i32
    return %arg0, %arg1 : i32, i32
  }
}

module attributes {stable_mosaic.version = 11 : i64} {
  func.func @kernel(%arg0: i32, %arg1: i32, %arg2: i32, %arg3: memref<16x64xbf16, #tpu.memory_space<vmem>>, %arg4: memref<64x32xbf16, #tpu.memory_space<vmem>>, %arg5: memref<1x32xf32, #tpu.memory_space<vmem>>, %arg6: memref<16x32xf32, #tpu.memory_space<vmem>>, %arg7: memref<1x32xf32, #tpu.memory_space<vmem>>, %arg8: memref<1x32xf32, #tpu.memory_space<vmem>>, %arg9: memref<16x32xf32, #tpu.memory_space<vmem>>, %arg10: memref<16x32xf32, #tpu.memory_space<vmem>>) attributes {dimension_semantics = [#tpu.dimension_semantics<parallel>, #tpu.dimension_semantics<parallel>, #tpu.dimension_semantics<arbitrary>], iteration_bounds = array<i64: 1, 1, 1>, scalar_prefetch = 0 : i64, scratch_operands = 1 : i64, tpu.core_type = #tpu.core_type<tc>, window_params = [{transform_indices = @transform_0, window_bounds = array<i64: 16, 64>}, {transform_indices = @transform_1, window_bounds = array<i64: 64, 32>}, {transform_indices = @transform_2, window_bounds = array<i64: 1, 32>}, {transform_indices = @transform_3, window_bounds = array<i64: 16, 32>}, {pipeline_mode = #tpu.pipeline_mode<synchronous>, transform_indices = @transform_4, window_bounds = array<i64: 1, 32>}, {pipeline_mode = #tpu.pipeline_mode<synchronous>, transform_indices = @transform_5, window_bounds = array<i64: 1, 32>}, {transform_indices = @transform_6, window_bounds = array<i64: 16, 32>}]} {
    %c0_i32 = arith.constant 0 : i32
    %0 = arith.cmpi eq, %arg2, %c0_i32 : i32
    %1 = arith.extui %0 : i1 to i32
    %c0_i32_0 = arith.constant 0 : i32
    %2 = arith.cmpi ne, %1, %c0_i32_0 : i32
    scf.if %2 {
      %cst_10 = arith.constant 0.000000e+00 : f32
      %12 = vector.broadcast %cst_10 : f32 to vector<16x32xf32>
      %c0_11 = arith.constant 0 : index
      %c0_12 = arith.constant 0 : index
      %13 = vector.load %arg10[%c0_11, %c0_12] : memref<16x32xf32, #tpu.memory_space<vmem>>, vector<16x32xf32>
      tpu.vector_store %arg10[%c0_11, %c0_12], %12 {strides = array<i32>} : memref<16x32xf32, #tpu.memory_space<vmem>>, vector<16x32xf32>,
    } else {
    }
    %c0 = arith.constant 0 : index
    %c0_1 = arith.constant 0 : index
    %3 = vector.load %arg10[%c0, %c0_1] : memref<16x32xf32, #tpu.memory_space<vmem>>, vector<16x32xf32>
    %c0_2 = arith.constant 0 : index
    %c0_3 = arith.constant 0 : index
    %4 = vector.load %arg3[%c0_2, %c0_3] : memref<16x64xbf16, #tpu.memory_space<vmem>>, vector<16x64xbf16>
    %c0_4 = arith.constant 0 : index
    %c0_5 = arith.constant 0 : index
    %5 = vector.load %arg4[%c0_4, %c0_5] : memref<64x32xbf16, #tpu.memory_space<vmem>>, vector<64x32xbf16>
    %cst = arith.constant dense<0.000000e+00> : vector<16x32xf32>
    %6 = tpu.matmul %4, %5, %cst {dimension_numbers = #tpu.dot_dimension_numbers<[1], [0], [0], [1], [0, 0, 1, 1], [], []>} : vector<16x64xbf16>, vector<64x32xbf16>, vector<16x32xf32> -> vector<16x32xf32>
    %7 = arith.addf %3, %6 : vector<16x32xf32>
    %c0_6 = arith.constant 0 : index
    %c0_7 = arith.constant 0 : index
    %8 = vector.load %arg10[%c0_6, %c0_7] : memref<16x32xf32, #tpu.memory_space<vmem>>, vector<16x32xf32>
    tpu.vector_store %arg10[%c0_6, %c0_7], %7 {strides = array<i32>} : memref<16x32xf32, #tpu.memory_space<vmem>>, vector<16x32xf32>,
    %c0_i32_8 = arith.constant 0 : i32
    %9 = arith.cmpi eq, %arg2, %c0_i32_8 : i32
    %10 = arith.extui %9 : i1 to i32
    %c0_i32_9 = arith.constant 0 : i32
    %11 = arith.cmpi ne, %10, %c0_i32_9 : i32
    scf.if %11 {
      %c0_10 = arith.constant 0 : index
      %c0_11 = arith.constant 0 : index
      %12 = vector.load %arg10[%c0_10, %c0_11] : memref<16x32xf32, #tpu.memory_space<vmem>>, vector<16x32xf32>
      %c0_12 = arith.constant 0 : index
      %c0_13 = arith.constant 0 : index
      %13 = vector.load %arg5[%c0_12, %c0_13] : memref<1x32xf32, #tpu.memory_space<vmem>>, vector<1x32xf32>
      %14 = vector.broadcast %13 : vector<1x32xf32> to vector<16x32xf32>
      %15 = arith.addf %12, %14 : vector<16x32xf32>
      %c0_14 = arith.constant 0 : index
      %c0_15 = arith.constant 0 : index
      %16 = vector.load %arg6[%c0_14, %c0_15] : memref<16x32xf32, #tpu.memory_space<vmem>>, vector<16x32xf32>
      %17 = arith.addf %15, %16 : vector<16x32xf32>
      %cst_16 = arith.constant dense<0.000000e+00> : vector<16xf32>
      %18 = vector.multi_reduction <add>, %17, %cst_16 [1] : vector<16x32xf32> to vector<16xf32>
      %19 = vector.shape_cast %18 : vector<16xf32> to vector<16x1xf32>
      %cst_17 = arith.constant 3.200000e+01 : f32
      %20 = vector.broadcast %cst_17 : f32 to vector<16x1xf32>
      %21 = arith.divf %19, %20 : vector<16x1xf32>
      %22 = vector.broadcast %21 : vector<16x1xf32> to vector<16x32xf32>
      %23 = arith.subf %17, %22 : vector<16x32xf32>
      %24 = arith.mulf %23, %23 : vector<16x32xf32>
      %cst_18 = arith.constant dense<0.000000e+00> : vector<16xf32>
      %25 = vector.multi_reduction <add>, %24, %cst_18 [1] : vector<16x32xf32> to vector<16xf32>
      %26 = vector.shape_cast %25 : vector<16xf32> to vector<16x1xf32>
      %cst_19 = arith.constant 3.200000e+01 : f32
      %27 = vector.broadcast %cst_19 : f32 to vector<16x1xf32>
      %28 = arith.divf %26, %27 : vector<16x1xf32>
      %29 = vector.broadcast %21 : vector<16x1xf32> to vector<16x32xf32>
      %30 = arith.subf %17, %29 : vector<16x32xf32>
      %cst_20 = arith.constant 9.99999974E-6 : f32
      %31 = vector.broadcast %cst_20 : f32 to vector<16x1xf32>
      %32 = arith.addf %28, %31 : vector<16x1xf32>
      %33 = math.rsqrt %32 : vector<16x1xf32>
      %34 = vector.broadcast %33 : vector<16x1xf32> to vector<16x32xf32>
      %35 = arith.mulf %30, %34 : vector<16x32xf32>
      %c0_21 = arith.constant 0 : index
      %c0_22 = arith.constant 0 : index
      %36 = vector.load %arg7[%c0_21, %c0_22] : memref<1x32xf32, #tpu.memory_space<vmem>>, vector<1x32xf32>
      %37 = vector.broadcast %36 : vector<1x32xf32> to vector<16x32xf32>
      %38 = arith.mulf %35, %37 : vector<16x32xf32>
      %c0_23 = arith.constant 0 : index
      %c0_24 = arith.constant 0 : index
      %39 = vector.load %arg8[%c0_23, %c0_24] : memref<1x32xf32, #tpu.memory_space<vmem>>, vector<1x32xf32>
      %40 = vector.broadcast %39 : vector<1x32xf32> to vector<16x32xf32>
      %41 = arith.addf %38, %40 : vector<16x32xf32>
      %c0_25 = arith.constant 0 : index
      %c0_26 = arith.constant 0 : index
      %42 = vector.load %arg9[%c0_25, %c0_26] : memref<16x32xf32, #tpu.memory_space<vmem>>, vector<16x32xf32>
      tpu.vector_store %arg9[%c0_25, %c0_26], %41 {strides = array<i32>} : memref<16x32xf32, #tpu.memory_space<vmem>>, vector<16x32xf32>,
    } else {
    }
    return
  }
  func.func @transform_0(%arg0: i32, %arg1: i32, %arg2: i32) -> (i32, i32) {
    %c0_i32 = arith.constant 0 : i32
    return %arg0, %arg2 : i32, i32
  }
  func.func @transform_1(%arg0: i32, %arg1: i32, %arg2: i32) -> (i32, i32) {
    %c0_i32 = arith.constant 0 : i32
    return %arg2, %arg1 : i32, i32
  }
  func.func @transform_2(%arg0: i32, %arg1: i32, %arg2: i32) -> (i32, i32) {
    %c0_i32 = arith.constant 0 : i32
    %c0_i32_0 = arith.constant 0 : i32
    return %c0_i32, %arg1 : i32, i32
  }
  func.func @transform_3(%arg0: i32, %arg1: i32, %arg2: i32) -> (i32, i32) {
    %c0_i32 = arith.constant 0 : i32
    return %arg0, %arg1 : i32, i32
  }
  func.func @transform_4(%arg0: i32, %arg1: i32, %arg2: i32) -> (i32, i32) {
    %c0_i32 = arith.constant 0 : i32
    %c0_i32_0 = arith.constant 0 : i32
    %c0_i32_1 = arith.constant 0 : i32
    return %c0_i32, %c0_i32_0 : i32, i32
  }
  func.func @transform_5(%arg0: i32, %arg1: i32, %arg2: i32) -> (i32, i32) {
    %c0_i32 = arith.constant 0 : i32
    %c0_i32_0 = arith.constant 0 : i32
    %c0_i32_1 = arith.constant 0 : i32
    return %c0_i32, %c0_i32_0 : i32, i32
  }
  func.func @transform_6(%arg0: i32, %arg1: i32, %arg2: i32) -> (i32, i32) {
    %c0_i32 = arith.constant 0 : i32
    return %arg0, %arg1 : i32, i32
  }
}

module attributes {stable_mosaic.version = 11 : i64} {
  func.func @kernel(%arg0: i32, %arg1: i32, %arg2: i32, %arg3: memref<16x32xf32, #tpu.memory_space<vmem>>, %arg4: memref<32x64xbf16, #tpu.memory_space<vmem>>, %arg5: memref<1x64xf32, #tpu.memory_space<vmem>>, %arg6: memref<16x64xf32, #tpu.memory_space<vmem>>, %arg7: memref<16x64xf32, #tpu.memory_space<vmem>>) attributes {dimension_semantics = [#tpu.dimension_semantics<parallel>, #tpu.dimension_semantics<parallel>, #tpu.dimension_semantics<arbitrary>], iteration_bounds = array<i64: 1, 1, 1>, scalar_prefetch = 0 : i64, scratch_operands = 1 : i64, tpu.core_type = #tpu.core_type<tc>, window_params = [{transform_indices = @transform_0, window_bounds = array<i64: 16, 32>}, {transform_indices = @transform_1, window_bounds = array<i64: 32, 64>}, {transform_indices = @transform_2, window_bounds = array<i64: 1, 64>}, {transform_indices = @transform_3, window_bounds = array<i64: 16, 64>}]} {
    %c0_i32 = arith.constant 0 : i32
    %0 = arith.cmpi eq, %arg2, %c0_i32 : i32
    %1 = arith.extui %0 : i1 to i32
    %c0_i32_0 = arith.constant 0 : i32
    %2 = arith.cmpi ne, %1, %c0_i32_0 : i32
    scf.if %2 {
      %cst_10 = arith.constant 0.000000e+00 : f32
      %13 = vector.broadcast %cst_10 : f32 to vector<16x64xf32>
      %c0_11 = arith.constant 0 : index
      %c0_12 = arith.constant 0 : index
      %14 = vector.load %arg7[%c0_11, %c0_12] : memref<16x64xf32, #tpu.memory_space<vmem>>, vector<16x64xf32>
      tpu.vector_store %arg7[%c0_11, %c0_12], %13 {strides = array<i32>} : memref<16x64xf32, #tpu.memory_space<vmem>>, vector<16x64xf32>,
    } else {
    }
    %c0 = arith.constant 0 : index
    %c0_1 = arith.constant 0 : index
    %3 = vector.load %arg7[%c0, %c0_1] : memref<16x64xf32, #tpu.memory_space<vmem>>, vector<16x64xf32>
    %c0_2 = arith.constant 0 : index
    %c0_3 = arith.constant 0 : index
    %4 = vector.load %arg3[%c0_2, %c0_3] : memref<16x32xf32, #tpu.memory_space<vmem>>, vector<16x32xf32>
    %5 = arith.truncf %4 : vector<16x32xf32> to vector<16x32xbf16>
    %c0_4 = arith.constant 0 : index
    %c0_5 = arith.constant 0 : index
    %6 = vector.load %arg4[%c0_4, %c0_5] : memref<32x64xbf16, #tpu.memory_space<vmem>>, vector<32x64xbf16>
    %cst = arith.constant dense<0.000000e+00> : vector<16x64xf32>
    %7 = tpu.matmul %5, %6, %cst {dimension_numbers = #tpu.dot_dimension_numbers<[1], [0], [0], [1], [0, 0, 1, 1], [], []>} : vector<16x32xbf16>, vector<32x64xbf16>, vector<16x64xf32> -> vector<16x64xf32>
    %8 = arith.addf %3, %7 : vector<16x64xf32>
    %c0_6 = arith.constant 0 : index
    %c0_7 = arith.constant 0 : index
    %9 = vector.load %arg7[%c0_6, %c0_7] : memref<16x64xf32, #tpu.memory_space<vmem>>, vector<16x64xf32>
    tpu.vector_store %arg7[%c0_6, %c0_7], %8 {strides = array<i32>} : memref<16x64xf32, #tpu.memory_space<vmem>>, vector<16x64xf32>,
    %c0_i32_8 = arith.constant 0 : i32
    %10 = arith.cmpi eq, %arg2, %c0_i32_8 : i32
    %11 = arith.extui %10 : i1 to i32
    %c0_i32_9 = arith.constant 0 : i32
    %12 = arith.cmpi ne, %11, %c0_i32_9 : i32
    scf.if %12 {
      %c0_10 = arith.constant 0 : index
      %c0_11 = arith.constant 0 : index
      %13 = vector.load %arg7[%c0_10, %c0_11] : memref<16x64xf32, #tpu.memory_space<vmem>>, vector<16x64xf32>
      %c0_12 = arith.constant 0 : index
      %c0_13 = arith.constant 0 : index
      %14 = vector.load %arg5[%c0_12, %c0_13] : memref<1x64xf32, #tpu.memory_space<vmem>>, vector<1x64xf32>
      %15 = vector.broadcast %14 : vector<1x64xf32> to vector<16x64xf32>
      %16 = arith.addf %13, %15 : vector<16x64xf32>
      %cst_14 = arith.constant dense<0xFF800000> : vector<16xf32>
      %17 = vector.multi_reduction <maximumf>, %16, %cst_14 [1] : vector<16x64xf32> to vector<16xf32>
      %18 = vector.shape_cast %17 : vector<16xf32> to vector<16x1xf32>
      %19 = vector.broadcast %18 : vector<16x1xf32> to vector<16x64xf32>
      %20 = arith.subf %16, %19 : vector<16x64xf32>
      %21 = math.exp %20 : vector<16x64xf32>
      %cst_15 = arith.constant dense<0.000000e+00> : vector<16xf32>
      %22 = vector.multi_reduction <add>, %21, %cst_15 [1] : vector<16x64xf32> to vector<16xf32>
      %23 = vector.shape_cast %22 : vector<16xf32> to vector<16x1xf32>
      %24 = math.log %23 : vector<16x1xf32>
      %25 = vector.broadcast %24 : vector<16x1xf32> to vector<16x64xf32>
      %26 = arith.subf %20, %25 : vector<16x64xf32>
      %c0_16 = arith.constant 0 : index
      %c0_17 = arith.constant 0 : index
      %27 = vector.load %arg6[%c0_16, %c0_17] : memref<16x64xf32, #tpu.memory_space<vmem>>, vector<16x64xf32>
      tpu.vector_store %arg6[%c0_16, %c0_17], %26 {strides = array<i32>} : memref<16x64xf32, #tpu.memory_space<vmem>>, vector<16x64xf32>,
    } else {
    }
    return
  }
  func.func @transform_0(%arg0: i32, %arg1: i32, %arg2: i32) -> (i32, i32) {
    %c0_i32 = arith.constant 0 : i32
    return %arg0, %arg2 : i32, i32
  }
  func.func @transform_1(%arg0: i32, %arg1: i32, %arg2: i32) -> (i32, i32) {
    %c0_i32 = arith.constant 0 : i32
    return %arg2, %arg1 : i32, i32
  }
  func.func @transform_2(%arg0: i32, %arg1: i32, %arg2: i32) -> (i32, i32) {
    %c0_i32 = arith.constant 0 : i32
    %c0_i32_0 = arith.constant 0 : i32
    return %c0_i32, %arg1 : i32, i32
  }
  func.func @transform_3(%arg0: i32, %arg1: i32, %arg2: i32) -> (i32, i32) {
    %c0_i32 = arith.constant 0 : i32
    return %arg0, %arg1 : i32, i32
  }
}

</mosaic_0001>

<bundles_post_ra>
// kernel: model_forward.31
= control target key start
LH: loop header
LB: loop body
LE: loop exit
PB: predicated region body
PF: predicated region fallthrough
CT: control target
= control target key end

     0   :  { %vm19_vm0 = vcmask 801792   ;;  %v145_v0 = vmov 0.0   ;;  %vm146_vm1 = vmmov 0   ;;  %vm43_vm2 = vcmask 261120   ;;  %s192_s1 = inlined_call_operand.vmem [shape: bf16[32,98], index: 1, kind: input, shape index: {}]   ;;  %s193_s0 = inlined_call_operand.vmem [shape: f32[16,32], index: 0, kind: input, shape index: {}]   ;;  %s194_s2 = inlined_call_operand.vmem [shape: f32[1,98], index: 2, kind: input, shape index: {}]   ;;  %s195_s3 = inlined_call_operand.vmem [shape: bf16[16,98], index: 3, kind: output, shape index: {}]  }
   0x1   :  { %133 = vmatprep.subr.bf16.mxu0 %v145_v0  ;;  %v143_v1 = vld [vmem:[%s192_s1] sm:$0xff]   ;;  %137 = vmatprep.mubr.msk.bf16.mxu0 %vm146_vm1, %v145_v0  ;;  %20 = vst.msk [vmem:[#allocation2] sm:$0xff] %vm19_vm0, %v145_v0  ;;  %21 = vst.msk [vmem:[#allocation2 + $0x8] sm:$0xff] %vm19_vm0, %v145_v0  ;;  %v144_v2 = vld [vmem:[%s192_s1 + $0x8] sm:$0xff]   ;;  %vm115_vm3 = vcmask 797696  }
   0x2   :  { %134 = vmatpush3.bf16.msra.mxu0 %v143_v1  ;;  %v24_v3 = vld [vmem:[%s193_s0] sm:$0xff]  ;;  %v25_v4 = vld [vmem:[%s193_s0 + $0x8] sm:$0xff] }
   0x3   :  { %135 = vmatprep.subr.bf16.mxu0 %v145_v0  ;;  %v26_v5 = vpack.c.bf16 %v25_v4, %v24_v3  ;;  %v125_v14 = vld [vmem:[%s194_s2] ss:$0 sm:$0xff] }
   0x6   :  { %136 = vmatpush3.bf16.msra.mxu0 %v144_v2 }
   0x8   :  { %v22_v6 = vld [vmem:[#allocation2] sm:$0xff]  ;;  %v23_v8 = vld [vmem:[#allocation2 + $0x8] sm:$0xff] }
   0x9   :  { %138 = vmatmul.mubr.msk.bf16.vlgmr.msra.gmra.mrb[0].mxu0 %vm43_vm2, %v26_v5 }
  0xdc   :  { %v81_v7 = vpop.f32.mrb[0].mxu0 }
  0xdd   :  { %v88_v9 = vadd.f32 %v81_v7, %v22_v6  ;;  %v139_v10 = vpop.f32.mrb[1].mxu0 }
  0xde   :  { %v84_v11 = vpop.f32.mrb[2].mxu0 }
  0xdf   :  { %91 = vst.msk [vmem:[#allocation2] sm:$0xff] %vm19_vm0, %v88_v9  ;;  %v89_v12 = vadd.f32 %v84_v11, %v23_v8  ;;  %v140_v13 = vpop.f32.mrb[3].mxu0 }
  0xe1   :  { %92 = vst.msk [vmem:[#allocation2 + $0x8] sm:$0xff] %vm19_vm0, %v89_v12 }
  0xe6   :  { %v96_v15 = vld [vmem:[#allocation2] sm:$0xff] }
  0xe7   :  { %v105_v16 = vadd.f32 %v125_v14, %v96_v15 }
  0xe8   :  { %v97_v17 = vld [vmem:[#allocation2 + $0x8] sm:$0xff] }
  0xe9   :  { %v128_v18 = vpack.c.bf16 %v105_v16, %v105_v16  ;;  %v106_v19 = vadd.f32 %v125_v14, %v97_v17 }
  0xeb   :  { %116 = vst.msk [vmem:[%s195_s3] sm:$0xf] %vm115_vm3, %v128_v18  ;;  %v129_v20 = vpack.c.bf16 %v106_v19, %v106_v19 }
  0xed   :  { %117 = vst.msk [vmem:[%s195_s3 + $0x4] sm:$0xf] %vm115_vm3, %v129_v20 }

// kernel: model_forward.40
= control target key start
LH: loop header
LB: loop body
LE: loop exit
PB: predicated region body
PF: predicated region fallthrough
CT: control target
= control target key end

     0   :  { %vm19_vm0 = vcmask 261120   ;;  %v122_v0 = vmov 0.0   ;;  %vm123_vm1 = vmmov 0   ;;  %s163_s1 = inlined_call_operand.vmem [shape: bf16[32,32], index: 1, kind: input, shape index: {}]   ;;  %s164_s0 = inlined_call_operand.vmem [shape: f32[8,32], index: 0, kind: input, shape index: {}]   ;;  %s165_s2 = inlined_call_operand.vmem [shape: f32[1,32], index: 2, kind: input, shape index: {}]   ;;  %s166_s3 = inlined_call_operand.vmem [shape: f32[8,32], index: 3, kind: output, shape index: {}]  }
   0x1   :  { %110 = vmatprep.subr.bf16.mxu0 %v122_v0  ;;  %v120_v1 = vld [vmem:[%s163_s1] sm:$0xff]   ;;  %114 = vmatprep.mubr.msk.bf16.mxu0 %vm123_vm1, %v122_v0  ;;  %20 = vst.msk [vmem:[#allocation2] sm:$0xff] %vm19_vm0, %v122_v0  ;;  %v121_v2 = vld [vmem:[%s163_s1 + $0x8] sm:$0xff]  }
   0x2   :  { %111 = vmatpush3.bf16.msra.mxu0 %v120_v1  ;;  %v22_v3 = vld [vmem:[%s164_s0] sm:$0xff] }
   0x3   :  { %112 = vmatprep.subr.bf16.mxu0 %v122_v0  ;;  %v23_v4 = vpack.c.bf16 %v22_v3, %v22_v3  ;;  %v106_v11 = vld [vmem:[%s165_s2] ss:$0 sm:$0xff] }
   0x6   :  { %113 = vmatpush3.bf16.msra.mxu0 %v121_v2 }
   0x8   :  { %v21_v5 = vld [vmem:[#allocation2] sm:$0xff] }
   0x9   :  { %115 = vmatmul.mubr.msk.bf16.vlgmr.msra.gmra.mrb[0].mxu0 %vm19_vm0, %v23_v4 }
  0xdc   :  { %v78_v6 = vpop.f32.mrb[0].mxu0 }
  0xdd   :  { %v84_v7 = vadd.f32 %v78_v6, %v21_v5  ;;  %v116_v8 = vpop.f32.mrb[1].mxu0 }
  0xde   :  { %v81_v9 = vpop.f32.mrb[2].mxu0 }
  0xdf   :  { %85 = vst.msk [vmem:[#allocation2] sm:$0xff] %vm19_vm0, %v84_v7  ;;  %v117_v10 = vpop.f32.mrb[3].mxu0 }
  0xe6   :  { %v89_v12 = vld [vmem:[#allocation2] sm:$0xff] }
  0xe7   :  { %v97_v13 = vadd.f32 %v106_v11, %v89_v12 }
  0xe9   :  { %98 = vst.msk [vmem:[%s166_s3] sm:$0xff] %vm19_vm0, %v97_v13 }

// kernel: model_forward.41
= control target key start
LH: loop header
LB: loop body
LE: loop exit
PB: predicated region body
PF: predicated region fallthrough
CT: control target
= control target key end

     0   :  { %s511_s12 = smov 0   ;;  %s513_s13 = smov 0   ;;  %s553_s0 = inlined_call_operand.vmem [shape: bf16[2,8,32], index: 0, kind: input, shape index: {}]   ;;  %s554_s1 = inlined_call_operand.vmem [shape: bf16[32,4], index: 1, kind: input, shape index: {}]   ;;  %s555_s2 = inlined_call_operand.vmem [shape: f32[1,32], index: 2, kind: input, shape index: {}]   ;;  %s556_s3 = inlined_call_operand.vmem [shape: bf16[2,8,8], index: 3, kind: output, shape index: {}]  }
   0x1   :  { %s515_s14 = smov 0  }
   0x2 LB: > { %s25_s15 = sadd.s32 1, %s481_s13  ;;  %p405_p0 = scmp.ge.s32.totalorder %s485_s14, 1  ;;  %s485_s14 = sphi %s515_s14, %s13_s14   ;;  %s481_s13 = sphi %s513_s13, %s558_s13   ;;  %s477_s12 = sphi %s511_s12, %s557_s12  }
   0x3   : > { %p27_p1 = scmp.ge.s32.totalorder %s25_s15, 2  ;;  %p155_p2 = scmp.lt.s32.totalorder %s485_s14, 3 }
   0x5   : > { %s560_s15 = smov (%p27_p1, %s25_s15), 0  ;;  %p156_p3 = pnand %p405_p0, %p155_p2 }
   0x6   : > { %p183_p4 = scmp.lt.s32.totalorder (!%p156_p3), %s477_s12, 1  ;;  %v461_v0 = vld [vmem:[%s554_s1 + $0x8] sm:$0xff] (!%p156_p3)   ;;  %v487_v1 = vmov (!%p156_p3), 0.0   ;;  %vm488_vm0 = vmmov (!%p156_p3), 0   ;;  %v462_v2 = vld [vmem:[%s554_s1] sm:$0xff] (!%p156_p3)   ;;  %vm219_vm1 = vcmask (!%p156_p3), 130048  }
   0x7   : > { %159 = sbr.rel (%p156_p3) target bundleno = 469 (0x1d5), region = 32  ;;  %427 = vmatprep.subr.bf16.mxu1 (!%p156_p3), %v487_v1  ;;  %421 = vmatprep.subr.bf16.mxu0 (!%p156_p3), %v487_v1  ;;  %v408_v4 = vld [vmem:[%s555_s2] ss:$0 sm:$0xff] (!%p156_p3)  ;;  %s489_s26 = smov (!%p156_p3), 112   ;;  %vm264_vm2 = vcmask (!%p156_p3), 27648   ;;  %vm325_vm3 = vcmask (!%p156_p3), 60448  }
   0x8   : > { %428 = vmatpush3.bf16.msra.mxu1 (!%p156_p3), %v461_v0  ;;  %429 = vmatprep.mubr.msk.bf16.mxu1 (!%p156_p3), %vm488_vm0, %v487_v1  ;;  %s490_s30 = smov (!%p156_p3), 4  }
   0x9   : > { %423 = vmatprep.mubr.msk.bf16.mxu0 (!%p156_p3), %vm488_vm0, %v487_v1  ;;  %422 = vmatpush3.bf16.msra.mxu0 (!%p156_p3), %v462_v2 }
   0xe   : > { %s562_s12 = smov (!%p183_p4, %s477_s12), 1 }
   0xf   : > { %s406_s20 = sshll.u32 %s562_s12, 2 }
  0x10   : > { %s189_s23 = scalar_lea.vmem %s553_s0, %s406_s20  ;;  %s196_s29 = scalar_lea.vmem %s556_s3, %s406_s20 }
  0x11   : > { %v198_v3 = vld [vmem:[%s189_s23] sm:$0xf] }
  0x12   : > { %v204_v5 = vunpack.c.l.bf16 %v198_v3 }
  0x14   : > { %v211_v6 = vadd.f32 %v408_v4, %v204_v5 }
  0x16   : > { %v212_v7 = vpack.c.bf16 %v211_v6, %v211_v6 }
  0x18   : > { %267 = vrot.lane.b32.xlu0 %v212_v7, %s489_s26  ;;  %424 = vmatmul.mubr.msk.bf16.vlgmr.msra.gmra.mrb[0].mxu0 %vm219_vm1, %v212_v7 }
  0x8a   : > { %v268_v8 = vpop.permute.xlu0 %267 }
  0x8b   : > { %430 = vmatmul.mubr.msk.bf16.vlgmr.msra.gmra.mrb[0].mxu1 %vm219_vm1, %v268_v8 }
  0xeb   : > { %v257_v9 = vpop.f32.mrb[0].mxu0 }
  0xec   : > { %v263_v10 = vpack.c.bf16 %v257_v9, %v257_v9  ;;  %v425_v11 = vpop.f32.mrb[1].mxu0 }
  0xed   : > { %v260_v12 = vpop.f32.mrb[2].mxu0 }
  0xee   : > { %265 = vst.msk [vmem:[%s196_s29] sm:$0xf] %vm264_vm2, %v263_v10  ;;  %v426_v13 = vpop.f32.mrb[3].mxu0 }
 0x15e   : > { %v312_v14 = vpop.f32.mrb[0].mxu1 }
 0x15f   : > { %v416_v15 = vpack.c.bf16 %v312_v14, %v312_v14  ;;  %v431_v16 = vpop.f32.mrb[1].mxu1 }
 0x160   : > { %v315_v17 = vpop.f32.mrb[2].mxu1 }
 0x161   : > { %322 = vrot.lane.b32.xlu0 %v416_v15, %s490_s30  ;;  %v432_v18 = vpop.f32.mrb[3].mxu1 }
 0x1d3   : > { %v323_v19 = vpop.permute.xlu0 %322 }
 0x1d4   : > { %326 = vst.msk [vmem:[%s196_s29] sm:$0xf] %vm325_vm3, %v323_v19 }
 0x1d5 PF: > { %s13_s14 = sadd.s32 1, %s485_s14   ;;  %s557_s12 = smov %s481_s13 }
 0x1d6   : > { %p10_p5 = scmp.ge.s32.totalorder %s13_s14, 4   ;;  %s558_s13 = smov %s560_s15 }
 0x1d8   :  { %12 = sbr.rel (!%p10_p5) target bundleno = 2 (0x2), region = 62 }

// kernel: model_forward.38
= control target key start
LH: loop header
LB: loop body
LE: loop exit
PB: predicated region body
PF: predicated region fallthrough
CT: control target
= control target key end

     0   :  { %vm16_vm0 = vcmask 261120   ;;  %s92_s14 = smov 96   ;;  %s93_s16 = smov 32   ;;  %vm78_vm1 = vcmask 519168   ;;  %s131_s0 = inlined_call_operand.vmem [shape: bf16[8,64], index: 0, kind: input, shape index: {}]   ;;  %s132_s2 = inlined_call_operand.vmem [shape: f32[1,32], index: 2, kind: input, shape index: {}]   ;;  %s133_s1 = inlined_call_operand.vmem [shape: f32[1,32], index: 1, kind: input, shape index: {}]   ;;  %s134_s3 = inlined_call_operand.vmem [shape: bf16[8,64], index: 3, kind: output, shape index: {}]  }
   0x1   :  { %v14_v0 = vld [vmem:[%s131_s0] sm:$0xf] }
   0x2   :  { %v15_v1 = vunpack.c.l.bf16 %v14_v0  ;;  %v85_v14 = vld [vmem:[%s132_s2] ss:$0 sm:$0xff] }
   0x3   :  { %v84_v17 = vld [vmem:[%s133_s1] ss:$0 sm:$0xff] }
   0x4   :  { %48 = vrot.lane.b32.xlu0 %v15_v1, %s92_s14  ;;  %v17_v2 = vsel %vm16_vm0, %v15_v1, 0.0 }
   0x5   :  { %18 = vadd.xlane.f32.xlu1 %v17_v2 }
  0x76   :  { %v49_v3 = vpop.permute.xlu0 %48 }
  0x77   :  { %v51_v4 = vsel %vm16_vm0, %v49_v3, 0.0 }
  0x78   :  { %52 = vadd.xlane.f32.xlu0 %v51_v4 }
  0x92   :  { %v19_v9 = vpop.xlane.xlu1 %18 }
  0x93   :  { %v21_v10 = vmul.f32 0.03125, %v19_v9 }
  0x95   :  { %v22_v11 = vsub.f32 %v15_v1, %v21_v10 }
  0x97   :  { %v23_v12 = vmul.f32 %v22_v11, %v22_v11 }
  0x99   :  { %v24_v13 = vsel %vm16_vm0, %v23_v12, 0.0 }
 0x105   :  { %v53_v5 = vpop.xlane.xlu0 %52 }
 0x106   :  { %v54_v6 = vmul.f32 0.03125, %v53_v5 }
 0x108   :  { %v55_v7 = vsub.f32 %v15_v1, %v54_v6 }
 0x10a   :  { %v56_v8 = vmul.f32 %v55_v7, %v55_v7 }
 0x10c   :  { %58 = vrot.lane.b32.xlu1 %v56_v8, %s92_s14 }
 0x130   :  { %25 = vadd.xlane.f32.xlu1 %v24_v13 }
 0x141   :  { %72 = vrot.lane.b32.xlu1 %v85_v14, %s93_s16 }
 0x17e   :  { %v59_v15 = vpop.permute.xlu1 %58 }
 0x17f   :  { %v61_v16 = vsel %vm16_vm0, %v59_v15, 0.0 }
 0x180   :  { %62 = vadd.xlane.f32.xlu0 %v61_v16 }
 0x196   :  { %68 = vrot.lane.b32.xlu0 %v84_v17, %s93_s16 }
 0x1bd   :  { %v26_v18 = vpop.xlane.xlu1 %25 }
 0x1be   :  { %v27_v19 = vmul.f32 0.03125, %v26_v18 }
 0x1c0   :  { %v28_v20 = vadd.f32 1e-05, %v27_v19 }
 0x1c1   :  { %v73_v30 = vpop.permute.xlu1 %72 }
 0x1c2   :  { %88 = vrsqrt.f32 %v28_v20 }
 0x1cc   :  { %v89_v24 = vpop.eup %88 }
 0x1cd   :  { %v30_v25 = vmul.f32 %v89_v24, %v22_v11 }
 0x1cf   :  { %v38_v29 = vmul.f32 %v84_v17, %v30_v25 }
 0x1d1   :  { %v46_v32 = vadd.f32 %v85_v14, %v38_v29 }
 0x20d   :  { %v63_v21 = vpop.xlane.xlu0 %62 }
 0x20e   :  { %v64_v22 = vmul.f32 0.03125, %v63_v21 }
 0x210   :  { %v65_v23 = vadd.f32 1e-05, %v64_v22 }
 0x211   :  { %v69_v27 = vpop.permute.xlu0 %68 }
 0x212   :  { %90 = vrsqrt.f32 %v65_v23 }
 0x21c   :  { %v91_v26 = vpop.eup %90 }
 0x21d   :  { %v67_v28 = vmul.f32 %v91_v26, %v55_v7 }
 0x21f   :  { %v71_v31 = vmul.f32 %v69_v27, %v67_v28 }
 0x221   :  { %v75_v33 = vadd.f32 %v73_v30, %v71_v31 }
 0x223   :  { %v76_v34 = vsel %vm16_vm0, %v46_v32, %v75_v33 }
 0x224   :  { %v77_v35 = vpack.c.bf16 %v76_v34, %v76_v34 }
 0x226   :  { %79 = vst.msk [vmem:[%s134_s3] sm:$0xf] %vm78_vm1, %v77_v35 }

// kernel: model_forward.37
= control target key start
LH: loop header
LB: loop body
LE: loop exit
PB: predicated region body
PF: predicated region fallthrough
CT: control target
= control target key end

     0   :  { %s941_s9 = smov 0   ;;  %s943_s10 = smov 0   ;;  %s1070_s0 = inlined_call_operand.vmem [shape: bf16[2,2,4,4], index: 0, kind: input, shape index: {}]   ;;  %s1071_s1 = inlined_call_operand.vmem [shape: bf16[2,2,4,64], index: 1, kind: input, shape index: {}]   ;;  %s1072_s2 = inlined_call_operand.vmem [shape: bf16[2,2,64], index: 2, kind: output, shape index: {}]  }
   0x1   :  { %s945_s11 = smov 0  }
   0x2 LB: > { %s24_s12 = sadd.s32 1, %s913_s10  ;;  %p839_p0 = scmp.ge.s32.totalorder %s917_s11, 1  ;;  %s917_s11 = sphi %s945_s11, %s12_s11   ;;  %s913_s10 = sphi %s943_s10, %s1074_s10   ;;  %s909_s9 = sphi %s941_s9, %s1073_s9  }
   0x3   : > { %p26_p1 = scmp.ge.s32.totalorder %s24_s12, 2  ;;  %p150_p2 = scmp.lt.s32.totalorder %s917_s11, 3 }
   0x5   : > { %s1076_s12 = smov (%p26_p1, %s24_s12), 0  ;;  %p151_p3 = pnand %p839_p0, %p150_p2 }
   0x6   : > { %p187_p4 = scmp.lt.s32.totalorder (!%p151_p3), %s909_s9, 1  ;;  %v919_v0 = vmov (!%p151_p3), 0   ;;  %vm220_vm0 = vcmask (!%p151_p3), 27648   ;;  %v920_v43 = vmov (!%p151_p3), 1   ;;  %v921_v44 = vmov (!%p151_p3), 2  }
   0x7   : > { %154 = sbr.rel (%p151_p3) target bundleno = 262 (0x106), region = 28  ;;  %881 = vset.pattern.permute.xlu1 (!%p151_p3), %v919_v0  ;;  %879 = vset.pattern.permute.xlu0 (!%p151_p3), %v919_v0  ;;  %v922_v45 = vmov (!%p151_p3), 3   ;;  %v923_v46 = vmov (!%p151_p3), 839922192   ;;  %v267_v48 = vlaneseq (!%p151_p3)  ;;  %vm285_vm1 = vcmask (!%p151_p3), 125952  }
   0x8   : > { %v265_v47 = vunpack.c.l.s4 (!%p151_p3), %v923_v46  ;;  %v924_v0 = vmov (!%p151_p3), 1966171168   ;;  %vm407_vm2 = vcmask (!%p151_p3), 257152   ;;  %vm528_vm3 = vcmask (!%p151_p3), 388352  }
   0x9   : > { %v976_v50 = vshrl.u32 (!%p151_p3), %v267_v48, 7  ;;  %vm649_vm4 = vcmask (!%p151_p3), 519552   ;;  %vm363_vm5 = vcmask (!%p151_p3), 1041409   ;;  %vm381_vm6 = vcmask (!%p151_p3), 122880  }
   0xa   : > { %v266_v49 = vunpack.c.0.s8 (!%p151_p3), %v265_v47  ;;  %vm502_vm7 = vcmask (!%p151_p3), 254080   ;;  %vm623_vm8 = vcmask (!%p151_p3), 385280   ;;  %vm744_vm9 = vcmask (!%p151_p3), 516480  }
   0xc   : > { %v979_v52 = vsub.s32 (!%p151_p3), %v266_v49, %v976_v50 }
   0xe   : > { %s1078_s9 = smov (!%p187_p4, %s909_s9), 1 }
   0xf   : > { %s846_s13 = sshll.u32 %s1078_s9, 2  ;;  %s1033_s22 = scalar_lea.vmem %s1072_s2, %s1078_s9 }
  0x10   : > { %s194_s16 = scalar_lea.vmem %s1070_s0, %s846_s13  ;;  %s204_s19 = scalar_lea.vmem %s1071_s1, %s846_s13 }
  0x11   : > { %v213_v1 = vld [vmem:[%s194_s16 + $0x2] sm:$0x3]  ;;  %v212_v2 = vld [vmem:[%s194_s16] sm:$0x3] }
  0x12   : > { %v215_v3 = vunpack.c.l.bf16 %v213_v1  ;;  %v214_v4 = vunpack.c.l.bf16 %v212_v2  ;;  %v217_v51 = vld [vmem:[%s204_s19 + $0x2] sm:$0x3]  ;;  %v216_v53 = vld [vmem:[%s204_s19] sm:$0x3]  ;;  %v305_v1 = vunpack.c.l.s4 %v924_v0 }
  0x13   : > { %v219_v54 = vunpack.c.l.bf16 %v217_v51  ;;  %v981_v56 = vunpack.c.l.bf16 %v216_v53 }
  0x14   : > { %v228_v5 = vsel %vm220_vm0, %v215_v3, -inf  ;;  %v221_v6 = vsel %vm220_vm0, %v214_v4, -inf }
  0x15   : > { %v229_v7 = vrot.slane %v228_v5, 4  ;;  %v222_v8 = vrot.slane %v221_v6, 4 }
  0x17   : > { %v230_v9 = vmax.f32 %v228_v5, %v229_v7  ;;  %v223_v10 = vmax.f32 %v221_v6, %v222_v8 }
  0x19   : > { %v231_v11 = vrot.slane %v230_v9, 2  ;;  %v224_v12 = vrot.slane %v223_v10, 2 }
  0x1b   : > { %v232_v13 = vmax.f32 %v230_v9, %v231_v11  ;;  %v225_v14 = vmax.f32 %v223_v10, %v224_v12  ;;  %v306_v12 = vunpack.c.0.s8 %v305_v1 }
  0x1d   : > { %v233_v15 = vrot.slane %v232_v13, 1  ;;  %v226_v16 = vrot.slane %v225_v14, 1 }
  0x1f   : > { %v234_v17 = vmax.f32 %v232_v13, %v233_v15  ;;  %v227_v18 = vmax.f32 %v225_v14, %v226_v16  ;;  %v925_v13 = vmov 1935823168  }
  0x20   : > { %v333_v14 = vunpack.c.l.s4 %v925_v13 }
  0x21   : > { %v236_v19 = vsub.f32 %v215_v3, %v234_v17  ;;  %v235_v20 = vsub.f32 %v214_v4, %v227_v18 }
  0x23   : > { %v239_v21 = vmul.f32 1.442695, %v236_v19  ;;  %v237_v22 = vmul.f32 1.442695, %v235_v20 }
  0x25   : > { %887 = vpow2.f32 %v239_v21 }
  0x26   : > { %889 = vpow2.f32 %v237_v22 }
  0x2f   : > { %v888_v23 = vpop.eup %887 }
  0x30   : > { %v890_v24 = vpop.eup %889  ;;  %v248_v25 = vsel %vm220_vm0, %v888_v23, 0.0 }
  0x31   : > { %v249_v26 = vrot.slane %v248_v25, 4  ;;  %v241_v27 = vsel %vm220_vm0, %v890_v24, 0.0 }
  0x32   : > { %v242_v28 = vrot.slane %v241_v27, 4 }
  0x33   : > { %v250_v29 = vadd.f32 %v249_v26, %v248_v25 }
  0x34   : > { %v243_v30 = vadd.f32 %v242_v28, %v241_v27 }
  0x35   : > { %v251_v31 = vrot.slane %v250_v29, 2 }
  0x36   : > { %v244_v32 = vrot.slane %v243_v30, 2 }
  0x37   : > { %v252_v33 = vadd.f32 %v251_v31, %v250_v29  ;;  %v334_v29 = vunpack.c.0.s8 %v333_v14 }
  0x38   : > { %v245_v34 = vadd.f32 %v244_v32, %v243_v30 }
  0x39   : > { %v253_v35 = vrot.slane %v252_v33, 1 }
  0x3a   : > { %v246_v36 = vrot.slane %v245_v34, 1 }
  0x3b   : > { %v254_v37 = vadd.f32 %v253_v35, %v252_v33  ;;  %v994_v33 = vsub.s32 %v306_v12, %v976_v50 }
  0x3c   : > { %v247_v38 = vadd.f32 %v246_v36, %v245_v34 }
  0x3d   : > { %891 = vrcp.f32 %v254_v37 }
  0x3e   : > { %893 = vrcp.f32 %v247_v38 }
  0x47   : > { %v892_v39 = vpop.eup %891 }
  0x48   : > { %v894_v40 = vpop.eup %893  ;;  %v258_v41 = vmul.f32 %v892_v39, %v888_v23 }
  0x49   : > { %v256_v42 = vmul.f32 %v894_v40, %v890_v24 }
  0x4a   : > { %273 = vperm.xlu0 %879, %v258_v41  }
  0x4b   : > { %261 = vperm.xlu1 %881, %v256_v42  }
  0x4e   : > { %880 = vset.pattern.permute.xlu0 %v920_v43 }
  0x4f   : > { %882 = vset.pattern.permute.xlu1 %v921_v44  ;;  %395 = vperm.xlu0 %880, %v258_v41  }
  0x50   : > { %516 = vperm.xlu1 %882, %v258_v41  }
  0x53   : > { %884 = vset.pattern.permute.xlu0 %v922_v45 }
  0x54   : > { %883 = vset.pattern.permute.xlu1 %v920_v43  ;;  %637 = vperm.xlu0 %884, %v258_v41  }
  0x55   : > { %384 = vperm.xlu1 %883, %v256_v42  }
  0x59   : > { %885 = vset.pattern.permute.xlu1 %v921_v44 }
  0x5a   : > { %505 = vperm.xlu1 %885, %v256_v42  }
  0x5e   : > { %886 = vset.pattern.permute.xlu1 %v922_v45 }
  0x5f   : > { %626 = vperm.xlu1 %886, %v256_v42  }
  0xc9   : > { %v274_v55 = vpop.permute.xlu0 %273 }
  0xca   : > { %v282_v57 = vrot.slane %v274_v55, %v979_v52  ;;  %v262_v58 = vpop.permute.xlu1 %261  ;;  %v1001_v55 = vsub.s32 %v334_v29, %v976_v50 }
  0xcb   : > { %v270_v59 = vrot.slane %v262_v58, %v979_v52 }
  0xcc   : > { %v284_v60 = vmul.f32 %v282_v57, %v219_v54 }
  0xcd   : > { %v283_v61 = vmul.f32 %v270_v59, %v981_v56 }
  0xce   : > { %v293_v62 = vsel %vm285_vm1, %v284_v60, 0.0  ;;  %v396_v63 = vpop.permute.xlu0 %395 }
  0xcf   : > { %v294_v2 = vrot.slane %v293_v62, 4  ;;  %v286_v3 = vsel %vm285_vm1, %v283_v61, 0.0  ;;  %v517_v4 = vpop.permute.xlu1 %516  ;;  %v404_v5 = vrot.slane %v396_v63, %v979_v52 }
  0xd0   : > { %v287_v6 = vrot.slane %v286_v3, 4  ;;  %v525_v7 = vrot.slane %v517_v4, %v979_v52 }
  0xd1   : > { %v295_v8 = vadd.f32 %v294_v2, %v293_v62  ;;  %v406_v9 = vmul.f32 %v404_v5, %v219_v54 }
  0xd2   : > { %v288_v10 = vadd.f32 %v287_v6, %v286_v3  ;;  %v527_v11 = vmul.f32 %v525_v7, %v219_v54 }
  0xd3   : > { %v296_v15 = vrot.slane %v295_v8, 2  ;;  %v415_v16 = vsel %vm407_vm2, %v406_v9, 0.0  ;;  %v638_v17 = vpop.permute.xlu0 %637 }
  0xd4   : > { %v289_v18 = vrot.slane %v288_v10, 2  ;;  %v536_v19 = vsel %vm528_vm3, %v527_v11, 0.0  ;;  %v416_v20 = vrot.slane %v415_v16, 4  ;;  %v385_v21 = vpop.permute.xlu1 %384  ;;  %v646_v22 = vrot.slane %v638_v17, %v979_v52 }
  0xd5   : > { %v297_v23 = vadd.f32 %v296_v15, %v295_v8  ;;  %v537_v24 = vrot.slane %v536_v19, 4  ;;  %v393_v25 = vrot.slane %v385_v21, %v979_v52 }
  0xd6   : > { %v290_v26 = vadd.f32 %v289_v18, %v288_v10  ;;  %v417_v27 = vadd.f32 %v416_v20, %v415_v16  ;;  %v648_v28 = vmul.f32 %v646_v22, %v219_v54 }
  0xd7   : > { %v298_v30 = vrot.slane %v297_v23, 1  ;;  %v538_v31 = vadd.f32 %v537_v24, %v536_v19  ;;  %v405_v32 = vmul.f32 %v393_v25, %v981_v56 }
  0xd8   : > { %v291_v34 = vrot.slane %v290_v26, 1  ;;  %v418_v35 = vrot.slane %v417_v27, 2  ;;  %v657_v36 = vsel %vm649_vm4, %v648_v28, 0.0 }
  0xd9   : > { %v299_v37 = vadd.f32 %v298_v30, %v297_v23  ;;  %v539_v38 = vrot.slane %v538_v31, 2  ;;  %v408_v39 = vsel %vm407_vm2, %v405_v32, 0.0  ;;  %v658_v40 = vrot.slane %v657_v36, 4  ;;  %v506_v41 = vpop.permute.xlu1 %505 }
  0xda   : > { %v292_v42 = vadd.f32 %v291_v34, %v290_v26  ;;  %v419_v43 = vadd.f32 %v418_v35, %v417_v27  ;;  %v409_v44 = vrot.slane %v408_v39, 4  ;;  %v514_v45 = vrot.slane %v506_v41, %v979_v52 }
  0xdb   : > { %v301_v46 = vpack.c.bf16 %v299_v37, %v299_v37  ;;  %v540_v47 = vadd.f32 %v539_v38, %v538_v31  ;;  %v659_v48 = vadd.f32 %v658_v40, %v657_v36 }
  0xdc   : > { %v300_v49 = vpack.c.bf16 %v292_v42, %v292_v42  ;;  %v420_v51 = vrot.slane %v419_v43, 1  ;;  %v410_v53 = vadd.f32 %v409_v44, %v408_v39  ;;  %v526_v54 = vmul.f32 %v514_v45, %v981_v56 }
  0xdd   : > { %v324_v57 = vrot.slane %v301_v46, %v994_v33  ;;  %v541_v58 = vrot.slane %v540_v47, 1  ;;  %v660_v59 = vrot.slane %v659_v48, 2 }
  0xde   : > { %v310_v60 = vrot.slane %v300_v49, %v994_v33  ;;  %v421_v61 = vadd.f32 %v420_v51, %v419_v43  ;;  %v411_v62 = vrot.slane %v410_v53, 2  ;;  %v529_v63 = vsel %vm528_vm3, %v526_v54, 0.0  ;;  %v627_v0 = vpop.permute.xlu1 %626 }
  0xdf   : > { %v331_v1 = vrot.slane %v324_v57, %v994_v33  ;;  %v542_v2 = vadd.f32 %v541_v58, %v540_v47  ;;  %v661_v3 = vadd.f32 %v660_v59, %v659_v48  ;;  %v530_v4 = vrot.slane %v529_v63, 4 }
  0xe0   : > { %v317_v5 = vrot.slane %v310_v60, %v994_v33  ;;  %v423_v50 = vpack.c.bf16 %v421_v61, %v421_v61  ;;  %v412_v6 = vadd.f32 %v411_v62, %v410_v53  ;;  %v635_v7 = vrot.slane %v627_v0, %v979_v52 }
  0xe1   : > { %v352_v8 = vrot.slane %v331_v1, %v1001_v55  ;;  %v544_v9 = vpack.c.bf16 %v542_v2, %v542_v2  ;;  %v662_v10 = vrot.slane %v661_v3, 1  ;;  %v531_v11 = vadd.f32 %v530_v4, %v529_v63 }
  0xe2   : > { %v338_v12 = vrot.slane %v317_v5, %v1001_v55  ;;  %v446_v13 = vrot.slane %v423_v50, %v994_v33  ;;  %v413_v14 = vrot.slane %v412_v6, 1  ;;  %v647_v15 = vmul.f32 %v635_v7, %v981_v56 }
  0xe3   : > { %v359_v16 = vrot.slane %v352_v8, %v1001_v55  ;;  %v567_v17 = vrot.slane %v544_v9, %v994_v33  ;;  %v663_v18 = vadd.f32 %v662_v10, %v661_v3  ;;  %v532_v19 = vrot.slane %v531_v11, 2 }
  0xe4   : > { %v345_v52 = vrot.slane %v338_v12, %v1001_v55  ;;  %v453_v20 = vrot.slane %v446_v13, %v994_v33  ;;  %v414_v21 = vadd.f32 %v413_v14, %v412_v6  ;;  %v650_v22 = vsel %vm649_vm4, %v647_v15, 0.0 }
  0xe5   : > { %v361_v23 = vunpack.c.l.b16 %v359_v16  ;;  %v574_v24 = vrot.slane %v567_v17, %v994_v33  ;;  %v665_v25 = vpack.c.bf16 %v663_v18, %v663_v18  ;;  %v533_v26 = vadd.f32 %v532_v19, %v531_v11 }
  0xe6   : > { %v474_v56 = vrot.slane %v453_v20, %v1001_v55  ;;  %v422_v27 = vpack.c.bf16 %v414_v21, %v414_v21  ;;  %v651_v28 = vrot.slane %v650_v22, 4  ;;  %v360_v30 = vunpack.c.l.b16 %v345_v52 }
  0xe7   : > { %v362_v29 = vrot.slane %v361_v23, 7  ;;  %v534_v31 = vrot.slane %v533_v26, 1  ;;  %v688_v35 = vrot.slane %v665_v25, %v994_v33  ;;  %v595_v38 = vrot.slane %v574_v24, %v1001_v55 }
  0xe8   : > { %v481_v32 = vrot.slane %v474_v56, %v1001_v55  ;;  %v432_v34 = vrot.slane %v422_v27, %v994_v33  ;;  %v652_v36 = vadd.f32 %v651_v28, %v650_v22 }
  0xe9   : > { %v364_v37 = vsel %vm363_vm5, %v362_v29, %v360_v30  ;;  %v535_v39 = vadd.f32 %v534_v31, %v533_v26  ;;  %v695_v47 = vrot.slane %v688_v35, %v994_v33  ;;  %v602_v49 = vrot.slane %v595_v38, %v1001_v55 }
  0xea   : > { %v365_v40 = vpack.c.b16 %v364_v37, %v364_v37  ;;  %v483_v41 = vunpack.c.l.b16 %v481_v32  ;;  %v439_v42 = vrot.slane %v432_v34, %v994_v33  ;;  %v653_v43 = vrot.slane %v652_v36, 2 }
  0xeb   : > { %v543_v44 = vpack.c.bf16 %v535_v39, %v535_v39  ;;  %v716_v61 = vrot.slane %v695_v47, %v1001_v55  ;;  %v604_v63 = vunpack.c.l.b16 %v602_v49 }
  0xec   : > { %v372_v45 = vrot.slane %v365_v40, %v994_v33  ;;  %v460_v46 = vrot.slane %v439_v42, %v1001_v55  ;;  %v654_v48 = vadd.f32 %v653_v43, %v652_v36  ;;  %v484_v54 = vrot.slane %v483_v41, 7 }
  0xed   : > { %v553_v51 = vrot.slane %v543_v44, %v994_v33  ;;  %v723_v5 = vrot.slane %v716_v61, %v1001_v55  ;;  %v605_v6 = vrot.slane %v604_v63, 7 }
  0xee   : > { %v379_v53 = vrot.slane %v372_v45, %v994_v33  ;;  %v467_v57 = vrot.slane %v460_v46, %v1001_v55  ;;  %v655_v58 = vrot.slane %v654_v48, 1 }
  0xef   : > { %v560_v59 = vrot.slane %v553_v51, %v994_v33  ;;  %v725_v12 = vunpack.c.l.b16 %v723_v5 }
  0xf0   : > { %382 = vst.msk [vmem:[%s1033_s22] sm:$0x1] %vm381_vm6, %v379_v53  ;;  %v482_v60 = vunpack.c.l.b16 %v467_v57  ;;  %v656_v62 = vadd.f32 %v655_v58, %v654_v48 }
  0xf1   : > { %v581_v0 = vrot.slane %v560_v59, %v1001_v55  ;;  %v726_v17 = vrot.slane %v725_v12, 7 }
  0xf2   : > { %v485_v1 = vsel %vm363_vm5, %v484_v54, %v482_v60  ;;  %v664_v2 = vpack.c.bf16 %v656_v62, %v656_v62 }
  0xf3   : > { %v486_v3 = vpack.c.b16 %v485_v1, %v485_v1  ;;  %v588_v4 = vrot.slane %v581_v0, %v1001_v55 }
  0xf4   : > { %v674_v50 = vrot.slane %v664_v2, %v994_v33 }
  0xf5   : > { %v493_v7 = vrot.slane %v486_v3, %v994_v33  ;;  %v603_v8 = vunpack.c.l.b16 %v588_v4 }
  0xf6   : > { %v681_v9 = vrot.slane %v674_v50, %v994_v33 }
  0xf7   : > { %v500_v10 = vrot.slane %v493_v7, %v994_v33  ;;  %v606_v11 = vsel %vm363_vm5, %v605_v6, %v603_v8 }
  0xf8   : > { %v607_v13 = vpack.c.b16 %v606_v11, %v606_v11  ;;  %v702_v14 = vrot.slane %v681_v9, %v1001_v55 }
  0xf9   : > { %503 = vst.msk [vmem:[%s1033_s22] sm:$0x1] %vm502_vm7, %v500_v10 }
  0xfa   : > { %v614_v15 = vrot.slane %v607_v13, %v994_v33  ;;  %v709_v16 = vrot.slane %v702_v14, %v1001_v55 }
  0xfc   : > { %v621_v18 = vrot.slane %v614_v15, %v994_v33  ;;  %v724_v19 = vunpack.c.l.b16 %v709_v16 }
  0xfe   : > { %624 = vst.msk [vmem:[%s1033_s22] sm:$0x1] %vm623_vm8, %v621_v18  ;;  %v727_v52 = vsel %vm363_vm5, %v726_v17, %v724_v19 }
  0xff   : > { %v728_v20 = vpack.c.b16 %v727_v52, %v727_v52 }
 0x101   : > { %v735_v21 = vrot.slane %v728_v20, %v994_v33 }
 0x103   : > { %v742_v22 = vrot.slane %v735_v21, %v994_v33 }
 0x105   : > { %745 = vst.msk [vmem:[%s1033_s22] sm:$0x1] %vm744_vm9, %v742_v22 }
 0x106 PF: > { %s12_s11 = sadd.s32 1, %s917_s11   ;;  %s1073_s9 = smov %s913_s10 }
 0x107   : > { %p9_p5 = scmp.ge.s32.totalorder %s12_s11, 4   ;;  %s1074_s10 = smov %s1076_s12 }
 0x109   :  { %11 = sbr.rel (!%p9_p5) target bundleno = 2 (0x2), region = 61 }

// kernel: model_forward.34
= control target key start
LH: loop header
LB: loop body
LE: loop exit
PB: predicated region body
PF: predicated region fallthrough
CT: control target
= control target key end

     0   :  { %vm19_vm0 = vcmask 15360   ;;  %v145_v0 = vmov 0.0   ;;  %vm146_vm1 = vmmov 0   ;;  %vm43_vm2 = vcmask 261120   ;;  %s192_s1 = inlined_call_operand.vmem [shape: bf16[32,2], index: 1, kind: input, shape index: {}]   ;;  %s193_s0 = inlined_call_operand.vmem [shape: f32[16,32], index: 0, kind: input, shape index: {}]   ;;  %s194_s2 = inlined_call_operand.vmem [shape: f32[1,2], index: 2, kind: input, shape index: {}]   ;;  %s195_s3 = inlined_call_operand.vmem [shape: bf16[16,2], index: 3, kind: output, shape index: {}]  }
   0x1   :  { %133 = vmatprep.subr.bf16.mxu0 %v145_v0  ;;  %v143_v1 = vld [vmem:[%s192_s1] sm:$0xff]   ;;  %137 = vmatprep.mubr.msk.bf16.mxu0 %vm146_vm1, %v145_v0  ;;  %20 = vst.msk [vmem:[#allocation2] sm:$0xff] %vm19_vm0, %v145_v0  ;;  %21 = vst.msk [vmem:[#allocation2 + $0x8] sm:$0xff] %vm19_vm0, %v145_v0  ;;  %v144_v2 = vld [vmem:[%s192_s1 + $0x8] sm:$0xff]   ;;  %vm115_vm3 = vcmask 11264  }
   0x2   :  { %134 = vmatpush3.bf16.msra.mxu0 %v143_v1  ;;  %v24_v3 = vld [vmem:[%s193_s0] sm:$0xff]  ;;  %v25_v4 = vld [vmem:[%s193_s0 + $0x8] sm:$0xff] }
   0x3   :  { %135 = vmatprep.subr.bf16.mxu0 %v145_v0  ;;  %v26_v5 = vpack.c.bf16 %v25_v4, %v24_v3  ;;  %v125_v14 = vld [vmem:[%s194_s2] ss:$0 sm:$0xff] }
   0x6   :  { %136 = vmatpush3.bf16.msra.mxu0 %v144_v2 }
   0x8   :  { %v22_v6 = vld [vmem:[#allocation2] sm:$0xff]  ;;  %v23_v8 = vld [vmem:[#allocation2 + $0x8] sm:$0xff] }
   0x9   :  { %138 = vmatmul.mubr.msk.bf16.vlgmr.msra.gmra.mrb[0].mxu0 %vm43_vm2, %v26_v5 }
  0xdc   :  { %v81_v7 = vpop.f32.mrb[0].mxu0 }
  0xdd   :  { %v88_v9 = vadd.f32 %v81_v7, %v22_v6  ;;  %v139_v10 = vpop.f32.mrb[1].mxu0 }
  0xde   :  { %v84_v11 = vpop.f32.mrb[2].mxu0 }
  0xdf   :  { %91 = vst.msk [vmem:[#allocation2] sm:$0xff] %vm19_vm0, %v88_v9  ;;  %v89_v12 = vadd.f32 %v84_v11, %v23_v8  ;;  %v140_v13 = vpop.f32.mrb[3].mxu0 }
  0xe1   :  { %92 = vst.msk [vmem:[#allocation2 + $0x8] sm:$0xff] %vm19_vm0, %v89_v12 }
  0xe6   :  { %v96_v15 = vld [vmem:[#allocation2] sm:$0xff] }
  0xe7   :  { %v105_v16 = vadd.f32 %v125_v14, %v96_v15 }
  0xe8   :  { %v97_v17 = vld [vmem:[#allocation2 + $0x8] sm:$0xff] }
  0xe9   :  { %v128_v18 = vpack.c.bf16 %v105_v16, %v105_v16  ;;  %v106_v19 = vadd.f32 %v125_v14, %v97_v17 }
  0xeb   :  { %116 = vst.msk [vmem:[%s195_s3] sm:$0xf] %vm115_vm3, %v128_v18  ;;  %v129_v20 = vpack.c.bf16 %v106_v19, %v106_v19 }
  0xed   :  { %117 = vst.msk [vmem:[%s195_s3 + $0x4] sm:$0xf] %vm115_vm3, %v129_v20 }

// kernel: model_forward.35
= control target key start
LH: loop header
LB: loop body
LE: loop exit
PB: predicated region body
PF: predicated region fallthrough
CT: control target
= control target key end

     0   :  { %s702_s9 = smov 0   ;;  %s704_s10 = smov 0   ;;  %s763_s0 = inlined_call_operand.vmem [shape: bf16[2,2,4,2], index: 0, kind: input, shape index: {}]   ;;  %s764_s1 = inlined_call_operand.vmem [shape: f32[2,2,4,32], index: 1, kind: input, shape index: {}]   ;;  %s765_s2 = inlined_call_operand.vmem [shape: bf16[2,2,32], index: 2, kind: output, shape index: {}]  }
   0x1   :  { %s706_s11 = smov 0  }
   0x2 LB: > { %s24_s12 = sadd.s32 1, %s674_s10  ;;  %p604_p0 = scmp.ge.s32.totalorder %s678_s11, 1  ;;  %s678_s11 = sphi %s706_s11, %s12_s11   ;;  %s674_s10 = sphi %s704_s10, %s767_s10   ;;  %s670_s9 = sphi %s702_s9, %s766_s9  }
   0x3   : > { %p26_p1 = scmp.ge.s32.totalorder %s24_s12, 2  ;;  %p150_p2 = scmp.lt.s32.totalorder %s678_s11, 3 }
   0x5   : > { %s769_s12 = smov (%p26_p1, %s24_s12), 0  ;;  %p151_p3 = pnand %p604_p0, %p150_p2 }
   0x6   : > { %p187_p4 = scmp.lt.s32.totalorder (!%p151_p3), %s670_s9, 1  ;;  %v680_v0 = vmov (!%p151_p3), 1   ;;  %v681_v1 = vmov (!%p151_p3), 0   ;;  %vm218_vm0 = vcmask (!%p151_p3), 11264   ;;  %s682_s21 = smov (!%p151_p3), 112   ;;  %v265_v48 = vlaneseq (!%p151_p3) }
   0x7   : > { %154 = sbr.rel (%p151_p3) target bundleno = 358 (0x166), region = 28  ;;  %644 = vset.pattern.permute.xlu0 (!%p151_p3), %v680_v0  ;;  %646 = vset.pattern.permute.xlu1 (!%p151_p3), %v681_v1  ;;  %v683_v46 = vmov (!%p151_p3), 839922192   ;;  %vm283_vm1 = vcmask (!%p151_p3), 125952   ;;  %vm361_vm2 = vcmask (!%p151_p3), 1041409   ;;  %s686_s22 = smov (!%p151_p3), 16  }
   0x8   : > { %v263_v47 = vunpack.c.l.s4 (!%p151_p3), %v683_v46  ;;  %v266_v51 = vshrl.u32 (!%p151_p3), %v265_v48, 7  ;;  %vm379_vm3 = vcmask (!%p151_p3), 122880   ;;  %vm509_vm4 = vcmask (!%p151_p3), 254080  }
   0xa   : > { %v264_v50 = vunpack.c.0.s8 (!%p151_p3), %v263_v47 }
   0xc   : > { %v267_v52 = vsub.s32 (!%p151_p3), %v264_v50, %v266_v51 }
   0xe   : > { %s771_s9 = smov (!%p187_p4, %s670_s9), 1 }
   0xf   : > { %s611_s13 = sshll.u32 %s771_s9, 2  ;;  %s612_s14 = sshll.u32 %s771_s9, 3 }
  0x10   : > { %s194_s17 = scalar_lea.vmem %s763_s0, %s611_s13  ;;  %s204_s20 = scalar_lea.vmem %s764_s1, %s612_s14 }
  0x11   : > { %v213_v2 = vld [vmem:[%s194_s17 + $0x2] sm:$0x3]  ;;  %v212_v3 = vld [vmem:[%s194_s17] sm:$0x3]  ;;  %v731_v4 = vld [vmem:[%s204_s20 + $0x4] sm:$0xf]  ;;  %s211_s25 = scalar_lea.vmem %s765_s2, %s771_s9 }
  0x12   : > { %v215_v5 = vunpack.c.l.bf16 %v213_v2  ;;  %v214_v6 = vunpack.c.l.bf16 %v212_v3  ;;  %407 = vrot.lane.b32.xlu1 %v731_v4, %s682_s21  ;;  %v734_v7 = vld [vmem:[%s204_s20] sm:$0xf]  ;;  %v684_v3 = vmov 1966171168  }
  0x14   : > { %v226_v8 = vsel %vm218_vm0, %v215_v5, -inf  ;;  %v219_v9 = vsel %vm218_vm0, %v214_v6, -inf }
  0x15   : > { %v227_v10 = vrot.slane %v226_v8, 4  ;;  %v220_v11 = vrot.slane %v219_v9, 4 }
  0x16   : > { %405 = vrot.lane.b32.xlu1 %v734_v7, %s682_s21 }
  0x17   : > { %v228_v12 = vmax.f32 %v226_v8, %v227_v10  ;;  %v221_v13 = vmax.f32 %v219_v9, %v220_v11 }
  0x19   : > { %v229_v14 = vrot.slane %v228_v12, 2  ;;  %v222_v15 = vrot.slane %v221_v13, 2 }
  0x1b   : > { %v230_v16 = vmax.f32 %v228_v12, %v229_v14  ;;  %v223_v17 = vmax.f32 %v221_v13, %v222_v15  ;;  %v685_v14 = vmov 1935823168  }
  0x1d   : > { %v231_v18 = vrot.slane %v230_v16, 1  ;;  %v224_v19 = vrot.slane %v223_v17, 1 }
  0x1f   : > { %v232_v20 = vmax.f32 %v230_v16, %v231_v18  ;;  %v225_v21 = vmax.f32 %v223_v17, %v224_v19 }
  0x21   : > { %v234_v22 = vsub.f32 %v215_v5, %v232_v20  ;;  %v233_v23 = vsub.f32 %v214_v6, %v225_v21  ;;  %v303_v5 = vunpack.c.l.s4 %v684_v3 }
  0x23   : > { %v237_v24 = vmul.f32 1.442695, %v234_v22  ;;  %v235_v25 = vmul.f32 1.442695, %v233_v23  ;;  %v304_v16 = vunpack.c.0.s8 %v303_v5 }
  0x25   : > { %648 = vpow2.f32 %v237_v24 }
  0x26   : > { %650 = vpow2.f32 %v235_v25 }
  0x2f   : > { %v649_v26 = vpop.eup %648 }
  0x30   : > { %v651_v27 = vpop.eup %650  ;;  %v246_v28 = vsel %vm218_vm0, %v649_v26, 0.0 }
  0x31   : > { %v247_v29 = vrot.slane %v246_v28, 4  ;;  %v239_v30 = vsel %vm218_vm0, %v651_v27, 0.0 }
  0x32   : > { %v240_v31 = vrot.slane %v239_v30, 4 }
  0x33   : > { %v248_v32 = vadd.f32 %v247_v29, %v246_v28 }
  0x34   : > { %v241_v33 = vadd.f32 %v240_v31, %v239_v30 }
  0x35   : > { %v249_v34 = vrot.slane %v248_v32, 2 }
  0x36   : > { %v242_v35 = vrot.slane %v241_v33, 2 }
  0x37   : > { %v250_v36 = vadd.f32 %v249_v34, %v248_v32 }
  0x38   : > { %v243_v37 = vadd.f32 %v242_v35, %v241_v33 }
  0x39   : > { %v251_v38 = vrot.slane %v250_v36, 1 }
  0x3a   : > { %v244_v39 = vrot.slane %v243_v37, 1 }
  0x3b   : > { %v252_v40 = vadd.f32 %v251_v38, %v250_v36 }
  0x3c   : > { %v245_v41 = vadd.f32 %v244_v39, %v243_v37 }
  0x3d   : > { %652 = vrcp.f32 %v252_v40 }
  0x3e   : > { %654 = vrcp.f32 %v245_v41 }
  0x47   : > { %v653_v42 = vpop.eup %652 }
  0x48   : > { %v655_v43 = vpop.eup %654  ;;  %v256_v44 = vmul.f32 %v653_v42, %v649_v26  ;;  %v307_v26 = vsub.s32 %v304_v16, %v266_v51 }
  0x49   : > { %v254_v45 = vmul.f32 %v655_v43, %v651_v27 }
  0x4a   : > { %393 = vperm.xlu0 %644, %v256_v44  }
  0x4b   : > { %259 = vperm.xlu1 %646, %v254_v45  }
  0x4e   : > { %382 = vperm.xlu0 %644, %v254_v45  }
  0x52   : > { %645 = vset.pattern.permute.xlu0 %v681_v1 }
  0x53   : > { %271 = vperm.xlu0 %645, %v256_v44  }
  0x57   : > { %647 = vset.pattern.permute.xlu0 %v680_v0 }
  0x84   : > { %v408_v49 = vpop.permute.xlu1 %407 }
  0x88   : > { %v406_v53 = vpop.permute.xlu1 %405 }
  0xc9   : > { %v394_v54 = vpop.permute.xlu0 %393 }
  0xca   : > { %v402_v55 = vrot.slane %v394_v54, %v267_v52  ;;  %v260_v56 = vpop.permute.xlu1 %259 }
  0xcb   : > { %v268_v57 = vrot.slane %v260_v56, %v267_v52 }
  0xcc   : > { %v412_v58 = vmul.f32 %v408_v49, %v402_v55 }
  0xcd   : > { %v383_v59 = vpop.permute.xlu0 %382  ;;  %v281_v60 = vmul.f32 %v268_v57, %v734_v7  ;;  %v331_v7 = vunpack.c.l.s4 %v685_v14 }
  0xce   : > { %v420_v61 = vsel %vm283_vm1, %v412_v58, 0.0  ;;  %v391_v62 = vrot.slane %v383_v59, %v267_v52 }
  0xcf   : > { %v421_v63 = vrot.slane %v420_v61, 4  ;;  %v284_v0 = vsel %vm283_vm1, %v281_v60, 0.0  ;;  %v332_v27 = vunpack.c.0.s8 %v331_v7 }
  0xd0   : > { %v411_v1 = vmul.f32 %v406_v53, %v391_v62  ;;  %v285_v2 = vrot.slane %v284_v0, 4 }
  0xd1   : > { %v422_v6 = vadd.f32 %v421_v63, %v420_v61  ;;  %v335_v36 = vsub.s32 %v332_v27, %v266_v51 }
  0xd2   : > { %v413_v8 = vsel %vm283_vm1, %v411_v1, 0.0  ;;  %v272_v9 = vpop.permute.xlu0 %271  ;;  %v286_v10 = vadd.f32 %v285_v2, %v284_v0 }
  0xd3   : > { %v423_v11 = vrot.slane %v422_v6, 2  ;;  %v414_v12 = vrot.slane %v413_v8, 4  ;;  %v280_v13 = vrot.slane %v272_v9, %v267_v52 }
  0xd4   : > { %v287_v15 = vrot.slane %v286_v10, 2 }
  0xd5   : > { %v424_v17 = vadd.f32 %v423_v11, %v422_v6  ;;  %v415_v18 = vadd.f32 %v414_v12, %v413_v8  ;;  %v282_v19 = vmul.f32 %v280_v13, %v731_v4 }
  0xd6   : > { %v288_v20 = vadd.f32 %v287_v15, %v286_v10 }
  0xd7   : > { %v425_v21 = vrot.slane %v424_v17, 1  ;;  %v416_v22 = vrot.slane %v415_v18, 2  ;;  %v291_v23 = vsel %vm283_vm1, %v282_v19, 0.0 }
  0xd8   : > { %v292_v24 = vrot.slane %v291_v23, 4  ;;  %v289_v25 = vrot.slane %v288_v20, 1 }
  0xd9   : > { %v426_v28 = vadd.f32 %v425_v21, %v424_v17  ;;  %v417_v29 = vadd.f32 %v416_v22, %v415_v18 }
  0xda   : > { %v293_v30 = vadd.f32 %v292_v24, %v291_v23  ;;  %v290_v31 = vadd.f32 %v289_v25, %v288_v20 }
  0xdb   : > { %v428_v32 = vpack.c.bf16 %v426_v28, %v426_v28  ;;  %v418_v33 = vrot.slane %v417_v29, 1 }
  0xdc   : > { %v294_v34 = vrot.slane %v293_v30, 2  ;;  %v298_v35 = vpack.c.bf16 %v290_v31, %v290_v31 }
  0xdd   : > { %v451_v37 = vrot.slane %v428_v32, %v307_v26  ;;  %v419_v4 = vadd.f32 %v418_v33, %v417_v29 }
  0xde   : > { %v295_v38 = vadd.f32 %v294_v34, %v293_v30  ;;  %v308_v39 = vrot.slane %v298_v35, %v307_v26 }
  0xdf   : > { %v458_v40 = vrot.slane %v451_v37, %v307_v26  ;;  %v427_v41 = vpack.c.bf16 %v419_v4, %v419_v4 }
  0xe0   : > { %v296_v42 = vrot.slane %v295_v38, 1  ;;  %v315_v46 = vrot.slane %v308_v39, %v307_v26 }
  0xe1   : > { %v479_v43 = vrot.slane %v458_v40, %v335_v36  ;;  %v437_v44 = vrot.slane %v427_v41, %v307_v26 }
  0xe2   : > { %v297_v45 = vadd.f32 %v296_v42, %v295_v38  ;;  %v336_v54 = vrot.slane %v315_v46, %v335_v36 }
  0xe3   : > { %v444_v47 = vrot.slane %v437_v44, %v307_v26  ;;  %v486_v48 = vrot.slane %v479_v43, %v335_v36 }
  0xe4   : > { %v299_v49 = vpack.c.bf16 %v297_v45, %v297_v45  ;;  %v343_v59 = vrot.slane %v336_v54, %v335_v36 }
  0xe5   : > { %v465_v50 = vrot.slane %v444_v47, %v335_v36  ;;  %v488_v52 = vunpack.c.l.b16 %v486_v48 }
  0xe6   : > { %v322_v53 = vrot.slane %v299_v49, %v307_v26  ;;  %v358_v1 = vunpack.c.l.b16 %v343_v59 }
  0xe7   : > { %v472_v55 = vrot.slane %v465_v50, %v335_v36  ;;  %v489_v57 = vrot.slane %v488_v52, 7 }
  0xe8   : > { %v329_v51 = vrot.slane %v322_v53, %v307_v26 }
  0xe9   : > { %v487_v56 = vunpack.c.l.b16 %v472_v55 }
  0xea   : > { %v350_v58 = vrot.slane %v329_v51, %v335_v36 }
  0xeb   : > { %v490_v60 = vsel %vm361_vm2, %v489_v57, %v487_v56 }
  0xec   : > { %v491_v61 = vpack.c.b16 %v490_v60, %v490_v60  ;;  %v357_v62 = vrot.slane %v350_v58, %v335_v36 }
  0xee   : > { %v498_v63 = vrot.slane %v491_v61, %v307_v26  ;;  %v359_v0 = vunpack.c.l.b16 %v357_v62 }
  0xf0   : > { %v505_v2 = vrot.slane %v498_v63, %v307_v26  ;;  %v360_v3 = vrot.slane %v359_v0, 7 }
  0xf2   : > { %506 = vrot.lane.b32.xlu1 %v505_v2, %s686_s22  ;;  %v362_v5 = vsel %vm361_vm2, %v360_v3, %v358_v1 }
  0xf3   : > { %v363_v6 = vpack.c.b16 %v362_v5, %v362_v5 }
  0xf5   : > { %v370_v8 = vrot.slane %v363_v6, %v307_v26 }
  0xf7   : > { %v377_v9 = vrot.slane %v370_v8, %v307_v26 }
  0xf9   : > { %380 = vst.msk [vmem:[%s211_s25] sm:$0x1] %vm379_vm3, %v377_v9 }
 0x164   : > { %v507_v10 = vpop.permute.xlu1 %506 }
 0x165   : > { %510 = vst.msk [vmem:[%s211_s25] sm:$0x1] %vm509_vm4, %v507_v10 }
 0x166 PF: > { %s12_s11 = sadd.s32 1, %s678_s11   ;;  %s766_s9 = smov %s674_s10 }
 0x167   : > { %p9_p5 = scmp.ge.s32.totalorder %s12_s11, 4   ;;  %s767_s10 = smov %s769_s12 }
 0x169   :  { %11 = sbr.rel (!%p9_p5) target bundleno = 2 (0x2), region = 61 }

// kernel: model_forward.36
= control target key start
LH: loop header
LB: loop body
LE: loop exit
PB: predicated region body
PF: predicated region fallthrough
CT: control target
= control target key end

     0   :  { %vm25_vm0 = vcmask 523264   ;;  %v198_v0 = vmov 0.0   ;;  %vm199_vm1 = vmmov 0   ;;  %vm45_vm2 = vcmask 261120   ;;  %s201_s26 = smov 32   ;;  %s261_s1 = inlined_call_operand.vmem [shape: bf16[32,64], index: 1, kind: input, shape index: {}]   ;;  %s262_s0 = inlined_call_operand.vmem [shape: bf16[8,32], index: 0, kind: input, shape index: {}]   ;;  %s263_s2 = inlined_call_operand.vmem [shape: f32[1,64], index: 2, kind: input, shape index: {}]   ;;  %s264_s4 = inlined_call_operand.vmem [shape: f32[1,32], index: 4, kind: input, shape index: {}]   ;;  %s265_s3 = inlined_call_operand.vmem [shape: f32[1,32], index: 3, kind: input, shape index: {}]   ;;  %s266_s5 = inlined_call_operand.vmem [shape: bf16[8,64], index: 5, kind: output, shape index: {}]  }
   0x1   :  { %26 = vst.msk [vmem:[#allocation2] sm:$0xff] %vm25_vm0, %v198_v0  ;;  %180 = vmatprep.subr.bf16.mxu0 %v198_v0  ;;  %v192_v1 = vld [vmem:[%s261_s1] sm:$0xff]   ;;  %184 = vmatprep.mubr.msk.bf16.mxu0 %vm199_vm1, %v198_v0  ;;  %v193_v2 = vld [vmem:[%s261_s1 + $0x8] sm:$0xff]   ;;  %s200_s1 = smov 96   ;;  %vm165_vm3 = vcmask 519168  }
   0x2   :  { %181 = vmatpush3.bf16.msra.mxu0 %v192_v1  ;;  %v28_v3 = vld [vmem:[%s262_s0] sm:$0xf] }
   0x3   :  { %182 = vmatprep.subr.bf16.mxu0 %v198_v0  ;;  %v174_v10 = vld [vmem:[%s263_s2] ss:$0 sm:$0xff] }
   0x4   :  { %v176_v25 = vld [vmem:[%s264_s4] ss:$0 sm:$0xff] }
   0x5   :  { %v175_v28 = vld [vmem:[%s265_s3] ss:$0 sm:$0xff] }
   0x6   :  { %183 = vmatpush3.bf16.msra.mxu0 %v193_v2 }
   0x8   :  { %v27_v4 = vld [vmem:[#allocation2] sm:$0xff] }
   0x9   :  { %185 = vmatmul.mubr.msk.bf16.vlgmr.msra.gmra.mrb[0].mxu0 %vm45_vm2, %v28_v3 }
  0xdc   :  { %v83_v5 = vpop.f32.mrb[0].mxu0 }
  0xdd   :  { %v89_v6 = vadd.f32 %v83_v5, %v27_v4  ;;  %v186_v7 = vpop.f32.mrb[1].mxu0 }
  0xde   :  { %v86_v8 = vpop.f32.mrb[2].mxu0 }
  0xdf   :  { %91 = vst.msk [vmem:[#allocation2] sm:$0xff] %vm25_vm0, %v89_v6  ;;  %v187_v9 = vpop.f32.mrb[3].mxu0 }
  0xe6   :  { %v95_v11 = vld [vmem:[#allocation2] sm:$0xff] }
  0xe7   :  { %v103_v12 = vadd.f32 %v174_v10, %v95_v11 }
  0xe9   :  { %135 = vrot.lane.b32.xlu0 %v103_v12, %s200_s1  ;;  %v104_v13 = vsel %vm45_vm2, %v103_v12, 0.0 }
  0xea   :  { %105 = vadd.xlane.f32.xlu1 %v104_v13 }
 0x15b   :  { %v136_v14 = vpop.permute.xlu0 %135 }
 0x15c   :  { %v138_v15 = vsel %vm45_vm2, %v136_v14, 0.0 }
 0x15d   :  { %139 = vadd.xlane.f32.xlu0 %v138_v15 }
 0x177   :  { %v106_v20 = vpop.xlane.xlu1 %105 }
 0x178   :  { %v108_v21 = vmul.f32 0.03125, %v106_v20 }
 0x17a   :  { %v109_v22 = vsub.f32 %v103_v12, %v108_v21 }
 0x17c   :  { %v110_v23 = vmul.f32 %v109_v22, %v109_v22 }
 0x17e   :  { %v111_v24 = vsel %vm45_vm2, %v110_v23, 0.0 }
 0x1ea   :  { %v140_v16 = vpop.xlane.xlu0 %139 }
 0x1eb   :  { %v141_v17 = vmul.f32 0.03125, %v140_v16 }
 0x1ed   :  { %v142_v18 = vsub.f32 %v103_v12, %v141_v17 }
 0x1ef   :  { %v143_v19 = vmul.f32 %v142_v18, %v142_v18 }
 0x1f1   :  { %145 = vrot.lane.b32.xlu1 %v143_v19, %s200_s1 }
 0x215   :  { %112 = vadd.xlane.f32.xlu1 %v111_v24 }
 0x226   :  { %159 = vrot.lane.b32.xlu1 %v176_v25, %s201_s26 }
 0x263   :  { %v146_v26 = vpop.permute.xlu1 %145 }
 0x264   :  { %v148_v27 = vsel %vm45_vm2, %v146_v26, 0.0 }
 0x265   :  { %149 = vadd.xlane.f32.xlu0 %v148_v27 }
 0x27b   :  { %155 = vrot.lane.b32.xlu0 %v175_v28, %s201_s26 }
 0x2a2   :  { %v113_v29 = vpop.xlane.xlu1 %112 }
 0x2a3   :  { %v114_v30 = vmul.f32 0.03125, %v113_v29 }
 0x2a5   :  { %v115_v31 = vadd.f32 1e-05, %v114_v30 }
 0x2a6   :  { %v160_v41 = vpop.permute.xlu1 %159 }
 0x2a7   :  { %194 = vrsqrt.f32 %v115_v31 }
 0x2b1   :  { %v195_v35 = vpop.eup %194 }
 0x2b2   :  { %v117_v36 = vmul.f32 %v195_v35, %v109_v22 }
 0x2b4   :  { %v125_v40 = vmul.f32 %v175_v28, %v117_v36 }
 0x2b6   :  { %v133_v43 = vadd.f32 %v176_v25, %v125_v40 }
 0x2f2   :  { %v150_v32 = vpop.xlane.xlu0 %149 }
 0x2f3   :  { %v151_v33 = vmul.f32 0.03125, %v150_v32 }
 0x2f5   :  { %v152_v34 = vadd.f32 1e-05, %v151_v33 }
 0x2f6   :  { %v156_v38 = vpop.permute.xlu0 %155 }
 0x2f7   :  { %196 = vrsqrt.f32 %v152_v34 }
 0x301   :  { %v197_v37 = vpop.eup %196 }
 0x302   :  { %v154_v39 = vmul.f32 %v197_v37, %v142_v18 }
 0x304   :  { %v158_v42 = vmul.f32 %v156_v38, %v154_v39 }
 0x306   :  { %v162_v44 = vadd.f32 %v160_v41, %v158_v42 }
 0x308   :  { %v163_v45 = vsel %vm45_vm2, %v133_v43, %v162_v44 }
 0x309   :  { %v164_v46 = vpack.c.bf16 %v163_v45, %v163_v45 }
 0x30b   :  { %166 = vst.msk [vmem:[%s266_s5] sm:$0xf] %vm165_vm3, %v164_v46 }

// kernel: model_forward.32
= control target key start
LH: loop header
LB: loop body
LE: loop exit
PB: predicated region body
PF: predicated region fallthrough
CT: control target
= control target key end

     0   :  { %s158_s14 = smov 96   ;;  %vm18_vm0 = vcmask 261120   ;;  %s159_s16 = smov 32   ;;  %vm126_vm1 = vcmask 519168   ;;  %s205_s0 = inlined_call_operand.vmem [shape: bf16[16,64], index: 0, kind: input, shape index: {}]   ;;  %s206_s1 = inlined_call_operand.vmem [shape: f32[1,32], index: 1, kind: input, shape index: {}]   ;;  %s207_s2 = inlined_call_operand.vmem [shape: f32[1,32], index: 2, kind: input, shape index: {}]   ;;  %s208_s3 = inlined_call_operand.vmem [shape: bf16[16,64], index: 3, kind: output, shape index: {}]  }
   0x1   :  { %v140_v0 = vld [vmem:[%s205_s0] sm:$0xff]  }
   0x2   :  { %v141_v1 = vunpack.c.l.bf16 %v140_v0  ;;  %v142_v2 = vunpack.c.h.bf16 %v140_v0  ;;  %v133_v33 = vld [vmem:[%s206_s1] ss:$0 sm:$0xff] }
   0x3   :  { %v134_v34 = vld [vmem:[%s207_s2] ss:$0 sm:$0xff] }
   0x4   :  { %v145_v3 = vpack.i.bf16 %v142_v2, %v141_v1  ;;  %v19_v9 = vsel %vm18_vm0, %v141_v1, 0.0  ;;  %v22_v10 = vsel %vm18_vm0, %v142_v2, 0.0 }
   0x6   :  { %146 = vrot.lane.b32.xlu0 %v145_v3, %s158_s14 }
  0x78   :  { %v147_v4 = vpop.permute.xlu0 %146 }
  0x79   :  { %v148_v5 = vunpack.i.l.bf16 %v147_v4  ;;  %v149_v6 = vunpack.i.h.bf16 %v147_v4 }
  0x7b   :  { %v75_v7 = vsel %vm18_vm0, %v149_v6, 0.0  ;;  %v72_v8 = vsel %vm18_vm0, %v148_v5, 0.0 }
  0x7c   :  { %76 = vadd.xlane.f32.xlu1 %v75_v7  ;;  %73 = vadd.xlane.f32.xlu0 %v72_v8 }
  0x80   :  { %20 = vadd.xlane.f32.xlu1 %v19_v9 }
  0x84   :  { %23 = vadd.xlane.f32.xlu1 %v22_v10 }
 0x109   :  { %v77_v11 = vpop.xlane.xlu1 %76  ;;  %v74_v12 = vpop.xlane.xlu0 %73 }
 0x10a   :  { %v79_v13 = vmul.f32 0.03125, %v77_v11  ;;  %v78_v14 = vmul.f32 0.03125, %v74_v12 }
 0x10c   :  { %v80_v15 = vsub.f32 %v141_v1, %v78_v14  ;;  %v81_v17 = vsub.f32 %v142_v2, %v79_v13 }
 0x10d   :  { %v21_v16 = vpop.xlane.xlu1 %20 }
 0x10e   :  { %v82_v18 = vmul.f32 %v80_v15, %v80_v15  ;;  %v83_v21 = vmul.f32 %v81_v17, %v81_v17  ;;  %v26_v25 = vmul.f32 0.03125, %v21_v16 }
 0x110   :  { %86 = vrot.lane.b32.xlu1 %v82_v18, %s158_s14  ;;  %v28_v26 = vsub.f32 %v141_v1, %v26_v25 }
 0x111   :  { %v24_v19 = vpop.xlane.xlu1 %23 }
 0x112   :  { %v27_v20 = vmul.f32 0.03125, %v24_v19  ;;  %v30_v27 = vmul.f32 %v28_v26, %v28_v26 }
 0x114   :  { %v29_v22 = vsub.f32 %v142_v2, %v27_v20  ;;  %88 = vrot.lane.b32.xlu1 %v83_v21, %s158_s14  ;;  %v32_v28 = vsel %vm18_vm0, %v30_v27, 0.0 }
 0x116   :  { %v31_v23 = vmul.f32 %v29_v22, %v29_v22 }
 0x118   :  { %v35_v24 = vsel %vm18_vm0, %v31_v23, 0.0 }
 0x119   :  { %36 = vadd.xlane.f32.xlu0 %v35_v24 }
 0x138   :  { %33 = vadd.xlane.f32.xlu1 %v32_v28 }
 0x182   :  { %v87_v29 = vpop.permute.xlu1 %86 }
 0x183   :  { %v92_v30 = vsel %vm18_vm0, %v87_v29, 0.0 }
 0x184   :  { %93 = vadd.xlane.f32.xlu0 %v92_v30 }
 0x186   :  { %v89_v31 = vpop.permute.xlu1 %88 }
 0x187   :  { %v95_v32 = vsel %vm18_vm0, %v89_v31, 0.0 }
 0x188   :  { %96 = vadd.xlane.f32.xlu0 %v95_v32 }
 0x19e   :  { %106 = vrot.lane.b32.xlu0 %v133_v33, %s159_s16 }
 0x1a2   :  { %111 = vrot.lane.b32.xlu0 %v134_v34, %s159_s16 }
 0x1a6   :  { %v37_v35 = vpop.xlane.xlu0 %36 }
 0x1a7   :  { %v39_v36 = vmul.f32 0.03125, %v37_v35 }
 0x1a9   :  { %v41_v37 = vadd.f32 1e-05, %v39_v36 }
 0x1ab   :  { %150 = vrsqrt.f32 %v41_v37 }
 0x1b5   :  { %v151_v38 = vpop.eup %150 }
 0x1b6   :  { %v45_v39 = vmul.f32 %v151_v38, %v29_v22 }
 0x1b8   :  { %v54_v40 = vmul.f32 %v133_v33, %v45_v39 }
 0x1ba   :  { %v63_v41 = vadd.f32 %v134_v34, %v54_v40 }
 0x1c5   :  { %v34_v42 = vpop.xlane.xlu1 %33 }
 0x1c6   :  { %v38_v43 = vmul.f32 0.03125, %v34_v42 }
 0x1c8   :  { %v40_v44 = vadd.f32 1e-05, %v38_v43 }
 0x1ca   :  { %152 = vrsqrt.f32 %v40_v44 }
 0x1d4   :  { %v153_v45 = vpop.eup %152 }
 0x1d5   :  { %v44_v46 = vmul.f32 %v153_v45, %v28_v26 }
 0x1d7   :  { %v53_v47 = vmul.f32 %v133_v33, %v44_v46 }
 0x1d9   :  { %v62_v48 = vadd.f32 %v134_v34, %v53_v47 }
 0x211   :  { %v94_v49 = vpop.xlane.xlu0 %93 }
 0x212   :  { %v98_v50 = vmul.f32 0.03125, %v94_v49 }
 0x214   :  { %v100_v51 = vadd.f32 1e-05, %v98_v50 }
 0x215   :  { %v97_v52 = vpop.xlane.xlu0 %96 }
 0x216   :  { %154 = vrsqrt.f32 %v100_v51  ;;  %v99_v53 = vmul.f32 0.03125, %v97_v52 }
 0x218   :  { %v101_v54 = vadd.f32 1e-05, %v99_v53 }
 0x219   :  { %v107_v55 = vpop.permute.xlu0 %106 }
 0x21a   :  { %156 = vrsqrt.f32 %v101_v54 }
 0x21d   :  { %v112_v58 = vpop.permute.xlu0 %111 }
 0x220   :  { %v155_v56 = vpop.eup %154 }
 0x221   :  { %v104_v57 = vmul.f32 %v155_v56, %v80_v15 }
 0x223   :  { %v109_v59 = vmul.f32 %v107_v55, %v104_v57 }
 0x224   :  { %v157_v60 = vpop.eup %156 }
 0x225   :  { %v105_v61 = vmul.f32 %v157_v60, %v81_v17  ;;  %v114_v62 = vadd.f32 %v112_v58, %v109_v59 }
 0x227   :  { %v110_v63 = vmul.f32 %v107_v55, %v105_v61  ;;  %v116_v0 = vsel %vm18_vm0, %v62_v48, %v114_v62 }
 0x228   :  { %v137_v1 = vpack.c.bf16 %v116_v0, %v116_v0 }
 0x229   :  { %v115_v2 = vadd.f32 %v112_v58, %v110_v63 }
 0x22a   :  { %127 = vst.msk [vmem:[%s208_s3] sm:$0xf] %vm126_vm1, %v137_v1 }
 0x22b   :  { %v117_v3 = vsel %vm18_vm0, %v63_v41, %v115_v2 }
 0x22c   :  { %v138_v4 = vpack.c.bf16 %v117_v3, %v117_v3 }
 0x22e   :  { %128 = vst.msk [vmem:[%s208_s3 + $0x4] sm:$0xf] %vm126_vm1, %v138_v4 }

// kernel: model_forward.33
= control target key start
LH: loop header
LB: loop body
LE: loop exit
PB: predicated region body
PF: predicated region fallthrough
CT: control target
= control target key end

     0   :  { %vm25_vm0 = vcmask 523264   ;;  %v199_v0 = vmov 0.0   ;;  %vm200_vm1 = vmmov 0   ;;  %vm46_vm2 = vcmask 261120   ;;  %s202_s26 = smov 32   ;;  %s262_s1 = inlined_call_operand.vmem [shape: bf16[32,64], index: 1, kind: input, shape index: {}]   ;;  %s263_s0 = inlined_call_operand.vmem [shape: f32[8,32], index: 0, kind: input, shape index: {}]   ;;  %s264_s2 = inlined_call_operand.vmem [shape: f32[1,64], index: 2, kind: input, shape index: {}]   ;;  %s265_s4 = inlined_call_operand.vmem [shape: f32[1,32], index: 4, kind: input, shape index: {}]   ;;  %s266_s3 = inlined_call_operand.vmem [shape: f32[1,32], index: 3, kind: input, shape index: {}]   ;;  %s267_s5 = inlined_call_operand.vmem [shape: bf16[8,64], index: 5, kind: output, shape index: {}]  }
   0x1   :  { %26 = vst.msk [vmem:[#allocation2] sm:$0xff] %vm25_vm0, %v199_v0  ;;  %181 = vmatprep.subr.bf16.mxu0 %v199_v0  ;;  %v193_v1 = vld [vmem:[%s262_s1] sm:$0xff]   ;;  %185 = vmatprep.mubr.msk.bf16.mxu0 %vm200_vm1, %v199_v0  ;;  %v194_v2 = vld [vmem:[%s262_s1 + $0x8] sm:$0xff]   ;;  %vm166_vm3 = vcmask 519168  }
   0x2   :  { %182 = vmatpush3.bf16.msra.mxu0 %v193_v1  ;;  %v28_v3 = vld [vmem:[%s263_s0] sm:$0xff]  ;;  %s201_s0 = smov 96  }
   0x3   :  { %183 = vmatprep.subr.bf16.mxu0 %v199_v0  ;;  %v29_v4 = vpack.c.bf16 %v28_v3, %v28_v3  ;;  %v175_v11 = vld [vmem:[%s264_s2] ss:$0 sm:$0xff] }
   0x4   :  { %v177_v26 = vld [vmem:[%s265_s4] ss:$0 sm:$0xff] }
   0x5   :  { %v176_v29 = vld [vmem:[%s266_s3] ss:$0 sm:$0xff] }
   0x6   :  { %184 = vmatpush3.bf16.msra.mxu0 %v194_v2 }
   0x8   :  { %v27_v5 = vld [vmem:[#allocation2] sm:$0xff] }
   0x9   :  { %186 = vmatmul.mubr.msk.bf16.vlgmr.msra.gmra.mrb[0].mxu0 %vm46_vm2, %v29_v4 }
  0xdc   :  { %v84_v6 = vpop.f32.mrb[0].mxu0 }
  0xdd   :  { %v90_v7 = vadd.f32 %v84_v6, %v27_v5  ;;  %v187_v8 = vpop.f32.mrb[1].mxu0 }
  0xde   :  { %v87_v9 = vpop.f32.mrb[2].mxu0 }
  0xdf   :  { %92 = vst.msk [vmem:[#allocation2] sm:$0xff] %vm25_vm0, %v90_v7  ;;  %v188_v10 = vpop.f32.mrb[3].mxu0 }
  0xe6   :  { %v96_v12 = vld [vmem:[#allocation2] sm:$0xff] }
  0xe7   :  { %v104_v13 = vadd.f32 %v175_v11, %v96_v12 }
  0xe9   :  { %136 = vrot.lane.b32.xlu0 %v104_v13, %s201_s0  ;;  %v105_v14 = vsel %vm46_vm2, %v104_v13, 0.0 }
  0xea   :  { %106 = vadd.xlane.f32.xlu1 %v105_v14 }
 0x15b   :  { %v137_v15 = vpop.permute.xlu0 %136 }
 0x15c   :  { %v139_v16 = vsel %vm46_vm2, %v137_v15, 0.0 }
 0x15d   :  { %140 = vadd.xlane.f32.xlu0 %v139_v16 }
 0x177   :  { %v107_v21 = vpop.xlane.xlu1 %106 }
 0x178   :  { %v109_v22 = vmul.f32 0.03125, %v107_v21 }
 0x17a   :  { %v110_v23 = vsub.f32 %v104_v13, %v109_v22 }
 0x17c   :  { %v111_v24 = vmul.f32 %v110_v23, %v110_v23 }
 0x17e   :  { %v112_v25 = vsel %vm46_vm2, %v111_v24, 0.0 }
 0x1ea   :  { %v141_v17 = vpop.xlane.xlu0 %140 }
 0x1eb   :  { %v142_v18 = vmul.f32 0.03125, %v141_v17 }
 0x1ed   :  { %v143_v19 = vsub.f32 %v104_v13, %v142_v18 }
 0x1ef   :  { %v144_v20 = vmul.f32 %v143_v19, %v143_v19 }
 0x1f1   :  { %146 = vrot.lane.b32.xlu1 %v144_v20, %s201_s0 }
 0x215   :  { %113 = vadd.xlane.f32.xlu1 %v112_v25 }
 0x226   :  { %160 = vrot.lane.b32.xlu1 %v177_v26, %s202_s26 }
 0x263   :  { %v147_v27 = vpop.permute.xlu1 %146 }
 0x264   :  { %v149_v28 = vsel %vm46_vm2, %v147_v27, 0.0 }
 0x265   :  { %150 = vadd.xlane.f32.xlu0 %v149_v28 }
 0x27b   :  { %156 = vrot.lane.b32.xlu0 %v176_v29, %s202_s26 }
 0x2a2   :  { %v114_v30 = vpop.xlane.xlu1 %113 }
 0x2a3   :  { %v115_v31 = vmul.f32 0.03125, %v114_v30 }
 0x2a5   :  { %v116_v32 = vadd.f32 1e-05, %v115_v31 }
 0x2a6   :  { %v161_v42 = vpop.permute.xlu1 %160 }
 0x2a7   :  { %195 = vrsqrt.f32 %v116_v32 }
 0x2b1   :  { %v196_v36 = vpop.eup %195 }
 0x2b2   :  { %v118_v37 = vmul.f32 %v196_v36, %v110_v23 }
 0x2b4   :  { %v126_v41 = vmul.f32 %v176_v29, %v118_v37 }
 0x2b6   :  { %v134_v44 = vadd.f32 %v177_v26, %v126_v41 }
 0x2f2   :  { %v151_v33 = vpop.xlane.xlu0 %150 }
 0x2f3   :  { %v152_v34 = vmul.f32 0.03125, %v151_v33 }
 0x2f5   :  { %v153_v35 = vadd.f32 1e-05, %v152_v34 }
 0x2f6   :  { %v157_v39 = vpop.permute.xlu0 %156 }
 0x2f7   :  { %197 = vrsqrt.f32 %v153_v35 }
 0x301   :  { %v198_v38 = vpop.eup %197 }
 0x302   :  { %v155_v40 = vmul.f32 %v198_v38, %v143_v19 }
 0x304   :  { %v159_v43 = vmul.f32 %v157_v39, %v155_v40 }
 0x306   :  { %v163_v45 = vadd.f32 %v161_v42, %v159_v43 }
 0x308   :  { %v164_v46 = vsel %vm46_vm2, %v134_v44, %v163_v45 }
 0x309   :  { %v165_v47 = vpack.c.bf16 %v164_v46, %v164_v46 }
 0x30b   :  { %167 = vst.msk [vmem:[%s267_s5] sm:$0xf] %vm166_vm3, %v165_v47 }

// kernel: model_forward.43
= control target key start
LH: loop header
LB: loop body
LE: loop exit
PB: predicated region body
PF: predicated region fallthrough
CT: control target
= control target key end

     0   :  { %vm28_vm0 = vcmask 261120   ;;  %v201_v0 = vmov 0.0   ;;  %vm202_vm1 = vmmov 0   ;;  %s279_s1 = inlined_call_operand.vmem [shape: bf16[32,32], index: 1, kind: input, shape index: {}]   ;;  %s280_s0 = inlined_call_operand.vmem [shape: bf16[16,32], index: 0, kind: input, shape index: {}]   ;;  %s281_s2 = inlined_call_operand.vmem [shape: f32[1,32], index: 2, kind: input, shape index: {}]   ;;  %s282_s3 = inlined_call_operand.vmem [shape: f32[16,32], index: 3, kind: input, shape index: {}]   ;;  %s283_s4 = inlined_call_operand.vmem [shape: f32[1,32], index: 4, kind: input, shape index: {}]   ;;  %s284_s5 = inlined_call_operand.vmem [shape: f32[1,32], index: 5, kind: input, shape index: {}]   ;;  %s285_s6 = inlined_call_operand.vmem [shape: f32[16,32], index: 6, kind: output, shape index: {}]  }
   0x1   :  { %184 = vmatprep.subr.bf16.mxu0 %v201_v0  ;;  %v194_v1 = vld [vmem:[%s279_s1] sm:$0xff]   ;;  %188 = vmatprep.mubr.msk.bf16.mxu0 %vm202_vm1, %v201_v0  ;;  %29 = vst.msk [vmem:[#allocation2] sm:$0xff] %vm28_vm0, %v201_v0  ;;  %30 = vst.msk [vmem:[#allocation2 + $0x8] sm:$0xff] %vm28_vm0, %v201_v0  ;;  %v195_v2 = vld [vmem:[%s279_s1 + $0x8] sm:$0xff]  }
   0x2   :  { %185 = vmatpush3.bf16.msra.mxu0 %v194_v1  ;;  %v196_v3 = vld [vmem:[%s280_s0] sm:$0xff]   ;;  %v120_v17 = vld [vmem:[%s282_s3 + $0x8] sm:$0xff] }
   0x3   :  { %186 = vmatprep.subr.bf16.mxu0 %v201_v0  ;;  %v178_v12 = vld [vmem:[%s281_s2] ss:$0 sm:$0xff] }
   0x4   :  { %v119_v14 = vld [vmem:[%s282_s3] sm:$0xff] }
   0x5   :  { %v179_v40 = vld [vmem:[%s283_s4] ss:$0 sm:$0xff] }
   0x6   :  { %187 = vmatpush3.bf16.msra.mxu0 %v195_v2  ;;  %v180_v42 = vld [vmem:[%s284_s5] ss:$0 sm:$0xff] }
   0x8   :  { %v31_v4 = vld [vmem:[#allocation2] sm:$0xff]  ;;  %v32_v6 = vld [vmem:[#allocation2 + $0x8] sm:$0xff] }
   0x9   :  { %189 = vmatmul.mubr.msk.bf16.vlgmr.msra.gmra.mrb[0].mxu0 %vm28_vm0, %v196_v3 }
  0xdc   :  { %v94_v5 = vpop.f32.mrb[0].mxu0 }
  0xdd   :  { %v101_v7 = vadd.f32 %v94_v5, %v31_v4  ;;  %v190_v8 = vpop.f32.mrb[1].mxu0 }
  0xde   :  { %v97_v9 = vpop.f32.mrb[2].mxu0 }
  0xdf   :  { %103 = vst.msk [vmem:[#allocation2] sm:$0xff] %vm28_vm0, %v101_v7  ;;  %v102_v10 = vadd.f32 %v97_v9, %v32_v6  ;;  %v191_v11 = vpop.f32.mrb[3].mxu0 }
  0xe1   :  { %104 = vst.msk [vmem:[#allocation2 + $0x8] sm:$0xff] %vm28_vm0, %v102_v10 }
  0xe6   :  { %v108_v13 = vld [vmem:[#allocation2] sm:$0xff] }
  0xe7   :  { %v117_v15 = vadd.f32 %v178_v12, %v108_v13 }
  0xe8   :  { %v109_v16 = vld [vmem:[#allocation2 + $0x8] sm:$0xff] }
  0xe9   :  { %v121_v18 = vadd.f32 %v119_v14, %v117_v15  ;;  %v118_v19 = vadd.f32 %v178_v12, %v109_v16 }
  0xeb   :  { %v123_v20 = vsel %vm28_vm0, %v121_v18, 0.0  ;;  %v122_v21 = vadd.f32 %v120_v17, %v118_v19 }
  0xec   :  { %124 = vadd.xlane.f32.xlu0 %v123_v20 }
  0xed   :  { %v126_v22 = vsel %vm28_vm0, %v122_v21, 0.0 }
  0xf0   :  { %127 = vadd.xlane.f32.xlu0 %v126_v22 }
 0x179   :  { %v125_v23 = vpop.xlane.xlu0 %124 }
 0x17a   :  { %v130_v24 = vmul.f32 0.03125, %v125_v23 }
 0x17c   :  { %v132_v25 = vsub.f32 %v121_v18, %v130_v24 }
 0x17d   :  { %v128_v26 = vpop.xlane.xlu0 %127 }
 0x17e   :  { %v131_v27 = vmul.f32 0.03125, %v128_v26  ;;  %v134_v28 = vmul.f32 %v132_v25, %v132_v25 }
 0x180   :  { %v133_v29 = vsub.f32 %v122_v21, %v131_v27  ;;  %v136_v30 = vsel %vm28_vm0, %v134_v28, 0.0 }
 0x181   :  { %137 = vadd.xlane.f32.xlu1 %v136_v30 }
 0x182   :  { %v135_v31 = vmul.f32 %v133_v29, %v133_v29 }
 0x184   :  { %v139_v32 = vsel %vm28_vm0, %v135_v31, 0.0 }
 0x185   :  { %140 = vadd.xlane.f32.xlu1 %v139_v32 }
 0x20e   :  { %v138_v33 = vpop.xlane.xlu1 %137 }
 0x20f   :  { %v142_v34 = vmul.f32 0.03125, %v138_v33 }
 0x211   :  { %v144_v35 = vadd.f32 1e-05, %v142_v34 }
 0x212   :  { %v141_v36 = vpop.xlane.xlu1 %140 }
 0x213   :  { %197 = vrsqrt.f32 %v144_v35  ;;  %v143_v37 = vmul.f32 0.03125, %v141_v36 }
 0x215   :  { %v145_v38 = vadd.f32 1e-05, %v143_v37 }
 0x217   :  { %199 = vrsqrt.f32 %v145_v38 }
 0x21d   :  { %v198_v39 = vpop.eup %197 }
 0x21e   :  { %v148_v41 = vmul.f32 %v198_v39, %v132_v25 }
 0x220   :  { %v157_v43 = vmul.f32 %v179_v40, %v148_v41 }
 0x221   :  { %v200_v44 = vpop.eup %199 }
 0x222   :  { %v166_v45 = vadd.f32 %v180_v42, %v157_v43  ;;  %v149_v46 = vmul.f32 %v200_v44, %v133_v29 }
 0x224   :  { %168 = vst.msk [vmem:[%s285_s6] sm:$0xff] %vm28_vm0, %v166_v45  ;;  %v158_v47 = vmul.f32 %v179_v40, %v149_v46 }
 0x226   :  { %v167_v48 = vadd.f32 %v180_v42, %v158_v47 }
 0x228   :  { %169 = vst.msk [vmem:[%s285_s6 + $0x8] sm:$0xff] %vm28_vm0, %v167_v48 }

// kernel: model_forward.44
= control target key start
LH: loop header
LB: loop body
LE: loop exit
PB: predicated region body
PF: predicated region fallthrough
CT: control target
= control target key end

     0   :  { %vm19_vm0 = vcmask 523264   ;;  %v167_v0 = vmov 0.0   ;;  %vm168_vm1 = vmmov 0   ;;  %vm43_vm2 = vcmask 261120   ;;  %s214_s1 = inlined_call_operand.vmem [shape: bf16[32,64], index: 1, kind: input, shape index: {}]   ;;  %s215_s0 = inlined_call_operand.vmem [shape: f32[16,32], index: 0, kind: input, shape index: {}]   ;;  %s216_s2 = inlined_call_operand.vmem [shape: f32[1,64], index: 2, kind: input, shape index: {}]   ;;  %s217_s3 = inlined_call_operand.vmem [shape: bf16[16,64], index: 3, kind: output, shape index: {}]  }
   0x1   :  { %151 = vmatprep.subr.bf16.mxu0 %v167_v0  ;;  %v161_v1 = vld [vmem:[%s214_s1] sm:$0xff]   ;;  %155 = vmatprep.mubr.msk.bf16.mxu0 %vm168_vm1, %v167_v0  ;;  %20 = vst.msk [vmem:[#allocation2] sm:$0xff] %vm19_vm0, %v167_v0  ;;  %21 = vst.msk [vmem:[#allocation2 + $0x8] sm:$0xff] %vm19_vm0, %v167_v0  ;;  %v162_v2 = vld [vmem:[%s214_s1 + $0x8] sm:$0xff]   ;;  %vm133_vm3 = vcmask 519168  }
   0x2   :  { %152 = vmatpush3.bf16.msra.mxu0 %v161_v1  ;;  %v24_v3 = vld [vmem:[%s215_s0] sm:$0xff]  ;;  %v25_v4 = vld [vmem:[%s215_s0 + $0x8] sm:$0xff] }
   0x3   :  { %153 = vmatprep.subr.bf16.mxu0 %v167_v0  ;;  %v26_v5 = vpack.c.bf16 %v25_v4, %v24_v3  ;;  %v143_v14 = vld [vmem:[%s216_s2] ss:$0 sm:$0xff] }
   0x6   :  { %154 = vmatpush3.bf16.msra.mxu0 %v162_v2 }
   0x8   :  { %v22_v6 = vld [vmem:[#allocation2] sm:$0xff]  ;;  %v23_v8 = vld [vmem:[#allocation2 + $0x8] sm:$0xff] }
   0x9   :  { %156 = vmatmul.mubr.msk.bf16.vlgmr.msra.gmra.mrb[0].mxu0 %vm43_vm2, %v26_v5 }
  0xdc   :  { %v81_v7 = vpop.f32.mrb[0].mxu0 }
  0xdd   :  { %v88_v9 = vadd.f32 %v81_v7, %v22_v6  ;;  %v157_v10 = vpop.f32.mrb[1].mxu0 }
  0xde   :  { %v84_v11 = vpop.f32.mrb[2].mxu0 }
  0xdf   :  { %91 = vst.msk [vmem:[#allocation2] sm:$0xff] %vm19_vm0, %v88_v9  ;;  %v89_v12 = vadd.f32 %v84_v11, %v23_v8  ;;  %v158_v13 = vpop.f32.mrb[3].mxu0 }
  0xe1   :  { %92 = vst.msk [vmem:[#allocation2 + $0x8] sm:$0xff] %vm19_vm0, %v89_v12 }
  0xe6   :  { %v96_v15 = vld [vmem:[#allocation2] sm:$0xff] }
  0xe7   :  { %v105_v16 = vadd.f32 %v143_v14, %v96_v15 }
  0xe8   :  { %v97_v17 = vld [vmem:[#allocation2 + $0x8] sm:$0xff] }
  0xe9   :  { %v109_v18 = vmul.f32 0.044715, %v105_v16  ;;  %v106_v19 = vadd.f32 %v143_v14, %v97_v17  ;;  %v107_v30 = vmul.f32 0.5, %v105_v16 }
  0xeb   :  { %v111_v20 = vmul.f32 %v109_v18, %v105_v16  ;;  %v110_v21 = vmul.f32 0.044715, %v106_v19  ;;  %v108_v34 = vmul.f32 0.5, %v106_v19 }
  0xed   :  { %v113_v22 = vmul.f32 %v111_v20, %v105_v16  ;;  %v112_v23 = vmul.f32 %v110_v21, %v106_v19 }
  0xef   :  { %v115_v24 = vadd.f32 %v113_v22, %v105_v16  ;;  %v114_v25 = vmul.f32 %v112_v23, %v106_v19 }
  0xf1   :  { %v117_v26 = vmul.f32 0.7978846, %v115_v24  ;;  %v116_v27 = vadd.f32 %v114_v25, %v106_v19 }
  0xf3   :  { %163 = vtanh.f32 %v117_v26  ;;  %v118_v28 = vmul.f32 0.7978846, %v116_v27 }
  0xf5   :  { %165 = vtanh.f32 %v118_v28 }
  0xfd   :  { %v164_v29 = vpop.eup %163 }
  0xfe   :  { %v121_v31 = vadd.f32 1.0, %v164_v29 }
  0xff   :  { %v166_v32 = vpop.eup %165 }
 0x100   :  { %v123_v33 = vmul.f32 %v121_v31, %v107_v30  ;;  %v122_v35 = vadd.f32 1.0, %v166_v32 }
 0x102   :  { %v146_v36 = vpack.c.bf16 %v123_v33, %v123_v33  ;;  %v124_v37 = vmul.f32 %v122_v35, %v108_v34 }
 0x104   :  { %134 = vst.msk [vmem:[%s217_s3] sm:$0xf] %vm133_vm3, %v146_v36  ;;  %v147_v38 = vpack.c.bf16 %v124_v37, %v124_v37 }
 0x106   :  { %135 = vst.msk [vmem:[%s217_s3 + $0x4] sm:$0xf] %vm133_vm3, %v147_v38 }

// kernel: model_forward.45
= control target key start
LH: loop header
LB: loop body
LE: loop exit
PB: predicated region body
PF: predicated region fallthrough
CT: control target
= control target key end

     0   :  { %vm28_vm0 = vcmask 261120   ;;  %v228_v0 = vmov 0.0   ;;  %vm229_vm1 = vmmov 0   ;;  %vm72_vm2 = vcmask 523264   ;;  %s311_s1 = inlined_call_operand.vmem [shape: bf16[64,32], index: 1, kind: input, shape index: {}]   ;;  %s312_s0 = inlined_call_operand.vmem [shape: bf16[16,64], index: 0, kind: input, shape index: {}]   ;;  %s313_s2 = inlined_call_operand.vmem [shape: f32[1,32], index: 2, kind: input, shape index: {}]   ;;  %s314_s3 = inlined_call_operand.vmem [shape: f32[16,32], index: 3, kind: input, shape index: {}]   ;;  %s315_s4 = inlined_call_operand.vmem [shape: f32[1,32], index: 4, kind: input, shape index: {}]   ;;  %s316_s5 = inlined_call_operand.vmem [shape: f32[1,32], index: 5, kind: input, shape index: {}]   ;;  %s317_s6 = inlined_call_operand.vmem [shape: f32[16,32], index: 6, kind: output, shape index: {}]  }
   0x1   :  { %205 = vmatprep.subr.bf16.mxu0 %v228_v0  ;;  %v219_v1 = vld [vmem:[%s311_s1] sm:$0xff]   ;;  %213 = vmatprep.mubr.msk.bf16.mxu0 %vm229_vm1, %v228_v0  ;;  %29 = vst.msk [vmem:[#allocation2] sm:$0xff] %vm28_vm0, %v228_v0  ;;  %30 = vst.msk [vmem:[#allocation2 + $0x8] sm:$0xff] %vm28_vm0, %v228_v0  ;;  %v220_v2 = vld [vmem:[%s311_s1 + $0x8] sm:$0xff]  }
   0x2   :  { %206 = vmatpush3.bf16.msra.mxu0 %v219_v1  ;;  %v221_v3 = vld [vmem:[%s311_s1 + $0x10] sm:$0xff]   ;;  %v222_v4 = vld [vmem:[%s311_s1 + $0x18] sm:$0xff]   ;;  %v223_v5 = vld [vmem:[%s312_s0] sm:$0xff]  }
   0x3   :  { %207 = vmatprep.subr.bf16.mxu0 %v228_v0  ;;  %v197_v14 = vld [vmem:[%s313_s2] ss:$0 sm:$0xff]  ;;  %v137_v19 = vld [vmem:[%s314_s3 + $0x8] sm:$0xff] }
   0x4   :  { %v136_v16 = vld [vmem:[%s314_s3] sm:$0xff] }
   0x5   :  { %v198_v42 = vld [vmem:[%s315_s4] ss:$0 sm:$0xff] }
   0x6   :  { %208 = vmatpush3.bf16.msra.mxu0 %v220_v2  ;;  %v199_v44 = vld [vmem:[%s316_s5] ss:$0 sm:$0xff] }
   0x7   :  { %209 = vmatprep.subr.bf16.mxu0 %v228_v0 }
   0x8   :  { %v31_v6 = vld [vmem:[#allocation2] sm:$0xff]  ;;  %v32_v8 = vld [vmem:[#allocation2 + $0x8] sm:$0xff] }
   0xa   :  { %210 = vmatpush3.bf16.msra.mxu0 %v221_v3 }
   0xb   :  { %211 = vmatprep.subr.bf16.mxu0 %v228_v0 }
   0xe   :  { %212 = vmatpush3.bf16.msra.mxu0 %v222_v4 }
  0x11   :  { %214 = vmatmul.mubr.msk.bf16.vlgmr.msra.gmra.mrb[0].mxu0 %vm72_vm2, %v223_v5 }
  0xe4   :  { %v110_v7 = vpop.f32.mrb[0].mxu0 }
  0xe5   :  { %v117_v9 = vadd.f32 %v110_v7, %v31_v6  ;;  %v215_v10 = vpop.f32.mrb[1].mxu0 }
  0xe6   :  { %v113_v11 = vpop.f32.mrb[2].mxu0 }
  0xe7   :  { %120 = vst.msk [vmem:[#allocation2] sm:$0xff] %vm28_vm0, %v117_v9  ;;  %v118_v12 = vadd.f32 %v113_v11, %v32_v8  ;;  %v216_v13 = vpop.f32.mrb[3].mxu0 }
  0xe9   :  { %121 = vst.msk [vmem:[#allocation2 + $0x8] sm:$0xff] %vm28_vm0, %v118_v12 }
  0xee   :  { %v125_v15 = vld [vmem:[#allocation2] sm:$0xff] }
  0xef   :  { %v134_v17 = vadd.f32 %v197_v14, %v125_v15 }
  0xf0   :  { %v126_v18 = vld [vmem:[#allocation2 + $0x8] sm:$0xff] }
  0xf1   :  { %v138_v20 = vadd.f32 %v136_v16, %v134_v17  ;;  %v135_v21 = vadd.f32 %v197_v14, %v126_v18 }
  0xf3   :  { %v140_v22 = vsel %vm28_vm0, %v138_v20, 0.0  ;;  %v139_v23 = vadd.f32 %v137_v19, %v135_v21 }
  0xf4   :  { %141 = vadd.xlane.f32.xlu0 %v140_v22 }
  0xf5   :  { %v143_v24 = vsel %vm28_vm0, %v139_v23, 0.0 }
  0xf8   :  { %144 = vadd.xlane.f32.xlu0 %v143_v24 }
 0x181   :  { %v142_v25 = vpop.xlane.xlu0 %141 }
 0x182   :  { %v147_v26 = vmul.f32 0.03125, %v142_v25 }
 0x184   :  { %v149_v27 = vsub.f32 %v138_v20, %v147_v26 }
 0x185   :  { %v145_v28 = vpop.xlane.xlu0 %144 }
 0x186   :  { %v148_v29 = vmul.f32 0.03125, %v145_v28  ;;  %v151_v30 = vmul.f32 %v149_v27, %v149_v27 }
 0x188   :  { %v150_v31 = vsub.f32 %v139_v23, %v148_v29  ;;  %v153_v32 = vsel %vm28_vm0, %v151_v30, 0.0 }
 0x189   :  { %154 = vadd.xlane.f32.xlu1 %v153_v32 }
 0x18a   :  { %v152_v33 = vmul.f32 %v150_v31, %v150_v31 }
 0x18c   :  { %v156_v34 = vsel %vm28_vm0, %v152_v33, 0.0 }
 0x18d   :  { %157 = vadd.xlane.f32.xlu1 %v156_v34 }
 0x216   :  { %v155_v35 = vpop.xlane.xlu1 %154 }
 0x217   :  { %v159_v36 = vmul.f32 0.03125, %v155_v35 }
 0x219   :  { %v161_v37 = vadd.f32 1e-05, %v159_v36 }
 0x21a   :  { %v158_v38 = vpop.xlane.xlu1 %157 }
 0x21b   :  { %224 = vrsqrt.f32 %v161_v37  ;;  %v160_v39 = vmul.f32 0.03125, %v158_v38 }
 0x21d   :  { %v162_v40 = vadd.f32 1e-05, %v160_v39 }
 0x21f   :  { %226 = vrsqrt.f32 %v162_v40 }
 0x225   :  { %v225_v41 = vpop.eup %224 }
 0x226   :  { %v165_v43 = vmul.f32 %v225_v41, %v149_v27 }
 0x228   :  { %v174_v45 = vmul.f32 %v198_v42, %v165_v43 }
 0x229   :  { %v227_v46 = vpop.eup %226 }
 0x22a   :  { %v183_v47 = vadd.f32 %v199_v44, %v174_v45  ;;  %v166_v48 = vmul.f32 %v227_v46, %v150_v31 }
 0x22c   :  { %185 = vst.msk [vmem:[%s317_s6] sm:$0xff] %vm28_vm0, %v183_v47  ;;  %v175_v49 = vmul.f32 %v198_v42, %v166_v48 }
 0x22e   :  { %v184_v50 = vadd.f32 %v199_v44, %v175_v49 }
 0x230   :  { %186 = vst.msk [vmem:[%s317_s6 + $0x8] sm:$0xff] %vm28_vm0, %v184_v50 }

// kernel: model_forward.42
= control target key start
LH: loop header
LB: loop body
LE: loop exit
PB: predicated region body
PF: predicated region fallthrough
CT: control target
= control target key end

     0   :  { %s1986_s13 = smov 0   ;;  %s1988_s14 = smov 0   ;;  %s2258_s0 = inlined_call_operand.vmem [shape: bf16[2,8,32], index: 0, kind: input, shape index: {}]   ;;  %s2259_s1 = inlined_call_operand.vmem [shape: bf16[2,16,32], index: 1, kind: input, shape index: {}, may-alias: {1,2}]   ;;  %s2260_s2 = inlined_call_operand.vmem [shape: bf16[2,16,32], index: 2, kind: input, shape index: {}, may-alias: {1,2}]   ;;  %s2261_s3 = inlined_call_operand.vmem [shape: bf16[2,16,32], index: 3, kind: input, shape index: {}, may-alias: {3,4}]   ;;  %s2262_s4 = inlined_call_operand.vmem [shape: bf16[2,16,32], index: 4, kind: input, shape index: {}, may-alias: {3,4}]   ;;  %s2263_s5 = inlined_call_operand.vmem [shape: bf16[2,4,32], index: 5, kind: input, shape index: {}]   ;;  %s2264_s6 = inlined_call_operand.vmem [shape: bf16[2,4,32], index: 6, kind: input, shape index: {}]   ;;  %s2265_s7 = inlined_call_operand.vmem [shape: bf16[2,8,8], index: 7, kind: input, shape index: {}]   ;;  %s2266_s8 = inlined_call_operand.vmem [shape: bf16[32,4], index: 8, kind: input, shape index: {}]   ;;  %s2267_s9 = inlined_call_operand.vmem [shape: f32[1,32], index: 9, kind: input, shape index: {}]   ;;  %s2268_s10 = inlined_call_operand.vmem [shape: bf16[2,8,32], index: 10, kind: output, shape index: {}]  }
   0x1   :  { %s1990_s15 = smov 0  }
   0x2 LB: > { %s32_s16 = sadd.s32 1, %s1914_s14  ;;  %p1653_p0 = scmp.ge.s32.totalorder %s1918_s15, 1  ;;  %s1918_s15 = sphi %s1990_s15, %s20_s15   ;;  %s1914_s14 = sphi %s1988_s14, %s2272_s14   ;;  %s1910_s13 = sphi %s1986_s13, %s2271_s13  }
   0x3   : > { %p34_p1 = scmp.ge.s32.totalorder %s32_s16, 2  ;;  %p430_p2 = scmp.lt.s32.totalorder %s1918_s15, 3 }
   0x5   : > { %s2274_s16 = smov (%p34_p1, %s32_s16), 0  ;;  %p431_p3 = pnand %p1653_p0, %p430_p2 }
   0x6   : > { %v1873_v0 = vld [vmem:[%s2266_s8] sm:$0xff] (!%p431_p3)   ;;  %v1920_v1 = vmov (!%p431_p3), 0.0   ;;  %p521_p4 = scmp.lt.s32.totalorder (!%p431_p3), %s1910_s13, 1  ;;  %vm1921_vm0 = vmmov (!%p431_p3), 0   ;;  %v1922_v2 = vmov (!%p431_p3), 2   ;;  %v1923_v3 = vmov (!%p431_p3), 0  }
   0x7   : > { %434 = sbr.rel (%p431_p3) target bundleno = 1425 (0x591), region = 60  ;;  %1730 = vmatprep.subr.bf16.mxu0 (!%p431_p3), %v1920_v1  ;;  %1748 = vmatprep.subr.bf16.mxu1 (!%p431_p3), %v1920_v1  ;;  %v1668_v5 = vld [vmem:[%s2267_s9] ss:$0 sm:$0xff] (!%p431_p3)  ;;  %vm628_vm1 = vcmask (!%p431_p3), 130048   ;;  %v1924_v19 = vmov (!%p431_p3), 3   ;;  %v1925_v20 = vmov (!%p431_p3), 1   ;;  %v600_v30 = vlaneseq (!%p431_p3) }
   0x8   : > { %1731 = vmatpush3.bf16.msra.mxu0 (!%p431_p3), %v1873_v0  ;;  %1732 = vmatprep.mubr.msk.bf16.mxu0 (!%p431_p3), %vm1921_vm0, %v1920_v1  ;;  %v1874_v25 = vld [vmem:[%s2266_s8 + $0x8] sm:$0xff] (!%p431_p3)   ;;  %vm835_vm9 = vcmask (!%p431_p3), 64512   ;;  %v1928_v55 = vmov (!%p431_p3), 1983009808   ;;  %vm843_vm10 = vcmask (!%p431_p3), 31744   ;;  %vm873_vm11 = vcmask (!%p431_p3), 1043456  }
   0x9   : > { %1736 = vmatprep.subr.bf16.mxu0 (!%p431_p3), %v1920_v1  ;;  %1867 = vset.pattern.permute.xlu1 (!%p431_p3), %v1922_v2  ;;  %v601_v31 = vshrl.u32 (!%p431_p3), %v600_v30, 7  ;;  %v603_v32 = vand.u32 (!%p431_p3), 127, %v600_v30  ;;  %v1205_v56 = vunpack.c.l.s4 (!%p431_p3), %v1928_v55  ;;  %vm967_vm12 = vcmask (!%p431_p3), 1041408   ;;  %s1930_s27 = smov (!%p431_p3), 16  }
   0xa   : > { %1865 = vset.pattern.permute.xlu0 (!%p431_p3), %v1923_v3  ;;  %1750 = vmatprep.mubr.msk.bf16.mxu1 (!%p431_p3), %vm1921_vm0, %v1920_v1  ;;  %vm1015_vm13 = vcmask (!%p431_p3), 125952   ;;  %vm1462_vm14 = vcmask (!%p431_p3), 257152  }
   0xb   : > { %v604_v33 = vsub.s32 (!%p431_p3), %v603_v32, %v601_v31  ;;  %v1206_v57 = vunpack.c.0.s8 (!%p431_p3), %v1205_v56 }
   0xd   : > { %v2085_v34 = vadd.s32 (!%p431_p3), 4294967295, %v604_v33  ;;  %v2117_v59 = vsub.s32 (!%p431_p3), %v1206_v57, %v601_v31 }
   0xe   : > { %s2276_s13 = smov (!%p521_p4, %s1910_s13), 1 }
   0xf   : > { %s2018_s19 = sshll.u32 %s2276_s13, 2  ;;  %s2021_s20 = sshll.u32 %s2276_s13, 3  ;;  %vm609_vm2 = vcmp.eq.s32.totalorder %v2085_v34, 0  ;;  %vm610_vm3 = vcmp.eq.s32.totalorder %v2085_v34, 1  ;;  %vm611_vm4 = vcmp.eq.s32.totalorder %v2085_v34, 2  ;;  %vm612_vm5 = vcmp.eq.s32.totalorder %v2085_v34, 3 }
  0x10   : > { %s527_s23 = scalar_lea.vmem %s2258_s0, %s2018_s19  ;;  %s535_s26 = scalar_lea.vmem %s2259_s1, %s2021_s20  ;;  %vm606_vm6 = vcmp.ge.s32.totalorder %v2085_v34, 0  ;;  %vm607_vm7 = vcmp.lt.s32.totalorder %v2085_v34, 4 }
  0x11   : > { %v2031_v4 = vld [vmem:[%s527_s23] sm:$0xf]  ;;  %s1695_s29 = sadd.s32 4, %s2021_s20  ;;  %s1663_s30 = sshll.u32 %s2276_s13, 1  ;;  %vm2101_vm8 = vmand %vm606_vm6, %vm607_vm7 }
  0x12   : > { %v613_v6 = vunpack.c.l.bf16 %v2031_v4  ;;  %v2037_v7 = vld [vmem:[%s535_s26] sm:$0xf]  ;;  %s544_s17 = scalar_lea.vmem %s2260_s2, %s1695_s29  ;;  %s567_s22 = scalar_lea.vmem %s2263_s5, %s1663_s30 }
  0x13   : > { %v702_v10 = vsel %vm628_vm1, %v2037_v7, 0  ;;  %v2061_v11 = vld [vmem:[%s544_s17] sm:$0xf]  ;;  %s1926_s23 = smov 112   ;;  %s1927_s26 = smov 120   ;;  %v1680_v58 = vcombine.low %v2037_v7, %v2037_v7 }
  0x14   : > { %v620_v8 = vadd.f32 %v1668_v5, %v613_v6  ;;  %v2063_v12 = vld [vmem:[%s567_s22] sm:$0x3]  ;;  %v749_v13 = vsel %vm628_vm1, %v2061_v11, 0  ;;  %v1682_v60 = vcombine.low %v2061_v11, %v2061_v11  ;;  %s578_s11 = scalar_lea.vmem %s2265_s7, %s2018_s19  ;;  %s562_s18 = scalar_lea.vmem %s2262_s4, %s1695_s29 }
  0x15   : > { %v793_v14 = vsel %vm628_vm1, %v2063_v12, 0  ;;  %v1210_v61 = vrot.slane %v2063_v12, %v2117_v59  ;;  %v2130_v62 = vld [vmem:[%s578_s11] sm:$0xf]  ;;  %s553_s22 = scalar_lea.vmem %s2261_s3, %s2021_s20  ;;  %s571_s25 = scalar_lea.vmem %s2264_s6, %s1663_s30 }
  0x16   : > { %v621_v9 = vpack.c.bf16 %v620_v8, %v620_v8  ;;  %1749 = vmatpush3.bf16.xpose.msra.mxu1 %v793_v14  ;;  %v791_v63 = vunpack.c.l.bf16 %v2130_v62  ;;  %v1679_v8 = vcombine.low %v2031_v4, %v2031_v4  ;;  %s1929_s13 = smov 124  }
  0x17   : > { %1772 = vmatprep.subr.bf16.mxu1 %v1920_v1 }
  0x18   : > { %1733 = vmatmul.mubr.msk.bf16.vlgmr.msra.gmra.mrb[0].mxu0 %vm628_vm1, %v621_v9 }
  0x19   : > { %1737 = vmatpush3.bf16.xpose.msra.mxu0 %v702_v10  ;;  %1738 = vmatprep.mubr.msk.bf16.mxu0 %vm1921_vm0, %v1920_v1  ;;  %v2145_v10 = vld [vmem:[%s562_s18] sm:$0xf] }
  0x1a   : > { %1742 = vmatprep.subr.bf16.mxu0 %v1920_v1  ;;  %v875_v11 = vsel %vm873_vm11, %v2145_v10, 0 }
  0x1d   : > { %1751 = vmatmul.mubr.msk.bf16.vlgmr.msra.gmra.mrb[0].mxu1 %vm628_vm1, %v2031_v4 }
  0x1e   : > { %1774 = vmatprep.mubr.msk.bf16.mxu1 %vm1921_vm0, %v1920_v1  ;;  %1773 = vmatpush3.bf16.msra.mxu1 %v1874_v25 }
  0x1f   : > { %1778 = vmatprep.subr.bf16.mxu1 %v1920_v1 }
  0x20   : > { %1739 = vmatmul.mubr.msk.bf16.vlgmr.msra.gmra.mrb[4].mxu0 %vm628_vm1, %v2031_v4 }
  0x21   : > { %1744 = vmatprep.mubr.msk.bf16.mxu0 %vm1921_vm0, %v1920_v1  ;;  %1743 = vmatpush3.bf16.xpose.msra.mxu0 %v749_v13 }
  0x22   : > { %1754 = vmatprep.subr.bf16.mxu0 %v1920_v1 }
  0x28   : > { %1745 = vmatmul.mubr.msk.bf16.vlgmr.msra.gmra.mrb[8].mxu0 %vm628_vm1, %v2031_v4 }
  0x29   : > { %1756 = vmatprep.mubr.msk.bf16.mxu0 %vm1921_vm0, %v1920_v1  ;;  %1755 = vmatpush3.bf16.msra.mxu0 %v875_v11 }
  0x2a   : > { %1760 = vmatprep.subr.bf16.mxu0 %v1920_v1 }
  0xeb   : > { %v666_v15 = vpop.f32.mrb[0].mxu0 }
  0xec   : > { %686 = vperm.xlu1 %1867, %v666_v15   ;;  %674 = vperm.xlu0 %1865, %v666_v15   ;;  %v1734_v16 = vpop.f32.mrb[1].mxu0 }
  0xed   : > { %v669_v17 = vpop.f32.mrb[2].mxu0 }
  0xee   : > { %v1735_v18 = vpop.f32.mrb[3].mxu0 }
  0xf0   : > { %1868 = vset.pattern.permute.xlu1 %v1924_v19  ;;  %1866 = vset.pattern.permute.xlu0 %v1925_v20  ;;  %v829_v37 = vpop.f32.mrb[0].mxu1 }
  0xf1   : > { %692 = vperm.xlu1 %1868, %v666_v15   ;;  %680 = vperm.xlu0 %1866, %v666_v15   ;;  %v1752_v38 = vpop.f32.mrb[1].mxu1  ;;  %v830_v5 = vadd.f32 %v829_v37, %v791_v63 }
  0xf2   : > { %v832_v39 = vpop.f32.mrb[2].mxu1 }
  0xf3   : > { %v738_v21 = vpop.f32.mrb[4].mxu0  ;;  %v1753_v40 = vpop.f32.mrb[3].mxu1  ;;  %v844_v7 = vsel %vm843_vm10, %v830_v5, -inf }
  0xf4   : > { %v1740_v22 = vpop.f32.mrb[5].mxu0 }
  0xf5   : > { %1018 = vrot.lane.b32.xlu1 %v621_v9, %s1926_s23  ;;  %1869 = vset.pattern.permute.xlu0 %v1923_v3  ;;  %v741_v23 = vpop.f32.mrb[6].mxu0 }
  0xf6   : > { %1870 = vset.pattern.permute.xlu1 %v1925_v20  ;;  %v1741_v24 = vpop.f32.mrb[7].mxu0 }
  0xfb   : > { %v785_v26 = vpop.f32.mrb[8].mxu0 }
  0xfc   : > { %v1746_v27 = vpop.f32.mrb[9].mxu0 }
  0xfd   : > { %v788_v28 = vpop.f32.mrb[10].mxu0  ;;  %v590_v27 = vld [vmem:[%s553_s22] sm:$0xf] }
  0xfe   : > { %v1747_v29 = vpop.f32.mrb[11].mxu0  ;;  %v921_v30 = vsel %vm873_vm11, %v590_v27, 0 }
 0x16b   : > { %v687_v35 = vpop.permute.xlu1 %686  ;;  %v675_v36 = vpop.permute.xlu0 %674 }
 0x16c   : > { %v677_v43 = vsel %vm609_vm2, %v675_v36, 0.0  ;;  %v689_v46 = vsel %vm611_vm4, %v687_v35, 0.0  ;;  %v593_v35 = vld [vmem:[%s571_s25] sm:$0x3] }
 0x16d   : > { %v969_v37 = vsel %vm967_vm12, %v593_v35, 0  ;;  %v1403_v62 = vrot.slane %v593_v35, %v2117_v59 }
 0x170   : > { %v693_v41 = vpop.permute.xlu1 %692  ;;  %v681_v42 = vpop.permute.xlu0 %680 }
 0x171   : > { %v683_v44 = vsel %vm610_vm3, %v681_v42, 0.0  ;;  %v695_v49 = vsel %vm612_vm5, %v693_v41, 0.0 }
 0x172   : > { %v684_v45 = vadd.f32 %v683_v44, %v677_v43 }
 0x174   : > { %v690_v47 = vadd.f32 %v689_v46, %v684_v45  ;;  %v1019_v48 = vpop.permute.xlu1 %1018 }
 0x175   : > { %1775 = vmatmul.mubr.msk.bf16.vlgmr.msra.gmra.mrb[4].mxu1 %vm628_vm1, %v1019_v48 }
 0x176   : > { %v696_v51 = vadd.f32 %v695_v49, %v690_v47  ;;  %1780 = vmatprep.mubr.msk.bf16.mxu1 %vm1921_vm0, %v1920_v1 }
 0x178   : > { %v697_v52 = vsel %vm2101_vm8, %v696_v51, -1e+30 }
 0x179   : > { %v2110_v53 = vadd.f32 %v738_v21, %v697_v52  ;;  %745 = vrot.lane.b32.xlu0 %v697_v52, %s1927_s26 }
 0x17b   : > { %v836_v54 = vsel %vm835_vm9, %v2110_v53, -inf }
 0x17c   : > { %837 = vmax.xlane.f32.xlu1 %v836_v54 }
 0x18d   : > { %1103 = vrot.lane.b32.xlu1 %v1680_v58, %s1926_s23 }
 0x191   : > { %1154 = vrot.lane.b32.xlu1 %v1682_v60, %s1926_s23 }
 0x195   : > { %1211 = vrot.lane.b32.xlu1 %v1210_v61, %s1926_s23 }
 0x1eb   : > { %v746_v0 = vpop.permute.xlu0 %745 }
 0x1ec   : > { %v786_v3 = vadd.f32 %v785_v26, %v746_v0 }
 0x1ee   : > { %v839_v6 = vsel %vm835_vm9, %v786_v3, -inf }
 0x1ef   : > { %840 = vmax.xlane.f32.xlu0 %v839_v6 }
 0x1f3   : > { %845 = vmax.xlane.f32.xlu0 %v844_v7 }
 0x209   : > { %v838_v9 = vpop.xlane.xlu1 %837  ;;  %1098 = vrot.lane.b32.xlu0 %v1679_v8, %s1926_s23  ;;  %v1687_v8 = vcombine.low %v590_v27, %v590_v27 }
 0x20d   : > { %v1104_v12 = vpop.permute.xlu1 %1103 }
 0x20e   : > { %v1109_v4 = vsel %vm628_vm1, %v1104_v12, 0 }
 0x20f   : > { %1779 = vmatpush3.bf16.xpose.msra.mxu1 %v1109_v4 }
 0x210   : > { %1784 = vmatprep.subr.bf16.mxu1 %v1920_v1 }
 0x211   : > { %v1155_v21 = vpop.permute.xlu1 %1154 }
 0x212   : > { %v1161_v24 = vsel %vm628_vm1, %v1155_v21, 0 }
 0x215   : > { %v1212_v39 = vpop.permute.xlu1 %1211 }
 0x216   : > { %v1218_v40 = vsel %vm628_vm1, %v1212_v39, 0 }
 0x248   : > { %v1063_v13 = vpop.f32.mrb[4].mxu1 }
 0x249   : > { %1077 = vperm.xlu1 %1870, %v1063_v13   ;;  %1071 = vperm.xlu0 %1869, %v1063_v13   ;;  %v1776_v14 = vpop.f32.mrb[5].mxu1 }
 0x24a   : > { %v1066_v15 = vpop.f32.mrb[6].mxu1 }
 0x24b   : > { %v1777_v16 = vpop.f32.mrb[7].mxu1 }
 0x24d   : > { %1871 = vset.pattern.permute.xlu1 %v1922_v2  ;;  %1872 = vset.pattern.permute.xlu0 %v1924_v19 }
 0x24e   : > { %1083 = vperm.xlu1 %1871, %v1063_v13   ;;  %1089 = vperm.xlu0 %1872, %v1063_v13  }
 0x27c   : > { %v841_v17 = vpop.xlane.xlu0 %840 }
 0x27d   : > { %v842_v18 = vmax.f32 %v838_v9, %v841_v17 }
 0x280   : > { %v846_v20 = vpop.xlane.xlu0 %845 }
 0x281   : > { %v847_v22 = vmax.f32 %v842_v18, %v846_v20  ;;  %v1685_v20 = vcombine.low %v2145_v10, %v2145_v10 }
 0x283   : > { %v851_v23 = vsub.f32 %v786_v3, %v847_v22  ;;  %v848_v2 = vsub.f32 %v2110_v53, %v847_v22  ;;  %v854_v31 = vsub.f32 %v830_v5, %v847_v22 }
 0x284   : > { %v1099_v25 = vpop.permute.xlu0 %1098 }
 0x285   : > { %v852_v26 = vmul.f32 1.442695, %v851_v23  ;;  %1781 = vmatmul.mubr.msk.bf16.vlgmr.msra.gmra.mrb[8].mxu1 %vm628_vm1, %v1099_v25  ;;  %v849_v19 = vmul.f32 1.442695, %v848_v2  ;;  %v855_v32 = vmul.f32 1.442695, %v854_v31 }
 0x286   : > { %1785 = vmatpush3.bf16.xpose.msra.mxu1 %v1161_v24  ;;  %1786 = vmatprep.mubr.msk.bf16.mxu1 %vm1921_vm0, %v1920_v1 }
 0x287   : > { %1796 = vmatprep.subr.bf16.mxu1 %v1920_v1  ;;  %1880 = vpow2.f32 %v852_v26 }
 0x288   : > { %1882 = vpow2.f32 %v849_v19 }
 0x289   : > { %1884 = vpow2.f32 %v855_v32 }
 0x28d   : > { %1787 = vmatmul.mubr.msk.bf16.vlgmr.msra.gmra.mrb[12].mxu1 %vm628_vm1, %v1099_v25 }
 0x28e   : > { %1798 = vmatprep.mubr.msk.bf16.mxu1 %vm1921_vm0, %v1920_v1 }
 0x291   : > { %v2167_v28 = vpop.eup %1880 }
 0x292   : > { %v869_v29 = vpack.c.bf16 %v2167_v28, %v2167_v28  ;;  %v2181_v33 = vpop.eup %1882 }
 0x293   : > { %v868_v36 = vpack.c.bf16 %v2181_v33, %v2181_v33  ;;  %v2190_v38 = vpop.eup %1884 }
 0x294   : > { %1757 = vmatmul.mubr.msk.bf16.vlgmr.msra.gmra.mrb[12].mxu0 %vm835_vm9, %v869_v29  ;;  %v963_v41 = vpack.c.bf16 %v2190_v38, %v2190_v38 }
 0x295   : > { %1761 = vmatpush3.bf16.msra.mxu0 %v921_v30  ;;  %1762 = vmatprep.mubr.msk.bf16.mxu0 %vm1921_vm0, %v1920_v1 }
 0x296   : > { %1766 = vmatprep.subr.bf16.mxu0 %v1920_v1 }
 0x2a0   : > { %1763 = vmatmul.mubr.msk.bf16.vlgmr.msra.gmra.mrb[12].mxu0 %vm835_vm9, %v868_v36 }
 0x2a1   : > { %1767 = vmatpush3.bf16.msra.mxu0 %v969_v37  ;;  %1768 = vmatprep.mubr.msk.bf16.mxu0 %vm1921_vm0, %v1920_v1 }
 0x2a2   : > { %1790 = vmatprep.subr.bf16.mxu0 %v1920_v1 }
 0x2ac   : > { %1769 = vmatmul.mubr.msk.bf16.vlgmr.msra.gmra.mrb[12].mxu0 %vm843_vm10, %v963_v41 }
 0x2ad   : > { %1791 = vmatpush3.bf16.xpose.msra.mxu0 %v1218_v40  ;;  %1792 = vmatprep.mubr.msk.bf16.mxu0 %vm1921_vm0, %v1920_v1 }
 0x2b4   : > { %1793 = vmatmul.mubr.msk.bf16.vlgmr.msra.gmra.mrb[16].mxu0 %vm628_vm1, %v1099_v25 }
 0x2c8   : > { %v1078_v42 = vpop.permute.xlu1 %1077  ;;  %v1072_v43 = vpop.permute.xlu0 %1071 }
 0x2c9   : > { %v1080_v44 = vsel %vm610_vm3, %v1078_v42, 0.0  ;;  %v1074_v45 = vsel %vm609_vm2, %v1072_v43, 0.0  ;;  %v860_v43 = vsel %vm835_vm9, %v2167_v28, 0.0 }
 0x2ca   : > { %v1081_v46 = vadd.f32 %v1080_v44, %v1074_v45  ;;  %v857_v44 = vsel %vm835_vm9, %v2181_v33, 0.0 }
 0x2cd   : > { %v1084_v47 = vpop.permute.xlu1 %1083  ;;  %v1090_v48 = vpop.permute.xlu0 %1089 }
 0x2ce   : > { %v1086_v49 = vsel %vm611_vm4, %v1084_v47, 0.0  ;;  %v1092_v51 = vsel %vm612_vm5, %v1090_v48, 0.0 }
 0x2cf   : > { %v1087_v52 = vadd.f32 %v1086_v49, %v1081_v46  ;;  %v864_v46 = vsel %vm843_vm10, %v2190_v38, 0.0 }
 0x2d1   : > { %v1093_v53 = vadd.f32 %v1092_v51, %v1087_v52 }
 0x2d3   : > { %v1094_v54 = vsel %vm2101_vm8, %v1093_v53, -1e+30 }
 0x2d4   : > { %1157 = vrot.lane.b32.xlu1 %v1094_v54, %s1927_s26  ;;  %s585_s26 = scalar_lea.vmem %s2268_s10, %s2018_s19 }
 0x2d8   : > { %1214 = vrot.lane.b32.xlu1 %v791_v63, %s1929_s13 }
 0x346   : > { %v1158_v34 = vpop.permute.xlu1 %1157 }
 0x34a   : > { %v1215_v4 = vpop.permute.xlu1 %1214 }
 0x358   : > { %v1145_v55 = vpop.f32.mrb[8].mxu1 }
 0x359   : > { %v1146_v56 = vadd.f32 %v1145_v55, %v1094_v54  ;;  %v1782_v57 = vpop.f32.mrb[9].mxu1 }
 0x35a   : > { %v1148_v58 = vpop.f32.mrb[10].mxu1 }
 0x35b   : > { %v1260_v60 = vsel %vm835_vm9, %v1146_v56, -inf  ;;  %v1783_v61 = vpop.f32.mrb[11].mxu1 }
 0x35c   : > { %1261 = vmax.xlane.f32.xlu0 %v1260_v60 }
 0x360   : > { %v1197_v0 = vpop.f32.mrb[12].mxu1 }
 0x361   : > { %v1198_v3 = vadd.f32 %v1197_v0, %v1158_v34  ;;  %v1788_v5 = vpop.f32.mrb[13].mxu1 }
 0x362   : > { %v1200_v50 = vpop.f32.mrb[14].mxu1 }
 0x363   : > { %v1263_v6 = vsel %vm835_vm9, %v1198_v3, -inf  ;;  %v1789_v7 = vpop.f32.mrb[15].mxu1 }
 0x364   : > { %1264 = vmax.xlane.f32.xlu1 %v1263_v6 }
 0x375   : > { %1347 = vrot.lane.b32.xlu1 %v1687_v8, %s1926_s23 }
 0x379   : > { %1404 = vrot.lane.b32.xlu1 %v1403_v62, %s1926_s23 }
 0x37f   : > { %v2217_v63 = vpop.f32.mrb[12].mxu0 }
 0x380   : > { %v1770_v9 = vpop.f32.mrb[13].mxu0 }
 0x381   : > { %v1008_v11 = vpop.f32.mrb[14].mxu0 }
 0x382   : > { %v1771_v12 = vpop.f32.mrb[15].mxu0 }
 0x387   : > { %v1254_v13 = vpop.f32.mrb[16].mxu0 }
 0x388   : > { %v1255_v14 = vadd.f32 %v1254_v13, %v1215_v4  ;;  %v1794_v15 = vpop.f32.mrb[17].mxu0 }
 0x389   : > { %v1257_v16 = vpop.f32.mrb[18].mxu0 }
 0x38a   : > { %v1795_v17 = vpop.f32.mrb[19].mxu0  ;;  %v1267_v18 = vsel %vm843_vm10, %v1255_v14, -inf }
 0x38b   : > { %1268 = vmax.xlane.f32.xlu0 %v1267_v18 }
 0x3a1   : > { %1296 = vrot.lane.b32.xlu0 %v1685_v20, %s1926_s23 }
 0x3e9   : > { %v1262_v59 = vpop.xlane.xlu0 %1261 }
 0x3f1   : > { %v1265_v21 = vpop.xlane.xlu1 %1264 }
 0x3f2   : > { %v1266_v22 = vmax.f32 %v1262_v59, %v1265_v21 }
 0x3f5   : > { %v1348_v10 = vpop.permute.xlu1 %1347 }
 0x3f6   : > { %v1353_v39 = vsel %vm873_vm11, %v1348_v10, 0 }
 0x3f9   : > { %v1405_v45 = vpop.permute.xlu1 %1404 }
 0x3fa   : > { %v1410_v47 = vsel %vm967_vm12, %v1405_v45, 0 }
 0x418   : > { %v1269_v23 = vpop.xlane.xlu0 %1268 }
 0x419   : > { %v1270_v24 = vmax.f32 %v1266_v22, %v1269_v23 }
 0x41b   : > { %v1271_v25 = vsub.f32 %v1146_v56, %v1270_v24  ;;  %v1274_v26 = vsub.f32 %v1198_v3, %v1270_v24  ;;  %v1277_v2 = vsub.f32 %v1255_v14, %v1270_v24 }
 0x41c   : > { %v1297_v19 = vpop.permute.xlu0 %1296 }
 0x41d   : > { %v1272_v27 = vmul.f32 1.442695, %v1271_v25  ;;  %v1275_v29 = vmul.f32 1.442695, %v1274_v26  ;;  %v1278_v30 = vmul.f32 1.442695, %v1277_v2 }
 0x41e   : > { %v1302_v31 = vsel %vm873_vm11, %v1297_v19, 0 }
 0x41f   : > { %1886 = vpow2.f32 %v1272_v27  ;;  %1797 = vmatpush3.bf16.msra.mxu1 %v1302_v31 }
 0x420   : > { %1888 = vpow2.f32 %v1275_v29  ;;  %1802 = vmatprep.subr.bf16.mxu1 %v1920_v1 }
 0x421   : > { %1890 = vpow2.f32 %v1278_v30 }
 0x429   : > { %v1887_v32 = vpop.eup %1886 }
 0x42a   : > { %v1889_v35 = vpop.eup %1888  ;;  %v1280_v36 = vsel %vm835_vm9, %v1887_v32, 0.0  ;;  %v1291_v48 = vpack.c.bf16 %v1887_v32, %v1887_v32 }
 0x42b   : > { %v1891_v37 = vpop.eup %1890  ;;  %v1283_v40 = vsel %vm835_vm9, %v1889_v35, 0.0  ;;  %1281 = vadd.xlane.f32.xlu0 %v1280_v36  ;;  %v1292_v41 = vpack.c.bf16 %v1889_v35, %v1889_v35 }
 0x42c   : > { %1284 = vadd.xlane.f32.xlu1 %v1283_v40  ;;  %v1287_v42 = vsel %vm843_vm10, %v1891_v37, 0.0  ;;  %v1395_v28 = vpack.c.bf16 %v1891_v37, %v1891_v37 }
 0x42d   : > { %1799 = vmatmul.mubr.msk.bf16.vlgmr.msra.gmra.mrb[16].mxu1 %vm835_vm9, %v1292_v41 }
 0x42e   : > { %1803 = vmatpush3.bf16.msra.mxu1 %v1353_v39  ;;  %1804 = vmatprep.mubr.msk.bf16.mxu1 %vm1921_vm0, %v1920_v1 }
 0x42f   : > { %1288 = vadd.xlane.f32.xlu0 %v1287_v42  ;;  %1808 = vmatprep.subr.bf16.mxu1 %v1920_v1 }
 0x430   : > { %861 = vadd.xlane.f32.xlu1 %v860_v43 }
 0x433   : > { %858 = vadd.xlane.f32.xlu0 %v857_v44 }
 0x437   : > { %865 = vadd.xlane.f32.xlu0 %v864_v46 }
 0x439   : > { %1805 = vmatmul.mubr.msk.bf16.vlgmr.msra.gmra.mrb[16].mxu1 %vm835_vm9, %v1291_v48 }
 0x43a   : > { %1809 = vmatpush3.bf16.msra.mxu1 %v1410_v47  ;;  %1810 = vmatprep.mubr.msk.bf16.mxu1 %vm1921_vm0, %v1920_v1 }
 0x445   : > { %1811 = vmatmul.mubr.msk.bf16.vlgmr.msra.gmra.mrb[16].mxu1 %vm843_vm10, %v1395_v28 }
 0x4b8   : > { %v1282_v33 = vpop.xlane.xlu0 %1281 }
 0x4b9   : > { %v1285_v49 = vpop.xlane.xlu1 %1284 }
 0x4ba   : > { %v1286_v51 = vadd.f32 %v1285_v49, %v1282_v33 }
 0x4bc   : > { %v1289_v52 = vpop.xlane.xlu0 %1288 }
 0x4bd   : > { %v1290_v53 = vadd.f32 %v1289_v52, %v1286_v51  ;;  %v862_v54 = vpop.xlane.xlu1 %861 }
 0x4c0   : > { %v859_v38 = vpop.xlane.xlu0 %858 }
 0x4c1   : > { %v863_v55 = vadd.f32 %v862_v54, %v859_v38 }
 0x4c4   : > { %v866_v56 = vpop.xlane.xlu0 %865 }
 0x4c5   : > { %v867_v57 = vadd.f32 %v866_v56, %v863_v55 }
 0x4c7   : > { %1892 = vrcp.f32 %v867_v57 }
 0x4c8   : > { %1894 = vrcp.f32 %v1290_v53 }
 0x4d1   : > { %v1893_v58 = vpop.eup %1892 }
 0x4d2   : > { %v1013_v60 = vmul.f32 %v1893_v58, %v2217_v63  ;;  %v1895_v61 = vpop.eup %1894 }
 0x4d4   : > { %v1014_v1 = vpack.c.bf16 %v1013_v60, %v1013_v60 }
 0x4d6   : > { %1016 = vst.msk [vmem:[%s585_s26] sm:$0xf] %vm1015_vm13, %v1014_v1 }
 0x518   : > { %v1446_v34 = vpop.f32.mrb[16].mxu1 }
 0x519   : > { %v1454_v0 = vmul.f32 %v1895_v61, %v1446_v34  ;;  %v1812_v3 = vpop.f32.mrb[17].mxu1 }
 0x51a   : > { %v1449_v5 = vpop.f32.mrb[18].mxu1 }
 0x51b   : > { %v1699_v50 = vpack.c.bf16 %v1454_v0, %v1454_v0  ;;  %v1813_v6 = vpop.f32.mrb[19].mxu1 }
 0x51d   : > { %1459 = vrot.lane.b32.xlu1 %v1699_v50, %s1930_s27 }
 0x58f   : > { %v1460_v7 = vpop.permute.xlu1 %1459 }
 0x590   : > { %1463 = vst.msk [vmem:[%s585_s26] sm:$0xf] %vm1462_vm14, %v1460_v7 }
 0x591 PF: > { %s20_s15 = sadd.s32 1, %s1918_s15   ;;  %s2271_s13 = smov %s1914_s14 }
 0x592   : > { %p17_p5 = scmp.ge.s32.totalorder %s20_s15, 4   ;;  %s2272_s14 = smov %s2274_s16 }
 0x594   :  { %19 = sbr.rel (!%p17_p5) target bundleno = 2 (0x2), region = 111 }

// kernel: model_forward.61
= control target key start
LH: loop header
LB: loop body
LE: loop exit
PB: predicated region body
PF: predicated region fallthrough
CT: control target
= control target key end

     0   :  { %v204_v1 = vmov 0.0   ;;  %vm205_vm0 = vmmov 0   ;;  %vm20_vm1 = vcmask 523264   ;;  %s266_s0 = inlined_call_operand.vmem [shape: f32[16,32], index: 0, kind: input, shape index: {}]   ;;  %s267_s1 = inlined_call_operand.vmem [shape: bf16[32,64], index: 1, kind: input, shape index: {}]   ;;  %s268_s2 = inlined_call_operand.vmem [shape: f32[1,64], index: 2, kind: input, shape index: {}]   ;;  %s269_s3 = inlined_call_operand.hbm [shape: f32[16,64], index: 3, kind: output, shape index: {}]  }
   0x1   :  { %v170_v0 = vld [vmem:[%s267_s1] sm:$0xff]   ;;  %157 = vmatprep.subr.bf16.mxu0 %v204_v1  ;;  %v171_v2 = vld [vmem:[%s267_s1 + $0x8] sm:$0xff]   ;;  %161 = vmatprep.mubr.msk.bf16.mxu0 %vm205_vm0, %v204_v1 }
   0x2   :  { %158 = vmatpush3.bf16.msra.mxu0 %v170_v0  ;;  %v25_v3 = vld [vmem:[%s266_s0] sm:$0xff]  ;;  %v26_v4 = vld [vmem:[%s266_s0 + $0x8] sm:$0xff] }
   0x3   :  { %8 = vsyncpa [#allocation4], 0  ;;  %159 = vmatprep.subr.bf16.mxu0 %v204_v1  ;;  %21 = vst.msk [vmem:[#allocation2] sm:$0xff] %vm20_vm1, %v204_v1  ;;  %v27_v5 = vpack.c.bf16 %v26_v4, %v25_v3  ;;  %vm44_vm2 = vcmask 261120   ;;  %v153_v14 = vld [vmem:[%s268_s2] ss:$0 sm:$0xff] }
   0x4   :  { %22 = vst.msk [vmem:[#allocation2 + $0x8] sm:$0xff] %vm20_vm1, %v204_v1  ;;  %s206_s2 = smov [#allocation3]  }
   0x5   :  { %s139_s20 = sshll.u32 %s206_s2, 4  ;;  %s140_s20 = int_to_ptr.vmem [resolvable:$true] %s139_s20 }
   0x6   :  { %160 = vmatpush3.bf16.msra.mxu0 %v171_v2  ;;  %s180_s21 = scalar_lea.vmem %s140_s20, 256  ;;  %p185_p1 = scmp.lt.s32.totalorder %s140_s20, %s140_s20 }
   0x7   :  { %p181_p0 = scmp.ne.s32.totalorder %s140_s20, %s180_s21  ;;  %p186_p2 = scmp.lt.s32.totalorder %s180_s21, %s180_s21 }
   0x9   :  { %162 = vmatmul.mubr.msk.bf16.vlgmr.msra.gmra.mrb[0].mxu0 %vm44_vm2, %v27_v5  ;;  %p187_p3 = por %p186_p2, %p185_p1 }
   0xa   :  { %v23_v6 = vld [vmem:[#allocation2] sm:$0xff] }
   0xb   :  { %v24_v8 = vld [vmem:[#allocation2 + $0x8] sm:$0xff]  ;;  %p188_p4 = pnand %p187_p3, %p181_p0 }
  0xdc   :  { %v82_v7 = vpop.f32.mrb[0].mxu0 }
  0xdd   :  { %v89_v9 = vadd.f32 %v82_v7, %v23_v6  ;;  %v163_v10 = vpop.f32.mrb[1].mxu0 }
  0xde   :  { %v85_v11 = vpop.f32.mrb[2].mxu0 }
  0xdf   :  { %92 = vst.msk [vmem:[#allocation2] sm:$0xff] %vm20_vm1, %v89_v9  ;;  %v90_v12 = vadd.f32 %v85_v11, %v24_v8  ;;  %v164_v13 = vpop.f32.mrb[3].mxu0 }
  0xe1   :  { %93 = vst.msk [vmem:[#allocation2 + $0x8] sm:$0xff] %vm20_vm1, %v90_v12 }
  0xe6   :  { %v97_v15 = vld [vmem:[#allocation2] sm:$0xff] }
  0xe7   :  { %v106_v16 = vadd.f32 %v153_v14, %v97_v15 }
  0xe8   :  { %v98_v17 = vld [vmem:[#allocation2 + $0x8] sm:$0xff] }
  0xe9   :  { %v108_v18 = vsel %vm20_vm1, %v106_v16, -inf  ;;  %v107_v19 = vadd.f32 %v153_v14, %v98_v17 }
  0xea   :  { %109 = vmax.xlane.f32.xlu0 %v108_v18 }
  0xeb   :  { %v111_v20 = vsel %vm20_vm1, %v107_v19, -inf }
  0xee   :  { %112 = vmax.xlane.f32.xlu0 %v111_v20 }
 0x177   :  { %v110_v21 = vpop.xlane.xlu0 %109 }
 0x178   :  { %v114_v22 = vsub.f32 %v106_v16, %v110_v21 }
 0x17a   :  { %v116_v23 = vmul.f32 1.442695, %v114_v22 }
 0x17b   :  { %v113_v24 = vpop.xlane.xlu0 %112 }
 0x17c   :  { %172 = vpow2.f32 %v116_v23  ;;  %v115_v25 = vsub.f32 %v107_v19, %v113_v24 }
 0x17e   :  { %v118_v26 = vmul.f32 1.442695, %v115_v25 }
 0x180   :  { %174 = vpow2.f32 %v118_v26 }
 0x186   :  { %v173_v27 = vpop.eup %172 }
 0x187   :  { %v120_v28 = vsel %vm20_vm1, %v173_v27, 0.0 }
 0x188   :  { %121 = vadd.xlane.f32.xlu1 %v120_v28 }
 0x18a   :  { %v175_v29 = vpop.eup %174 }
 0x18b   :  { %v123_v30 = vsel %vm20_vm1, %v175_v29, 0.0 }
 0x18c   :  { %124 = vadd.xlane.f32.xlu1 %v123_v30 }
 0x215   :  { %v122_v31 = vpop.xlane.xlu1 %121 }
 0x216   :  { %176 = vlog2.f32 %v122_v31 }
 0x219   :  { %v125_v32 = vpop.xlane.xlu1 %124 }
 0x21a   :  { %178 = vlog2.f32 %v125_v32 }
 0x220   :  { %v177_v33 = vpop.eup %176 }
 0x221   :  { %v127_v34 = vmul.f32 0.6931472, %v177_v33 }
 0x223   :  { %v130_v35 = vsub.f32 %v114_v22, %v127_v34 }
 0x224   :  { %v179_v36 = vpop.eup %178 }
 0x225   :  { %132 = vst.msk [vmem:[#allocation3] sm:$0xff] %vm20_vm1, %v130_v35  ;;  %v129_v37 = vmul.f32 0.6931472, %v179_v36 }
 0x227   :  { %v131_v38 = vsub.f32 %v115_v25, %v129_v37 }
 0x229   :  { %133 = vst.msk [vmem:[#allocation3 + $0x8] sm:$0xff] %vm20_vm1, %v131_v38 }
 0x22a   :  { %191 = shalt.err (!%p188_p4)
}
 0x22b   :  { %s192_s24 = scalar_lea.hbm %s269_s3, 256 }
 0x22c   :  { %p193_p5 = scmp.ne.s32.totalorder %s269_s3, %s192_s24  ;;  %p196_p6 = scmp.lt.u32.totalorder %s192_s24, %s269_s3 }
 0x22e   :  { %p198_p7 = pnand %p196_p6, %p193_p5 }
 0x230   :  { %201 = shalt.err (!%p198_p7)
}
 0x231   :  { %s207_s29 = smov 128   ;;  %s208_s30 = smov 8  }
 0x232   :  { %145 = dma.vmem_to_hbm [thread:$0]  %s140_s20, 256, %s269_s3, [#allocation4], %s207_s29, %s207_s29, %s208_s30  }
 0x233   :  { %202 = dma.done.wait [#allocation4], 256  }
 0x234   :  { %203 = vsyncadd [#allocation4], 4294967040 }
 0x235   :  { %149 = vsyncpa [#allocation4], 1 }

</bundles_post_ra>
